<compile_context>
chip_gen: v6e
topology: v6e:2x2x1
jax: 0.10.0
libtpu: 0.0.40
codegen_flags: <defaults>
</compile_context>

<pallas_src>
import functools
import math

import jax
import jax.numpy as jnp
from jax import lax
from jax.experimental import pallas as pl
from jax.experimental.pallas import tpu as pltpu


# Batch/tile-invariant ("weight-like") kernel inputs, in order.
WEIGHT_NAMES = [
    "sa_norm", "wq_sa", "wk_sa", "wv_sa", "wo_sa", "mlp_norm_sa", "wg_sa", "wd_sa",
    "ca_norm", "wq_ca", "wk_ca", "wv_ca", "wo_ca", "mlp_norm_ca", "wg_ca", "wd_ca",
]


# ----------------------------- math helpers (shared kernel / reference) ------

def _rmsnorm(x, w, eps=1e-6):
    # x: [S, D] f32, w: [1, D] f32
    ms = jnp.mean(x * x, axis=-1, keepdims=True)
    return x * lax.rsqrt(ms + eps) * w


def _mm(a, w):
    # bf16 MXU matmul with f32 accumulation.
    return jnp.dot(a.astype(jnp.bfloat16), w.astype(jnp.bfloat16),
                   preferred_element_type=jnp.float32)


def _silu(x, approx):
    d = 1.0 + jnp.exp(-x)
    inv = pl.reciprocal(d, approx=True) if approx else 1.0 / d
    return x * inv


def _apply_rope_half(x, cos, sin, n_heads, head_dim):
    """Rotate-half RoPE on per-head 'split halves' layout.

    x: [N, n_heads*head_dim] whose per-head features are ordered
    [even originals..., odd originals...] (done via weight-column permutation
    in the wrapper), cos/sin: [N, head_dim//2].
    Equivalent to torchtune's interleaved RotaryPositionalEmbeddings.
    """
    n = x.shape[0]
    h2 = head_dim // 2
    x3 = x.reshape(n, n_heads, head_dim)
    x1 = x3[..., :h2]
    x2 = x3[..., h2:]
    c = cos[:, None, :]
    s = sin[:, None, :]
    r1 = x1 * c - x2 * s
    r2 = x2 * c + x1 * s
    return jnp.concatenate([r1, r2], axis=-1).reshape(n, n_heads * head_dim)


def _attention(q, k, v, n_heads, n_kv_heads, head_dim, *, causal, q_offset, approx):
    """Batched-head GQA attention.

    q: [Sq, H*hd], k/v: [Sk, Hkv*hd] -> [Sq, H*hd].  Heads are computed with two
    batched bf16 einsums; softmax in f32.
    """
    sq, sk = q.shape[0], k.shape[0]
    scale = 1.0 / math.sqrt(head_dim)
    q_per_kv = n_heads // n_kv_heads

    qh = q.reshape(sq, n_heads, head_dim).transpose(1, 0, 2)        # [H, Sq, hd]
    kh = k.reshape(sk, n_kv_heads, head_dim).transpose(1, 0, 2)     # [Hkv, Sk, hd]
    vh = v.reshape(sk, n_kv_heads, head_dim).transpose(1, 0, 2)
    if q_per_kv > 1:  # expand KV heads to match query heads (GQA)
        kh = jnp.broadcast_to(kh[:, None],
                              (n_kv_heads, q_per_kv, sk, head_dim)
                              ).reshape(n_heads, sk, head_dim)
        vh = jnp.broadcast_to(vh[:, None],
                              (n_kv_heads, q_per_kv, sk, head_dim)
                              ).reshape(n_heads, sk, head_dim)

    scores = jnp.einsum("hqd,hkd->hqk",
                        qh.astype(jnp.bfloat16), kh.astype(jnp.bfloat16),
                        preferred_element_type=jnp.float32) * scale  # [H, Sq, Sk]

    if causal:
        row = lax.broadcasted_iota(jnp.int32, (sq, sk), 0) + q_offset
        col = lax.broadcasted_iota(jnp.int32, (sq, sk), 1)
        scores = jnp.where((row >= col)[None, :, :], scores, -1e30)

    m = jnp.max(scores, axis=-1, keepdims=True)
    p = jnp.exp(scores - m)
    denom = jnp.sum(p, axis=-1, keepdims=True)
    inv = pl.reciprocal(denom, approx=True) if approx else 1.0 / denom
    p = p * inv

    out = jnp.einsum("hqk,hkd->hqd",
                     p.astype(jnp.bfloat16), vh.astype(jnp.bfloat16),
                     preferred_element_type=jnp.float32)             # [H, Sq, hd]
    return out.transpose(1, 0, 2).reshape(sq, n_heads * head_dim)


def _decoder_layer_math(x_q, x_full, mem, cos_q, sin_q, cos_k, sin_k, w, *,
                        n_heads, n_kv_heads, head_dim, q_offset, approx):
    """Forward for one query tile: x_q [TQ, D], x_full [S, D], mem [M, D]."""
    x_q = x_q.astype(jnp.float32)
    x_full = x_full.astype(jnp.float32)
    mem = mem.astype(jnp.float32)

    # ---- self-attention sublayer (causal, GQA, RoPE) ----
    hn_q = _rmsnorm(x_q, w["sa_norm"])
    hn_f = _rmsnorm(x_full, w["sa_norm"])
    q = _mm(hn_q, w["wq_sa"])
    k = _mm(hn_f, w["wk_sa"])
    v = _mm(hn_f, w["wv_sa"])
    q = _apply_rope_half(q, cos_q, sin_q, n_heads, head_dim)
    k = _apply_rope_half(k, cos_k, sin_k, n_kv_heads, head_dim)
    attn = _attention(q, k, v, n_heads, n_kv_heads, head_dim,
                      causal=True, q_offset=q_offset, approx=approx)
    h = x_q + _mm(attn, w["wo_sa"])
    # FeedForward with up_proj=None: down(silu(gate(x)))
    h = h + _mm(_silu(_mm(_rmsnorm(h, w["mlp_norm_sa"]), w["wg_sa"]), approx),
                w["wd_sa"])

    # ---- cross-attention sublayer (non-causal, no RoPE) ----
    cn = _rmsnorm(h, w["ca_norm"])
    q2 = _mm(cn, w["wq_ca"])
    k2 = _mm(mem, w["wk_ca"])
    v2 = _mm(mem, w["wv_ca"])
    attn2 = _attention(q2, k2, v2, n_heads, n_kv_heads, head_dim,
                       causal=False, q_offset=0, approx=approx)
    h = h + _mm(attn2, w["wo_ca"])
    h = h + _mm(_silu(_mm(_rmsnorm(h, w["mlp_norm_ca"]), w["wg_ca"]), approx),
                w["wd_ca"])
    return h


# ----------------------------- Pallas kernel ---------------------------------

def decoder_layer_kernel(xq_ref, xf_ref, mem_ref, cq_ref, sq_ref, ck_ref, sk_ref,
                         *rest, n_heads, n_kv_heads, head_dim):
    out_ref = rest[-1]
    w = {name: rest[i][...] for i, name in enumerate(WEIGHT_NAMES)}
    tq = xq_ref.shape[1]
    q_offset = pl.program_id(1) * tq
    y = _decoder_layer_math(
        xq_ref[0], xf_ref[0], mem_ref[0],
        cq_ref[...], sq_ref[...], ck_ref[...], sk_ref[...],
        w, n_heads=n_heads, n_kv_heads=n_kv_heads, head_dim=head_dim,
        q_offset=q_offset, approx=True)
    out_ref[0] = y.astype(out_ref.dtype)


# ----------------------------- wrapper / setup --------------------------------

def _rope_half_tables(seq_len, head_dim, base=10000.0):
    h2 = head_dim // 2
    theta = 1.0 / (base ** (jnp.arange(h2, dtype=jnp.float32) * 2.0 / head_dim))
    pos = jnp.arange(seq_len, dtype=jnp.float32)
    ang = pos[:, None] * theta[None, :]                      # [S, hd//2]
    return jnp.cos(ang), jnp.sin(ang)


def _interleave_to_half_perm(n_heads, head_dim):
    # Per head: [0, 2, 4, ..., hd-2, 1, 3, ..., hd-1]  (even features first).
    base = jnp.concatenate([jnp.arange(0, head_dim, 2),
                            jnp.arange(1, head_dim, 2)])
    offs = jnp.arange(n_heads) * head_dim
    return (offs[:, None] + base[None, :]).reshape(-1)


def _prepare_weights(params, n_heads, n_kv_heads, head_dim):
    """Permute wq/wk columns for rotate-half RoPE; cast projections to bf16."""
    perm_q = _interleave_to_half_perm(n_heads, head_dim)
    perm_k = _interleave_to_half_perm(n_kv_heads, head_dim)
    w = dict(params)
    w["wq_sa"] = params["wq_sa"][:, perm_q]
    w["wk_sa"] = params["wk_sa"][:, perm_k]
    out = {}
    for name in WEIGHT_NAMES:
        arr = w[name]
        if name.startswith("w"):                  # projection weights -> bf16
            arr = arr.astype(jnp.bfloat16)
        out[name] = arr                           # norm scales stay f32
    return out


def transformer_decoder_layer(tgt, memory, params, *, n_heads, n_kv_heads,
                              head_dim, q_tile=None):
    B, S, D = tgt.shape
    _, M, _ = memory.shape
    TQ = q_tile if q_tile is not None else (S if S <= 128 else 128)
    assert S % TQ == 0, "q_tile must divide the target sequence length"
    n_qt = S // TQ
    h2 = head_dim // 2

    cos, sin = _rope_half_tables(S, head_dim)                 # [S, hd//2] f32
    w = _prepare_weights(params, n_heads, n_kv_heads, head_dim)
    weight_inputs = [w[name] for name in WEIGHT_NAMES]

    in_specs = [
        pl.BlockSpec((1, TQ, D), lambda b, qi: (b, qi, 0)),   # query tile
        pl.BlockSpec((1, S, D), lambda b, qi: (b, 0, 0)),     # full seq (self KV)
        pl.BlockSpec((1, M, D), lambda b, qi: (b, 0, 0)),     # encoder memory
        pl.BlockSpec((TQ, h2), lambda b, qi: (qi, 0)),        # cos for query tile
        pl.BlockSpec((TQ, h2), lambda b, qi: (qi, 0)),        # sin for query tile
        pl.BlockSpec((S, h2), lambda b, qi: (0, 0)),          # cos for keys
        pl.BlockSpec((S, h2), lambda b, qi: (0, 0)),          # sin for keys
    ] + [pl.BlockSpec(wi.shape, lambda b, qi: (0, 0)) for wi in weight_inputs]

    kernel = functools.partial(decoder_layer_kernel, n_heads=n_heads,
                               n_kv_heads=n_kv_heads, head_dim=head_dim)

    # TODO(synk): for production d_model/d_ff, stream the FFN weights (k-tiled)
    # instead of keeping all weights resident (v7x has only 64 MiB VMEM).
    return pl.pallas_call(
        kernel,
        out_shape=jax.ShapeDtypeStruct((B, S, D), jnp.float32),
        grid_spec=pltpu.PrefetchScalarGridSpec(
            num_scalar_prefetch=0,
            grid=(B, n_qt),
            in_specs=in_specs,
            out_specs=pl.BlockSpec((1, TQ, D), lambda b, qi: (b, qi, 0)),
        ),
        compiler_params=pltpu.CompilerParams(
            dimension_semantics=("parallel", "parallel")),
    )(tgt, tgt, memory, cos, sin, cos, sin, *weight_inputs)


# ----------------------------- parameter init ---------------------------------

def init_params(key, d_model, n_heads, n_kv_heads, head_dim, d_ff):
    qd = n_heads * head_dim
    kvd = n_kv_heads * head_dim
    keys = jax.random.split(key, 12)

    def xavier(k, fan_in, fan_out):
        lim = math.sqrt(6.0 / (fan_in + fan_out))
        return jax.random.uniform(k, (fan_in, fan_out), jnp.float32, -lim, lim)

    return {
        "sa_norm": jnp.ones((1, d_model), jnp.float32),
        "wq_sa": xavier(keys[0], d_model, qd),
        "wk_sa": xavier(keys[1], d_model, kvd),
        "wv_sa": xavier(keys[2], d_model, kvd),
        "wo_sa": xavier(keys[3], qd, d_model),
        "mlp_norm_sa": jnp.ones((1, d_model), jnp.float32),
        "wg_sa": xavier(keys[4], d_model, d_ff),
        "wd_sa": xavier(keys[5], d_ff, d_model),
        "ca_norm": jnp.ones((1, d_model), jnp.float32),
        "wq_ca": xavier(keys[6], d_model, qd),
        "wk_ca": xavier(keys[7], d_model, kvd),
        "wv_ca": xavier(keys[8], d_model, kvd),
        "wo_ca": xavier(keys[9], qd, d_model),
        "mlp_norm_ca": jnp.ones((1, d_model), jnp.float32),
        "wg_ca": xavier(keys[10], d_model, d_ff),
        "wd_ca": xavier(keys[11], d_ff, d_model),
    }


# ----------------------------- fp32 golden reference ---------------------------
# Original convention: interleaved RoPE, unpermuted weights, fp32 matmuls.

def _rope_interleaved(x, n_heads, head_dim, base=10000.0):
    s = x.shape[0]
    h2 = head_dim // 2
    theta = 1.0 / (base ** (jnp.arange(h2, dtype=jnp.float32) * 2.0 / head_dim))
    ang = jnp.arange(s, dtype=jnp.float32)[:, None] * theta[None, :]
    cos, sin = jnp.cos(ang), jnp.sin(ang)
    x4 = x.reshape(s, n_heads, h2, 2)
    e, o = x4[..., 0], x4[..., 1]
    re = e * cos[:, None, :] - o * sin[:, None, :]
    ro = o * cos[:, None, :] + e * sin[:, None, :]
    return jnp.stack([re, ro], axis=-1).reshape(s, n_heads * head_dim)


def _golden_attention(q, k, v, n_heads, n_kv_heads, head_dim, causal):
    sq, sk = q.shape[0], k.shape[0]
    scale = 1.0 / math.sqrt(head_dim)
    q_per_kv = n_heads // n_kv_heads
    outs = []
    for h in range(n_heads):
        kv = h // q_per_kv
        qh = q[:, h * head_dim:(h + 1) * head_dim]
        kh = k[:, kv * head_dim:(kv + 1) * head_dim]
        vh = v[:, kv * head_dim:(kv + 1) * head_dim]
        s = (qh @ kh.T) * scale
        if causal:
            row = jnp.arange(sq)[:, None]
            col = jnp.arange(sk)[None, :]
            s = jnp.where(row >= col, s, -jnp.inf)
        outs.append(jax.nn.softmax(s, axis=-1) @ vh)
    return jnp.concatenate(outs, axis=-1)


def _golden_layer(x, mem, p, n_heads, n_kv_heads, head_dim):
    def rms(v, w):
        return v * lax.rsqrt(jnp.mean(v * v, -1, keepdims=True) + 1e-6) * w

    hn = rms(x, p["sa_norm"])
    q = hn @ p["wq_sa"]; k = hn @ p["wk_sa"]; v = hn @ p["wv_sa"]
    q = _rope_interleaved(q, n_heads, head_dim)
    k = _rope_interleaved(k, n_kv_heads, head_dim)
    a = _golden_attention(q, k, v, n_heads, n_kv_heads, head_dim, True)
    h = x + a @ p["wo_sa"]
    h = h + jax.nn.silu(rms(h, p["mlp_norm_sa"]) @ p["wg_sa"]) @ p["wd_sa"]

    cn = rms(h, p["ca_norm"])
    q2 = cn @ p["wq_ca"]; k2 = mem @ p["wk_ca"]; v2 = mem @ p["wv_ca"]
    a2 = _golden_attention(q2, k2, v2, n_heads, n_kv_heads, head_dim, False)
    h = h + a2 @ p["wo_ca"]
    h = h + jax.nn.silu(rms(h, p["mlp_norm_ca"]) @ p["wg_ca"]) @ p["wd_ca"]
    return h


# ----------------------------- demo / self-check -------------------------------

if __name__ == "__main__":
    B, S, M = 2, 16, 12
    d_model, nhead, n_kv, head_dim, d_ff = 32, 4, 2, 8, 64

    key = jax.random.PRNGKey(0)
    k1, k2, k3 = jax.random.split(key, 3)
    tgt = jax.random.normal(k1, (B, S, d_model), jnp.float32)
    memory = jax.random.normal(k2, (B, M, d_model), jnp.float32)
    params = init_params(k3, d_model, nhead, n_kv, head_dim, d_ff)

    # q_tile=8 -> grid (B=2, q_tiles=2), exercises causal offset + RoPE tiling.
    out = transformer_decoder_layer(tgt, memory, params, n_heads=nhead,
                                    n_kv_heads=n_kv, head_dim=head_dim, q_tile=8)
    out = jax.block_until_ready(out)
    assert out.shape == (B, S, d_model)
    assert bool(jnp.all(jnp.isfinite(out)))

    # Reference 1: same bf16 math (shared function), pure JAX, vmapped over batch.
    cos, sin = _rope_half_tables(S, head_dim)
    wprep = _prepare_weights(params, nhead, n_kv, head_dim)
    ref = jax.vmap(lambda x, m: _decoder_layer_math(
        x, x, m, cos, sin, cos, sin, wprep, n_heads=nhead, n_kv_heads=n_kv,
        head_dim=head_dim, q_offset=0, approx=False))(tgt, memory)
    err_ref = float(jnp.max(jnp.abs(out - ref)))

    # Reference 2: fp32 golden with the original interleaved-RoPE convention.
    gold = jax.vmap(lambda x, m: _golden_layer(
        x, m, params, nhead, n_kv, head_dim))(tgt, memory)
    err_gold = float(jnp.max(jnp.abs(out - gold)))

    assert err_ref < 1e-1, f"kernel vs bf16 reference mismatch: {err_ref}"
    assert err_gold < 2.5e-1, f"kernel vs fp32 golden mismatch: {err_gold}"
    print("KERNEL_OK")
</pallas_src>

<mosaic_0001>
module attributes {stable_mosaic.version = 11 : i64} {
  func.func @decoder_layer_kernel(%arg0: i32, %arg1: i32, %arg2: memref<1x8x32xf32, #tpu.memory_space<vmem>>, %arg3: memref<1x16x32xf32, #tpu.memory_space<vmem>>, %arg4: memref<1x12x32xf32, #tpu.memory_space<vmem>>, %arg5: memref<8x4xf32, #tpu.memory_space<vmem>>, %arg6: memref<8x4xf32, #tpu.memory_space<vmem>>, %arg7: memref<16x4xf32, #tpu.memory_space<vmem>>, %arg8: memref<16x4xf32, #tpu.memory_space<vmem>>, %arg9: memref<1x32xf32, #tpu.memory_space<vmem>>, %arg10: memref<32x32xbf16, #tpu.memory_space<vmem>>, %arg11: memref<32x16xbf16, #tpu.memory_space<vmem>>, %arg12: memref<32x16xbf16, #tpu.memory_space<vmem>>, %arg13: memref<32x32xbf16, #tpu.memory_space<vmem>>, %arg14: memref<1x32xf32, #tpu.memory_space<vmem>>, %arg15: memref<32x64xbf16, #tpu.memory_space<vmem>>, %arg16: memref<64x32xbf16, #tpu.memory_space<vmem>>, %arg17: memref<1x32xf32, #tpu.memory_space<vmem>>, %arg18: memref<32x32xbf16, #tpu.memory_space<vmem>>, %arg19: memref<32x16xbf16, #tpu.memory_space<vmem>>, %arg20: memref<32x16xbf16, #tpu.memory_space<vmem>>, %arg21: memref<32x32xbf16, #tpu.memory_space<vmem>>, %arg22: memref<1x32xf32, #tpu.memory_space<vmem>>, %arg23: memref<32x64xbf16, #tpu.memory_space<vmem>>, %arg24: memref<64x32xbf16, #tpu.memory_space<vmem>>, %arg25: memref<1x8x32xf32, #tpu.memory_space<vmem>>) attributes {dimension_semantics = [#tpu.dimension_semantics<parallel>, #tpu.dimension_semantics<parallel>], iteration_bounds = array<i64: 2, 2>, scalar_prefetch = 0 : i64, scratch_operands = 0 : i64, tpu.core_type = #tpu.core_type<tc>, window_params = [{transform_indices = @transform_0, window_bounds = array<i64: 1, 8, 32>}, {transform_indices = @transform_1, window_bounds = array<i64: 1, 16, 32>}, {transform_indices = @transform_2, window_bounds = array<i64: 1, 12, 32>}, {transform_indices = @transform_3, window_bounds = array<i64: 8, 4>}, {transform_indices = @transform_4, window_bounds = array<i64: 8, 4>}, {pipeline_mode = #tpu.pipeline_mode<synchronous>, transform_indices = @transform_5, window_bounds = array<i64: 16, 4>}, {pipeline_mode = #tpu.pipeline_mode<synchronous>, transform_indices = @transform_6, window_bounds = array<i64: 16, 4>}, {pipeline_mode = #tpu.pipeline_mode<synchronous>, transform_indices = @transform_7, window_bounds = array<i64: 1, 32>}, {pipeline_mode = #tpu.pipeline_mode<synchronous>, transform_indices = @transform_8, window_bounds = array<i64: 32, 32>}, {pipeline_mode = #tpu.pipeline_mode<synchronous>, transform_indices = @transform_9, window_bounds = array<i64: 32, 16>}, {pipeline_mode = #tpu.pipeline_mode<synchronous>, transform_indices = @transform_10, window_bounds = array<i64: 32, 16>}, {pipeline_mode = #tpu.pipeline_mode<synchronous>, transform_indices = @transform_11, window_bounds = array<i64: 32, 32>}, {pipeline_mode = #tpu.pipeline_mode<synchronous>, transform_indices = @transform_12, window_bounds = array<i64: 1, 32>}, {pipeline_mode = #tpu.pipeline_mode<synchronous>, transform_indices = @transform_13, window_bounds = array<i64: 32, 64>}, {pipeline_mode = #tpu.pipeline_mode<synchronous>, transform_indices = @transform_14, window_bounds = array<i64: 64, 32>}, {pipeline_mode = #tpu.pipeline_mode<synchronous>, transform_indices = @transform_15, window_bounds = array<i64: 1, 32>}, {pipeline_mode = #tpu.pipeline_mode<synchronous>, transform_indices = @transform_16, window_bounds = array<i64: 32, 32>}, {pipeline_mode = #tpu.pipeline_mode<synchronous>, transform_indices = @transform_17, window_bounds = array<i64: 32, 16>}, {pipeline_mode = #tpu.pipeline_mode<synchronous>, transform_indices = @transform_18, window_bounds = array<i64: 32, 16>}, {pipeline_mode = #tpu.pipeline_mode<synchronous>, transform_indices = @transform_19, window_bounds = array<i64: 32, 32>}, {pipeline_mode = #tpu.pipeline_mode<synchronous>, transform_indices = @transform_20, window_bounds = array<i64: 1, 32>}, {pipeline_mode = #tpu.pipeline_mode<synchronous>, transform_indices = @transform_21, window_bounds = array<i64: 32, 64>}, {pipeline_mode = #tpu.pipeline_mode<synchronous>, transform_indices = @transform_22, window_bounds = array<i64: 64, 32>}, {transform_indices = @transform_23, window_bounds = array<i64: 1, 8, 32>}]} {
    %c0 = arith.constant 0 : index
    %c0_0 = arith.constant 0 : index
    %0 = vector.load %arg9[%c0, %c0_0] : memref<1x32xf32, #tpu.memory_space<vmem>>, vector<1x32xf32>
    %c0_1 = arith.constant 0 : index
    %c0_2 = arith.constant 0 : index
    %1 = vector.load %arg10[%c0_1, %c0_2] : memref<32x32xbf16, #tpu.memory_space<vmem>>, vector<32x32xbf16>
    %c0_3 = arith.constant 0 : index
    %c0_4 = arith.constant 0 : index
    %2 = vector.load %arg11[%c0_3, %c0_4] : memref<32x16xbf16, #tpu.memory_space<vmem>>, vector<32x16xbf16>
    %c0_5 = arith.constant 0 : index
    %c0_6 = arith.constant 0 : index
    %3 = vector.load %arg12[%c0_5, %c0_6] : memref<32x16xbf16, #tpu.memory_space<vmem>>, vector<32x16xbf16>
    %c0_7 = arith.constant 0 : index
    %c0_8 = arith.constant 0 : index
    %4 = vector.load %arg13[%c0_7, %c0_8] : memref<32x32xbf16, #tpu.memory_space<vmem>>, vector<32x32xbf16>
    %c0_9 = arith.constant 0 : index
    %c0_10 = arith.constant 0 : index
    %5 = vector.load %arg14[%c0_9, %c0_10] : memref<1x32xf32, #tpu.memory_space<vmem>>, vector<1x32xf32>
    %c0_11 = arith.constant 0 : index
    %c0_12 = arith.constant 0 : index
    %6 = vector.load %arg15[%c0_11, %c0_12] : memref<32x64xbf16, #tpu.memory_space<vmem>>, vector<32x64xbf16>
    %c0_13 = arith.constant 0 : index
    %c0_14 = arith.constant 0 : index
    %7 = vector.load %arg16[%c0_13, %c0_14] : memref<64x32xbf16, #tpu.memory_space<vmem>>, vector<64x32xbf16>
    %c0_15 = arith.constant 0 : index
    %c0_16 = arith.constant 0 : index
    %8 = vector.load %arg17[%c0_15, %c0_16] : memref<1x32xf32, #tpu.memory_space<vmem>>, vector<1x32xf32>
    %c0_17 = arith.constant 0 : index
    %c0_18 = arith.constant 0 : index
    %9 = vector.load %arg18[%c0_17, %c0_18] : memref<32x32xbf16, #tpu.memory_space<vmem>>, vector<32x32xbf16>
    %c0_19 = arith.constant 0 : index
    %c0_20 = arith.constant 0 : index
    %10 = vector.load %arg19[%c0_19, %c0_20] : memref<32x16xbf16, #tpu.memory_space<vmem>>, vector<32x16xbf16>
    %c0_21 = arith.constant 0 : index
    %c0_22 = arith.constant 0 : index
    %11 = vector.load %arg20[%c0_21, %c0_22] : memref<32x16xbf16, #tpu.memory_space<vmem>>, vector<32x16xbf16>
    %c0_23 = arith.constant 0 : index
    %c0_24 = arith.constant 0 : index
    %12 = vector.load %arg21[%c0_23, %c0_24] : memref<32x32xbf16, #tpu.memory_space<vmem>>, vector<32x32xbf16>
    %c0_25 = arith.constant 0 : index
    %c0_26 = arith.constant 0 : index
    %13 = vector.load %arg22[%c0_25, %c0_26] : memref<1x32xf32, #tpu.memory_space<vmem>>, vector<1x32xf32>
    %c0_27 = arith.constant 0 : index
    %c0_28 = arith.constant 0 : index
    %14 = vector.load %arg23[%c0_27, %c0_28] : memref<32x64xbf16, #tpu.memory_space<vmem>>, vector<32x64xbf16>
    %c0_29 = arith.constant 0 : index
    %c0_30 = arith.constant 0 : index
    %15 = vector.load %arg24[%c0_29, %c0_30] : memref<64x32xbf16, #tpu.memory_space<vmem>>, vector<64x32xbf16>
    %c8_i32 = arith.constant 8 : i32
    %16 = arith.muli %arg1, %c8_i32 : i32
    %c0_31 = arith.constant 0 : index
    %c0_32 = arith.constant 0 : index
    %c0_33 = arith.constant 0 : index
    %17 = vector.load %arg2[%c0_31, %c0_32, %c0_33] : memref<1x8x32xf32, #tpu.memory_space<vmem>>, vector<1x8x32xf32>
    %18 = vector.shape_cast %17 : vector<1x8x32xf32> to vector<8x32xf32>
    %c0_34 = arith.constant 0 : index
    %c0_35 = arith.constant 0 : index
    %c0_36 = arith.constant 0 : index
    %19 = vector.load %arg3[%c0_34, %c0_35, %c0_36] : memref<1x16x32xf32, #tpu.memory_space<vmem>>, vector<1x16x32xf32>
    %20 = vector.shape_cast %19 : vector<1x16x32xf32> to vector<16x32xf32>
    %c0_37 = arith.constant 0 : index
    %c0_38 = arith.constant 0 : index
    %c0_39 = arith.constant 0 : index
    %21 = vector.load %arg4[%c0_37, %c0_38, %c0_39] : memref<1x12x32xf32, #tpu.memory_space<vmem>>, vector<1x12x32xf32>
    %22 = vector.shape_cast %21 : vector<1x12x32xf32> to vector<12x32xf32>
    %c0_40 = arith.constant 0 : index
    %c0_41 = arith.constant 0 : index
    %23 = vector.load %arg5[%c0_40, %c0_41] : memref<8x4xf32, #tpu.memory_space<vmem>>, vector<8x4xf32>
    %c0_42 = arith.constant 0 : index
    %c0_43 = arith.constant 0 : index
    %24 = vector.load %arg6[%c0_42, %c0_43] : memref<8x4xf32, #tpu.memory_space<vmem>>, vector<8x4xf32>
    %c0_44 = arith.constant 0 : index
    %c0_45 = arith.constant 0 : index
    %25 = vector.load %arg7[%c0_44, %c0_45] : memref<16x4xf32, #tpu.memory_space<vmem>>, vector<16x4xf32>
    %c0_46 = arith.constant 0 : index
    %c0_47 = arith.constant 0 : index
    %26 = vector.load %arg8[%c0_46, %c0_47] : memref<16x4xf32, #tpu.memory_space<vmem>>, vector<16x4xf32>
    %27 = arith.mulf %18, %18 : vector<8x32xf32>
    %cst = arith.constant dense<0.000000e+00> : vector<8xf32>
    %28 = vector.multi_reduction <add>, %27, %cst [1] : vector<8x32xf32> to vector<8xf32>
    %29 = vector.shape_cast %28 : vector<8xf32> to vector<8x1xf32>
    %cst_48 = arith.constant 3.200000e+01 : f32
    %30 = vector.broadcast %cst_48 : f32 to vector<8x1xf32>
    %31 = arith.divf %29, %30 : vector<8x1xf32>
    %cst_49 = arith.constant 9.99999997E-7 : f32
    %32 = vector.broadcast %cst_49 : f32 to vector<8x1xf32>
    %33 = arith.addf %31, %32 : vector<8x1xf32>
    %34 = math.rsqrt %33 : vector<8x1xf32>
    %35 = vector.broadcast %34 : vector<8x1xf32> to vector<8x32xf32>
    %36 = arith.mulf %18, %35 : vector<8x32xf32>
    %37 = vector.broadcast %0 : vector<1x32xf32> to vector<8x32xf32>
    %38 = arith.mulf %36, %37 : vector<8x32xf32>
    %39 = arith.mulf %20, %20 : vector<16x32xf32>
    %cst_50 = arith.constant dense<0.000000e+00> : vector<16xf32>
    %40 = vector.multi_reduction <add>, %39, %cst_50 [1] : vector<16x32xf32> to vector<16xf32>
    %41 = vector.shape_cast %40 : vector<16xf32> to vector<16x1xf32>
    %cst_51 = arith.constant 3.200000e+01 : f32
    %42 = vector.broadcast %cst_51 : f32 to vector<16x1xf32>
    %43 = arith.divf %41, %42 : vector<16x1xf32>
    %cst_52 = arith.constant 9.99999997E-7 : f32
    %44 = vector.broadcast %cst_52 : f32 to vector<16x1xf32>
    %45 = arith.addf %43, %44 : vector<16x1xf32>
    %46 = math.rsqrt %45 : vector<16x1xf32>
    %47 = vector.broadcast %46 : vector<16x1xf32> to vector<16x32xf32>
    %48 = arith.mulf %20, %47 : vector<16x32xf32>
    %49 = vector.broadcast %0 : vector<1x32xf32> to vector<16x32xf32>
    %50 = arith.mulf %48, %49 : vector<16x32xf32>
    %51 = arith.truncf %38 : vector<8x32xf32> to vector<8x32xbf16>
    %cst_53 = arith.constant dense<0.000000e+00> : vector<8x32xf32>
    %52 = tpu.matmul %51, %1, %cst_53 {dimension_numbers = #tpu.dot_dimension_numbers<[1], [0], [0], [1], [0, 0, 1, 1], [], []>} : vector<8x32xbf16>, vector<32x32xbf16>, vector<8x32xf32> -> vector<8x32xf32>
    %53 = arith.truncf %50 : vector<16x32xf32> to vector<16x32xbf16>
    %cst_54 = arith.constant dense<0.000000e+00> : vector<16x16xf32>
    %54 = tpu.matmul %53, %2, %cst_54 {dimension_numbers = #tpu.dot_dimension_numbers<[1], [0], [0], [1], [0, 0, 1, 1], [], []>} : vector<16x32xbf16>, vector<32x16xbf16>, vector<16x16xf32> -> vector<16x16xf32>
    %55 = arith.truncf %50 : vector<16x32xf32> to vector<16x32xbf16>
    %cst_55 = arith.constant dense<0.000000e+00> : vector<16x16xf32>
    %56 = tpu.matmul %55, %3, %cst_55 {dimension_numbers = #tpu.dot_dimension_numbers<[1], [0], [0], [1], [0, 0, 1, 1], [], []>} : vector<16x32xbf16>, vector<32x16xbf16>, vector<16x16xf32> -> vector<16x16xf32>
    %57 = vector.shape_cast %52 : vector<8x32xf32> to vector<8x4x8xf32>
    %58 = vector.extract_strided_slice %57 {offsets = [0, 0, 0], sizes = [8, 4, 4], strides = [1, 1, 1]} : vector<8x4x8xf32> to vector<8x4x4xf32>
    %59 = vector.extract_strided_slice %57 {offsets = [0, 0, 4], sizes = [8, 4, 4], strides = [1, 1, 1]} : vector<8x4x8xf32> to vector<8x4x4xf32>
    %60 = vector.shape_cast %23 : vector<8x4xf32> to vector<8x1x4xf32>
    %61 = vector.shape_cast %24 : vector<8x4xf32> to vector<8x1x4xf32>
    %62 = vector.broadcast %60 : vector<8x1x4xf32> to vector<8x4x4xf32>
    %63 = arith.mulf %58, %62 : vector<8x4x4xf32>
    %64 = vector.broadcast %61 : vector<8x1x4xf32> to vector<8x4x4xf32>
    %65 = arith.mulf %59, %64 : vector<8x4x4xf32>
    %66 = arith.subf %63, %65 : vector<8x4x4xf32>
    %67 = vector.broadcast %60 : vector<8x1x4xf32> to vector<8x4x4xf32>
    %68 = arith.mulf %59, %67 : vector<8x4x4xf32>
    %69 = vector.broadcast %61 : vector<8x1x4xf32> to vector<8x4x4xf32>
    %70 = arith.mulf %58, %69 : vector<8x4x4xf32>
    %71 = arith.addf %68, %70 : vector<8x4x4xf32>
    %72 = tpu.concatenate %66, %71 in 2 : vector<8x4x4xf32>, vector<8x4x4xf32> -> vector<8x4x8xf32>
    %73 = vector.shape_cast %72 : vector<8x4x8xf32> to vector<8x32xf32>
    %74 = vector.shape_cast %54 : vector<16x16xf32> to vector<16x2x8xf32>
    %75 = vector.extract_strided_slice %74 {offsets = [0, 0, 0], sizes = [16, 2, 4], strides = [1, 1, 1]} : vector<16x2x8xf32> to vector<16x2x4xf32>
    %76 = vector.extract_strided_slice %74 {offsets = [0, 0, 4], sizes = [16, 2, 4], strides = [1, 1, 1]} : vector<16x2x8xf32> to vector<16x2x4xf32>
    %77 = vector.shape_cast %25 : vector<16x4xf32> to vector<16x1x4xf32>
    %78 = vector.shape_cast %26 : vector<16x4xf32> to vector<16x1x4xf32>
    %79 = vector.broadcast %77 : vector<16x1x4xf32> to vector<16x2x4xf32>
    %80 = arith.mulf %75, %79 : vector<16x2x4xf32>
    %81 = vector.broadcast %78 : vector<16x1x4xf32> to vector<16x2x4xf32>
    %82 = arith.mulf %76, %81 : vector<16x2x4xf32>
    %83 = arith.subf %80, %82 : vector<16x2x4xf32>
    %84 = vector.broadcast %77 : vector<16x1x4xf32> to vector<16x2x4xf32>
    %85 = arith.mulf %76, %84 : vector<16x2x4xf32>
    %86 = vector.broadcast %78 : vector<16x1x4xf32> to vector<16x2x4xf32>
    %87 = arith.mulf %75, %86 : vector<16x2x4xf32>
    %88 = arith.addf %85, %87 : vector<16x2x4xf32>
    %89 = tpu.concatenate %83, %88 in 2 : vector<16x2x4xf32>, vector<16x2x4xf32> -> vector<16x2x8xf32>
    %90 = vector.shape_cast %89 : vector<16x2x8xf32> to vector<16x16xf32>
    %91 = vector.shape_cast %73 : vector<8x32xf32> to vector<8x4x8xf32>
    %92 = tpu.transpose %91, [1, 0, 2] : vector<8x4x8xf32> -> vector<4x8x8xf32>
    %93 = vector.shape_cast %90 : vector<16x16xf32> to vector<16x2x8xf32>
    %94 = tpu.transpose %93, [1, 0, 2] : vector<16x2x8xf32> -> vector<2x16x8xf32>
    %95 = vector.shape_cast %56 : vector<16x16xf32> to vector<16x2x8xf32>
    %96 = tpu.transpose %95, [1, 0, 2] : vector<16x2x8xf32> -> vector<2x16x8xf32>
    %97 = vector.shape_cast %94 : vector<2x16x8xf32> to vector<2x1x16x8xf32>
    %98 = vector.shape_cast %97 : vector<2x1x16x8xf32> to vector<2x1x16x8xf32>
    %99 = vector.broadcast %98 : vector<2x1x16x8xf32> to vector<2x2x16x8xf32>
    %100 = vector.shape_cast %99 : vector<2x2x16x8xf32> to vector<4x16x8xf32>
    %101 = vector.shape_cast %96 : vector<2x16x8xf32> to vector<2x1x16x8xf32>
    %102 = vector.shape_cast %101 : vector<2x1x16x8xf32> to vector<2x1x16x8xf32>
    %103 = vector.broadcast %102 : vector<2x1x16x8xf32> to vector<2x2x16x8xf32>
    %104 = vector.shape_cast %103 : vector<2x2x16x8xf32> to vector<4x16x8xf32>
    %105 = arith.truncf %92 : vector<4x8x8xf32> to vector<4x8x8xbf16>
    %106 = arith.truncf %100 : vector<4x16x8xf32> to vector<4x16x8xbf16>
    "tpu.trace_start"() <{level = 10 : i32, message = "hqd,hkd->hqk"}> : () -> ()
    %cst_56 = arith.constant dense<0.000000e+00> : vector<4x8x16xf32>
    %107 = tpu.matmul %105, %106, %cst_56 {dimension_numbers = #tpu.dot_dimension_numbers<[2], [2], [1], [1], [0, 0, 0, 1, 1, 1], [0], [0]>} : vector<4x8x8xbf16>, vector<4x16x8xbf16>, vector<4x8x16xf32> -> vector<4x8x16xf32>
    "tpu.trace_stop"() : () -> ()
    %cst_57 = arith.constant 0.353553385 : f32
    %108 = vector.broadcast %cst_57 : f32 to vector<4x8x16xf32>
    %109 = arith.mulf %107, %108 : vector<4x8x16xf32>
    %110 = tpu.iota {dimensions = array<i32: 0>} : vector<8x16xi32>
    %111 = vector.broadcast %16 : i32 to vector<8x16xi32>
    %112 = arith.addi %110, %111 : vector<8x16xi32>
    %113 = tpu.iota {dimensions = array<i32: 1>} : vector<8x16xi32>
    %114 = arith.cmpi sge, %112, %113 : vector<8x16xi32>
    %115 = vector.shape_cast %114 : vector<8x16xi1> to vector<1x8x16xi1>
    %cst_58 = arith.constant -1.000000e+30 : f32
    %116 = vector.shape_cast %115 : vector<1x8x16xi1> to vector<1x8x16xi1>
    %117 = vector.broadcast %116 : vector<1x8x16xi1> to vector<4x8x16xi1>
    %118 = vector.broadcast %cst_58 : f32 to vector<4x8x16xf32>
    %119 = arith.select %117, %109, %118 : vector<4x8x16xi1>, vector<4x8x16xf32>
    %cst_59 = arith.constant dense<0xFF800000> : vector<4x8xf32>
    %120 = vector.multi_reduction <maximumf>, %119, %cst_59 [2] : vector<4x8x16xf32> to vector<4x8xf32>
    %121 = vector.shape_cast %120 : vector<4x8xf32> to vector<4x8x1xf32>
    %122 = vector.broadcast %121 : vector<4x8x1xf32> to vector<4x8x16xf32>
    %123 = arith.subf %119, %122 : vector<4x8x16xf32>
    %124 = math.exp %123 : vector<4x8x16xf32>
    %cst_60 = arith.constant dense<0.000000e+00> : vector<4x8xf32>
    %125 = vector.multi_reduction <add>, %124, %cst_60 [2] : vector<4x8x16xf32> to vector<4x8xf32>
    %126 = vector.shape_cast %125 : vector<4x8xf32> to vector<4x8x1xf32>
    %127 = tpu.reciprocal %126 {approx = true} : vector<4x8x1xf32> -> vector<4x8x1xf32>
    %128 = vector.broadcast %127 : vector<4x8x1xf32> to vector<4x8x16xf32>
    %129 = arith.mulf %124, %128 : vector<4x8x16xf32>
    %130 = arith.truncf %129 : vector<4x8x16xf32> to vector<4x8x16xbf16>
    %131 = arith.truncf %104 : vector<4x16x8xf32> to vector<4x16x8xbf16>
    "tpu.trace_start"() <{level = 10 : i32, message = "hqk,hkd->hqd"}> : () -> ()
    %cst_61 = arith.constant dense<0.000000e+00> : vector<4x8x8xf32>
    %132 = tpu.matmul %130, %131, %cst_61 {dimension_numbers = #tpu.dot_dimension_numbers<[2], [1], [1], [2], [0, 0, 0, 1, 1, 2], [0], [0]>} : vector<4x8x16xbf16>, vector<4x16x8xbf16>, vector<4x8x8xf32> -> vector<4x8x8xf32>
    "tpu.trace_stop"() : () -> ()
    %133 = tpu.transpose %132, [1, 0, 2] : vector<4x8x8xf32> -> vector<8x4x8xf32>
    %134 = vector.shape_cast %133 : vector<8x4x8xf32> to vector<8x32xf32>
    %135 = arith.truncf %134 : vector<8x32xf32> to vector<8x32xbf16>
    %cst_62 = arith.constant dense<0.000000e+00> : vector<8x32xf32>
    %136 = tpu.matmul %135, %4, %cst_62 {dimension_numbers = #tpu.dot_dimension_numbers<[1], [0], [0], [1], [0, 0, 1, 1], [], []>} : vector<8x32xbf16>, vector<32x32xbf16>, vector<8x32xf32> -> vector<8x32xf32>
    %137 = arith.addf %18, %136 : vector<8x32xf32>
    %138 = arith.mulf %137, %137 : vector<8x32xf32>
    %cst_63 = arith.constant dense<0.000000e+00> : vector<8xf32>
    %139 = vector.multi_reduction <add>, %138, %cst_63 [1] : vector<8x32xf32> to vector<8xf32>
    %140 = vector.shape_cast %139 : vector<8xf32> to vector<8x1xf32>
    %cst_64 = arith.constant 3.200000e+01 : f32
    %141 = vector.broadcast %cst_64 : f32 to vector<8x1xf32>
    %142 = arith.divf %140, %141 : vector<8x1xf32>
    %cst_65 = arith.constant 9.99999997E-7 : f32
    %143 = vector.broadcast %cst_65 : f32 to vector<8x1xf32>
    %144 = arith.addf %142, %143 : vector<8x1xf32>
    %145 = math.rsqrt %144 : vector<8x1xf32>
    %146 = vector.broadcast %145 : vector<8x1xf32> to vector<8x32xf32>
    %147 = arith.mulf %137, %146 : vector<8x32xf32>
    %148 = vector.broadcast %5 : vector<1x32xf32> to vector<8x32xf32>
    %149 = arith.mulf %147, %148 : vector<8x32xf32>
    %150 = arith.truncf %149 : vector<8x32xf32> to vector<8x32xbf16>
    %cst_66 = arith.constant dense<0.000000e+00> : vector<8x64xf32>
    %151 = tpu.matmul %150, %6, %cst_66 {dimension_numbers = #tpu.dot_dimension_numbers<[1], [0], [0], [1], [0, 0, 1, 1], [], []>} : vector<8x32xbf16>, vector<32x64xbf16>, vector<8x64xf32> -> vector<8x64xf32>
    %cst_67 = arith.constant 0.000000e+00 : f32
    %152 = vector.broadcast %cst_67 : f32 to vector<8x64xf32>
    %153 = arith.subf %152, %151 : vector<8x64xf32>
    %154 = math.exp %153 : vector<8x64xf32>
    %cst_68 = arith.constant 1.000000e+00 : f32
    %155 = vector.broadcast %cst_68 : f32 to vector<8x64xf32>
    %156 = arith.addf %155, %154 : vector<8x64xf32>
    %157 = tpu.reciprocal %156 {approx = true} : vector<8x64xf32> -> vector<8x64xf32>
    %158 = arith.mulf %151, %157 : vector<8x64xf32>
    %159 = arith.truncf %158 : vector<8x64xf32> to vector<8x64xbf16>
    %cst_69 = arith.constant dense<0.000000e+00> : vector<8x32xf32>
    %160 = tpu.matmul %159, %7, %cst_69 {dimension_numbers = #tpu.dot_dimension_numbers<[1], [0], [0], [1], [0, 0, 1, 1], [], []>} : vector<8x64xbf16>, vector<64x32xbf16>, vector<8x32xf32> -> vector<8x32xf32>
    %161 = arith.addf %137, %160 : vector<8x32xf32>
    %162 = arith.mulf %161, %161 : vector<8x32xf32>
    %cst_70 = arith.constant dense<0.000000e+00> : vector<8xf32>
    %163 = vector.multi_reduction <add>, %162, %cst_70 [1] : vector<8x32xf32> to vector<8xf32>
    %164 = vector.shape_cast %163 : vector<8xf32> to vector<8x1xf32>
    %cst_71 = arith.constant 3.200000e+01 : f32
    %165 = vector.broadcast %cst_71 : f32 to vector<8x1xf32>
    %166 = arith.divf %164, %165 : vector<8x1xf32>
    %cst_72 = arith.constant 9.99999997E-7 : f32
    %167 = vector.broadcast %cst_72 : f32 to vector<8x1xf32>
    %168 = arith.addf %166, %167 : vector<8x1xf32>
    %169 = math.rsqrt %168 : vector<8x1xf32>
    %170 = vector.broadcast %169 : vector<8x1xf32> to vector<8x32xf32>
    %171 = arith.mulf %161, %170 : vector<8x32xf32>
    %172 = vector.broadcast %8 : vector<1x32xf32> to vector<8x32xf32>
    %173 = arith.mulf %171, %172 : vector<8x32xf32>
    %174 = arith.truncf %173 : vector<8x32xf32> to vector<8x32xbf16>
    %cst_73 = arith.constant dense<0.000000e+00> : vector<8x32xf32>
    %175 = tpu.matmul %174, %9, %cst_73 {dimension_numbers = #tpu.dot_dimension_numbers<[1], [0], [0], [1], [0, 0, 1, 1], [], []>} : vector<8x32xbf16>, vector<32x32xbf16>, vector<8x32xf32> -> vector<8x32xf32>
    %176 = arith.truncf %22 : vector<12x32xf32> to vector<12x32xbf16>
    %cst_74 = arith.constant dense<0.000000e+00> : vector<12x16xf32>
    %177 = tpu.matmul %176, %10, %cst_74 {dimension_numbers = #tpu.dot_dimension_numbers<[1], [0], [0], [1], [0, 0, 1, 1], [], []>} : vector<12x32xbf16>, vector<32x16xbf16>, vector<12x16xf32> -> vector<12x16xf32>
    %178 = arith.truncf %22 : vector<12x32xf32> to vector<12x32xbf16>
    %cst_75 = arith.constant dense<0.000000e+00> : vector<12x16xf32>
    %179 = tpu.matmul %178, %11, %cst_75 {dimension_numbers = #tpu.dot_dimension_numbers<[1], [0], [0], [1], [0, 0, 1, 1], [], []>} : vector<12x32xbf16>, vector<32x16xbf16>, vector<12x16xf32> -> vector<12x16xf32>
    %180 = vector.shape_cast %175 : vector<8x32xf32> to vector<8x4x8xf32>
    %181 = tpu.transpose %180, [1, 0, 2] : vector<8x4x8xf32> -> vector<4x8x8xf32>
    %182 = vector.shape_cast %177 : vector<12x16xf32> to vector<12x2x8xf32>
    %183 = tpu.transpose %182, [1, 0, 2] : vector<12x2x8xf32> -> vector<2x12x8xf32>
    %184 = vector.shape_cast %179 : vector<12x16xf32> to vector<12x2x8xf32>
    %185 = tpu.transpose %184, [1, 0, 2] : vector<12x2x8xf32> -> vector<2x12x8xf32>
    %186 = vector.shape_cast %183 : vector<2x12x8xf32> to vector<2x1x12x8xf32>
    %187 = vector.shape_cast %186 : vector<2x1x12x8xf32> to vector<2x1x12x8xf32>
    %188 = vector.broadcast %187 : vector<2x1x12x8xf32> to vector<2x2x12x8xf32>
    %189 = vector.shape_cast %188 : vector<2x2x12x8xf32> to vector<4x12x8xf32>
    %190 = vector.shape_cast %185 : vector<2x12x8xf32> to vector<2x1x12x8xf32>
    %191 = vector.shape_cast %190 : vector<2x1x12x8xf32> to vector<2x1x12x8xf32>
    %192 = vector.broadcast %191 : vector<2x1x12x8xf32> to vector<2x2x12x8xf32>
    %193 = vector.shape_cast %192 : vector<2x2x12x8xf32> to vector<4x12x8xf32>
    %194 = arith.truncf %181 : vector<4x8x8xf32> to vector<4x8x8xbf16>
    %195 = arith.truncf %189 : vector<4x12x8xf32> to vector<4x12x8xbf16>
    "tpu.trace_start"() <{level = 10 : i32, message = "hqd,hkd->hqk"}> : () -> ()
    %cst_76 = arith.constant dense<0.000000e+00> : vector<4x8x12xf32>
    %196 = tpu.matmul %194, %195, %cst_76 {dimension_numbers = #tpu.dot_dimension_numbers<[2], [2], [1], [1], [0, 0, 0, 1, 1, 1], [0], [0]>} : vector<4x8x8xbf16>, vector<4x12x8xbf16>, vector<4x8x12xf32> -> vector<4x8x12xf32>
    "tpu.trace_stop"() : () -> ()
    %cst_77 = arith.constant 0.353553385 : f32
    %197 = vector.broadcast %cst_77 : f32 to vector<4x8x12xf32>
    %198 = arith.mulf %196, %197 : vector<4x8x12xf32>
    %cst_78 = arith.constant dense<0xFF800000> : vector<4x8xf32>
    %199 = vector.multi_reduction <maximumf>, %198, %cst_78 [2] : vector<4x8x12xf32> to vector<4x8xf32>
    %200 = vector.shape_cast %199 : vector<4x8xf32> to vector<4x8x1xf32>
    %201 = vector.broadcast %200 : vector<4x8x1xf32> to vector<4x8x12xf32>
    %202 = arith.subf %198, %201 : vector<4x8x12xf32>
    %203 = math.exp %202 : vector<4x8x12xf32>
    %cst_79 = arith.constant dense<0.000000e+00> : vector<4x8xf32>
    %204 = vector.multi_reduction <add>, %203, %cst_79 [2] : vector<4x8x12xf32> to vector<4x8xf32>
    %205 = vector.shape_cast %204 : vector<4x8xf32> to vector<4x8x1xf32>
    %206 = tpu.reciprocal %205 {approx = true} : vector<4x8x1xf32> -> vector<4x8x1xf32>
    %207 = vector.broadcast %206 : vector<4x8x1xf32> to vector<4x8x12xf32>
    %208 = arith.mulf %203, %207 : vector<4x8x12xf32>
    %209 = arith.truncf %208 : vector<4x8x12xf32> to vector<4x8x12xbf16>
    %210 = arith.truncf %193 : vector<4x12x8xf32> to vector<4x12x8xbf16>
    "tpu.trace_start"() <{level = 10 : i32, message = "hqk,hkd->hqd"}> : () -> ()
    %cst_80 = arith.constant dense<0.000000e+00> : vector<4x8x8xf32>
    %211 = tpu.matmul %209, %210, %cst_80 {dimension_numbers = #tpu.dot_dimension_numbers<[2], [1], [1], [2], [0, 0, 0, 1, 1, 2], [0], [0]>} : vector<4x8x12xbf16>, vector<4x12x8xbf16>, vector<4x8x8xf32> -> vector<4x8x8xf32>
    "tpu.trace_stop"() : () -> ()
    %212 = tpu.transpose %211, [1, 0, 2] : vector<4x8x8xf32> -> vector<8x4x8xf32>
    %213 = vector.shape_cast %212 : vector<8x4x8xf32> to vector<8x32xf32>
    %214 = arith.truncf %213 : vector<8x32xf32> to vector<8x32xbf16>
    %cst_81 = arith.constant dense<0.000000e+00> : vector<8x32xf32>
    %215 = tpu.matmul %214, %12, %cst_81 {dimension_numbers = #tpu.dot_dimension_numbers<[1], [0], [0], [1], [0, 0, 1, 1], [], []>} : vector<8x32xbf16>, vector<32x32xbf16>, vector<8x32xf32> -> vector<8x32xf32>
    %216 = arith.addf %161, %215 : vector<8x32xf32>
    %217 = arith.mulf %216, %216 : vector<8x32xf32>
    %cst_82 = arith.constant dense<0.000000e+00> : vector<8xf32>
    %218 = vector.multi_reduction <add>, %217, %cst_82 [1] : vector<8x32xf32> to vector<8xf32>
    %219 = vector.shape_cast %218 : vector<8xf32> to vector<8x1xf32>
    %cst_83 = arith.constant 3.200000e+01 : f32
    %220 = vector.broadcast %cst_83 : f32 to vector<8x1xf32>
    %221 = arith.divf %219, %220 : vector<8x1xf32>
    %cst_84 = arith.constant 9.99999997E-7 : f32
    %222 = vector.broadcast %cst_84 : f32 to vector<8x1xf32>
    %223 = arith.addf %221, %222 : vector<8x1xf32>
    %224 = math.rsqrt %223 : vector<8x1xf32>
    %225 = vector.broadcast %224 : vector<8x1xf32> to vector<8x32xf32>
    %226 = arith.mulf %216, %225 : vector<8x32xf32>
    %227 = vector.broadcast %13 : vector<1x32xf32> to vector<8x32xf32>
    %228 = arith.mulf %226, %227 : vector<8x32xf32>
    %229 = arith.truncf %228 : vector<8x32xf32> to vector<8x32xbf16>
    %cst_85 = arith.constant dense<0.000000e+00> : vector<8x64xf32>
    %230 = tpu.matmul %229, %14, %cst_85 {dimension_numbers = #tpu.dot_dimension_numbers<[1], [0], [0], [1], [0, 0, 1, 1], [], []>} : vector<8x32xbf16>, vector<32x64xbf16>, vector<8x64xf32> -> vector<8x64xf32>
    %cst_86 = arith.constant 0.000000e+00 : f32
    %231 = vector.broadcast %cst_86 : f32 to vector<8x64xf32>
    %232 = arith.subf %231, %230 : vector<8x64xf32>
    %233 = math.exp %232 : vector<8x64xf32>
    %cst_87 = arith.constant 1.000000e+00 : f32
    %234 = vector.broadcast %cst_87 : f32 to vector<8x64xf32>
    %235 = arith.addf %234, %233 : vector<8x64xf32>
    %236 = tpu.reciprocal %235 {approx = true} : vector<8x64xf32> -> vector<8x64xf32>
    %237 = arith.mulf %230, %236 : vector<8x64xf32>
    %238 = arith.truncf %237 : vector<8x64xf32> to vector<8x64xbf16>
    %cst_88 = arith.constant dense<0.000000e+00> : vector<8x32xf32>
    %239 = tpu.matmul %238, %15, %cst_88 {dimension_numbers = #tpu.dot_dimension_numbers<[1], [0], [0], [1], [0, 0, 1, 1], [], []>} : vector<8x64xbf16>, vector<64x32xbf16>, vector<8x32xf32> -> vector<8x32xf32>
    %240 = arith.addf %216, %239 : vector<8x32xf32>
    %c0_89 = arith.constant 0 : index
    %c0_90 = arith.constant 0 : index
    %c0_91 = arith.constant 0 : index
    %241 = vector.load %arg25[%c0_89, %c0_90, %c0_91] : memref<1x8x32xf32, #tpu.memory_space<vmem>>, vector<1x8x32xf32>
    %242 = vector.shape_cast %241 : vector<1x8x32xf32> to vector<8x32xf32>
    %243 = vector.shape_cast %240 : vector<8x32xf32> to vector<1x8x32xf32>
    tpu.vector_store %arg25[%c0_89, %c0_90, %c0_91], %243 {strides = array<i32>} : memref<1x8x32xf32, #tpu.memory_space<vmem>>, vector<1x8x32xf32>,
    return
  }
  func.func @transform_0(%arg0: i32, %arg1: i32) -> (i32, i32, i32) {
    %c0_i32 = arith.constant 0 : i32
    %c0_i32_0 = arith.constant 0 : i32
    return %arg0, %arg1, %c0_i32 : i32, i32, i32
  }
  func.func @transform_1(%arg0: i32, %arg1: i32) -> (i32, i32, i32) {
    %c0_i32 = arith.constant 0 : i32
    %c0_i32_0 = arith.constant 0 : i32
    %c0_i32_1 = arith.constant 0 : i32
    return %arg0, %c0_i32, %c0_i32_0 : i32, i32, i32
  }
  func.func @transform_2(%arg0: i32, %arg1: i32) -> (i32, i32, i32) {
    %c0_i32 = arith.constant 0 : i32
    %c0_i32_0 = arith.constant 0 : i32
    %c0_i32_1 = arith.constant 0 : i32
    return %arg0, %c0_i32, %c0_i32_0 : i32, i32, i32
  }
  func.func @transform_3(%arg0: i32, %arg1: i32) -> (i32, i32) {
    %c0_i32 = arith.constant 0 : i32
    %c0_i32_0 = arith.constant 0 : i32
    return %arg1, %c0_i32 : i32, i32
  }
  func.func @transform_4(%arg0: i32, %arg1: i32) -> (i32, i32) {
    %c0_i32 = arith.constant 0 : i32
    %c0_i32_0 = arith.constant 0 : i32
    return %arg1, %c0_i32 : i32, i32
  }
  func.func @transform_5(%arg0: i32, %arg1: i32) -> (i32, i32) {
    %c0_i32 = arith.constant 0 : i32
    %c0_i32_0 = arith.constant 0 : i32
    %c0_i32_1 = arith.constant 0 : i32
    return %c0_i32, %c0_i32_0 : i32, i32
  }
  func.func @transform_6(%arg0: i32, %arg1: i32) -> (i32, i32) {
    %c0_i32 = arith.constant 0 : i32
    %c0_i32_0 = arith.constant 0 : i32
    %c0_i32_1 = arith.constant 0 : i32
    return %c0_i32, %c0_i32_0 : i32, i32
  }
  func.func @transform_7(%arg0: i32, %arg1: i32) -> (i32, i32) {
    %c0_i32 = arith.constant 0 : i32
    %c0_i32_0 = arith.constant 0 : i32
    %c0_i32_1 = arith.constant 0 : i32
    return %c0_i32, %c0_i32_0 : i32, i32
  }
  func.func @transform_8(%arg0: i32, %arg1: i32) -> (i32, i32) {
    %c0_i32 = arith.constant 0 : i32
    %c0_i32_0 = arith.constant 0 : i32
    %c0_i32_1 = arith.constant 0 : i32
    return %c0_i32, %c0_i32_0 : i32, i32
  }
  func.func @transform_9(%arg0: i32, %arg1: i32) -> (i32, i32) {
    %c0_i32 = arith.constant 0 : i32
    %c0_i32_0 = arith.constant 0 : i32
    %c0_i32_1 = arith.constant 0 : i32
    return %c0_i32, %c0_i32_0 : i32, i32
  }
  func.func @transform_10(%arg0: i32, %arg1: i32) -> (i32, i32) {
    %c0_i32 = arith.constant 0 : i32
    %c0_i32_0 = arith.constant 0 : i32
    %c0_i32_1 = arith.constant 0 : i32
    return %c0_i32, %c0_i32_0 : i32, i32
  }
  func.func @transform_11(%arg0: i32, %arg1: i32) -> (i32, i32) {
    %c0_i32 = arith.constant 0 : i32
    %c0_i32_0 = arith.constant 0 : i32
    %c0_i32_1 = arith.constant 0 : i32
    return %c0_i32, %c0_i32_0 : i32, i32
  }
  func.func @transform_12(%arg0: i32, %arg1: i32) -> (i32, i32) {
    %c0_i32 = arith.constant 0 : i32
    %c0_i32_0 = arith.constant 0 : i32
    %c0_i32_1 = arith.constant 0 : i32
    return %c0_i32, %c0_i32_0 : i32, i32
  }
  func.func @transform_13(%arg0: i32, %arg1: i32) -> (i32, i32) {
    %c0_i32 = arith.constant 0 : i32
    %c0_i32_0 = arith.constant 0 : i32
    %c0_i32_1 = arith.constant 0 : i32
    return %c0_i32, %c0_i32_0 : i32, i32
  }
  func.func @transform_14(%arg0: i32, %arg1: i32) -> (i32, i32) {
    %c0_i32 = arith.constant 0 : i32
    %c0_i32_0 = arith.constant 0 : i32
    %c0_i32_1 = arith.constant 0 : i32
    return %c0_i32, %c0_i32_0 : i32, i32
  }
  func.func @transform_15(%arg0: i32, %arg1: i32) -> (i32, i32) {
    %c0_i32 = arith.constant 0 : i32
    %c0_i32_0 = arith.constant 0 : i32
    %c0_i32_1 = arith.constant 0 : i32
    return %c0_i32, %c0_i32_0 : i32, i32
  }
  func.func @transform_16(%arg0: i32, %arg1: i32) -> (i32, i32) {
    %c0_i32 = arith.constant 0 : i32
    %c0_i32_0 = arith.constant 0 : i32
    %c0_i32_1 = arith.constant 0 : i32
    return %c0_i32, %c0_i32_0 : i32, i32
  }
  func.func @transform_17(%arg0: i32, %arg1: i32) -> (i32, i32) {
    %c0_i32 = arith.constant 0 : i32
    %c0_i32_0 = arith.constant 0 : i32
    %c0_i32_1 = arith.constant 0 : i32
    return %c0_i32, %c0_i32_0 : i32, i32
  }
  func.func @transform_18(%arg0: i32, %arg1: i32) -> (i32, i32) {
    %c0_i32 = arith.constant 0 : i32
    %c0_i32_0 = arith.constant 0 : i32
    %c0_i32_1 = arith.constant 0 : i32
    return %c0_i32, %c0_i32_0 : i32, i32
  }
  func.func @transform_19(%arg0: i32, %arg1: i32) -> (i32, i32) {
    %c0_i32 = arith.constant 0 : i32
    %c0_i32_0 = arith.constant 0 : i32
    %c0_i32_1 = arith.constant 0 : i32
    return %c0_i32, %c0_i32_0 : i32, i32
  }
  func.func @transform_20(%arg0: i32, %arg1: i32) -> (i32, i32) {
    %c0_i32 = arith.constant 0 : i32
    %c0_i32_0 = arith.constant 0 : i32
    %c0_i32_1 = arith.constant 0 : i32
    return %c0_i32, %c0_i32_0 : i32, i32
  }
  func.func @transform_21(%arg0: i32, %arg1: i32) -> (i32, i32) {
    %c0_i32 = arith.constant 0 : i32
    %c0_i32_0 = arith.constant 0 : i32
    %c0_i32_1 = arith.constant 0 : i32
    return %c0_i32, %c0_i32_0 : i32, i32
  }
  func.func @transform_22(%arg0: i32, %arg1: i32) -> (i32, i32) {
    %c0_i32 = arith.constant 0 : i32
    %c0_i32_0 = arith.constant 0 : i32
    %c0_i32_1 = arith.constant 0 : i32
    return %c0_i32, %c0_i32_0 : i32, i32
  }
  func.func @transform_23(%arg0: i32, %arg1: i32) -> (i32, i32, i32) {
    %c0_i32 = arith.constant 0 : i32
    %c0_i32_0 = arith.constant 0 : i32
    return %arg0, %arg1, %c0_i32 : i32, i32, i32
  }
}

</mosaic_0001>

<bundles_post_ra>
// kernel: tpu_custom_call.1
= control target key start
LH: loop header
LB: loop body
LE: loop exit
PB: predicated region body
PF: predicated region fallthrough
CT: control target
= control target key end

     0   :  { %s7426_s0 = inlined_call_operand.vmem [shape: f32[2,16,32], index: 0, kind: input, shape index: {}]   ;;  %s7427_s1 = inlined_call_operand.vmem [shape: f32[2,16,32], index: 1, kind: input, shape index: {}]   ;;  %s7428_s2 = inlined_call_operand.vmem [shape: f32[2,12,32], index: 2, kind: input, shape index: {}]   ;;  %s7429_s3 = inlined_call_operand.vmem [shape: f32[16,4], index: 3, kind: input, shape index: {}]   ;;  %s7430_s4 = inlined_call_operand.vmem [shape: f32[16,4], index: 4, kind: input, shape index: {}]   ;;  %s7431_s5 = inlined_call_operand.vmem [shape: f32[16,4], index: 5, kind: input, shape index: {}]   ;;  %s7432_s6 = inlined_call_operand.vmem [shape: f32[16,4], index: 6, kind: input, shape index: {}]   ;;  %s7433_s7 = inlined_call_operand.vmem [shape: f32[1,32], index: 7, kind: input, shape index: {}]   ;;  %s7434_s8 = inlined_call_operand.vmem [shape: bf16[32,32], index: 8, kind: input, shape index: {}]   ;;  %s7435_s9 = inlined_call_operand.vmem [shape: bf16[32,16], index: 9, kind: input, shape index: {}]   ;;  %s7436_s10 = inlined_call_operand.vmem [shape: bf16[32,16], index: 10, kind: input, shape index: {}]   ;;  %s7437_s11 = inlined_call_operand.vmem [shape: bf16[32,32], index: 11, kind: input, shape index: {}]   ;;  %s7438_s12 = inlined_call_operand.vmem [shape: f32[1,32], index: 12, kind: input, shape index: {}]   ;;  %s7439_s13 = inlined_call_operand.vmem [shape: bf16[32,64], index: 13, kind: input, shape index: {}]   ;;  %s7440_s14 = inlined_call_operand.vmem [shape: bf16[64,32], index: 14, kind: input, shape index: {}]   ;;  %s7441_s15 = inlined_call_operand.vmem [shape: f32[1,32], index: 15, kind: input, shape index: {}]   ;;  %s7442_s16 = inlined_call_operand.vmem [shape: bf16[32,32], index: 16, kind: input, shape index: {}]   ;;  %s7443_s17 = inlined_call_operand.vmem [shape: bf16[32,16], index: 17, kind: input, shape index: {}]   ;;  %s7444_s18 = inlined_call_operand.vmem [shape: bf16[32,16], index: 18, kind: input, shape index: {}]   ;;  %s7445_s19 = inlined_call_operand.vmem [shape: bf16[32,32], index: 19, kind: input, shape index: {}]   ;;  %s7446_s20 = inlined_call_operand.vmem [shape: f32[1,32], index: 20, kind: input, shape index: {}]   ;;  %s7447_s21 = inlined_call_operand.vmem [shape: bf16[32,64], index: 21, kind: input, shape index: {}]   ;;  %s7448_s22 = inlined_call_operand.vmem [shape: bf16[64,32], index: 22, kind: input, shape index: {}]   ;;  %s7449_s23 = inlined_call_operand.hbm [shape: f32[2,16,32], index: 23, kind: output, shape index: {}]  }
   0x1   :  { %7506 = sst [smem:[#allocation69_spill]] %s7426_s0 }
   0x2   :  { %7507 = sst [smem:[#allocation70_spill]] %s7427_s1 }
   0x3   :  { %7508 = sst [smem:[#allocation71_spill]] %s7428_s2 }
   0x4   :  { %7509 = sst [smem:[#allocation72_spill]] %s7429_s3 }
   0x5   :  { %7510 = sst [smem:[#allocation73_spill]] %s7430_s4 }
   0x6   :  { %7511 = sst [smem:[#allocation74_spill]] %s7431_s5 }
   0x7   :  { %7512 = sst [smem:[#allocation75_spill]] %s7432_s6 }
   0x8   :  { %7513 = sst [smem:[#allocation76_spill]] %s7433_s7 }
   0x9   :  { %7514 = sst [smem:[#allocation77_spill]] %s7448_s22 }
   0xa   :  { %7515 = sst [smem:[#allocation78_spill]] %s7449_s23 }
   0xb   :  { %28 = vsyncpa [#allocation3], 0 }
   0xc   :  { %30 = vsyncpa [#allocation3 + $0x1], 0  ;;  %s5907_s4 = smov 0   ;;  %s5909_s30 = smov 0  }
   0xd   :  { %s5911_s24 = smov 0   ;;  %s5913_s25 = smov 0  }
   0xe   :  { %s5915_s5 = smov 0   ;;  %s5917_s1 = smov 0  }
   0xf   :  { %s5919_s26 = smov 0   ;;  %s5921_s2 = smov 0  }
  0x10 LB: > { %7516 = sst [smem:[#allocation5_spill]] %s5743_s4  ;;  %s5138_s6 = sadd.s32 4294967295, %s5771_s2   ;;  %s5771_s2 = sphi %s5921_s2, %s36_s2   ;;  %s5767_s26 = sphi %s5919_s26, %s7663_s26   ;;  %s5763_s1 = sphi %s5917_s1, %s7662_s1   ;;  %s5759_s5 = sphi %s5915_s5, %s7661_s5   ;;  %s5755_s25 = sphi %s5913_s25, %s7660_s25   ;;  %s5751_s24 = sphi %s5911_s24, %s7659_s24   ;;  %s5747_s30 = sphi %s5909_s30, %s7665_s30   ;;  %s5743_s4 = sphi %s5907_s4, %s7664_s4  }
  0x11   : > { %7517 = sst [smem:[#allocation6_spill]] %s5751_s24  ;;  %s5139_s27 = sadd.s32 4294967294, %s5771_s2  }
  0x12   : > { %7518 = sst [smem:[#allocation7_spill]] %s5763_s1  ;;  %s45_s7 = sadd.s32 1, %s5763_s1 }
  0x13   : > { %7519 = sst [smem:[#allocation8_spill]] %s5767_s26  ;;  %p46_p0 = scmp.ge.s32.totalorder %s45_s7, 2 }
  0x14   : > { %7520 = sst [smem:[#allocation9_spill]] %s5771_s2  ;;  %s48_s28 = sadd.s32 1, %s5767_s26 }
  0x15   : > { %p577_p1 = scmp.ne.s32.totalorder %s5751_s24, %s5747_s30  ;;  %p578_p2 = scmp.eq.s32.totalorder %s5138_s6, 3 }
  0x16   : > { %s7667_s7 = smov (%p46_p0, %s45_s7), 0  ;;  %s7669_s28 = smov (!%p46_p0, %s48_s28), %s5767_s26 }
  0x17   : > { %7521 = sst [smem:[#allocation10_spill]] %s7667_s7  ;;  %s563_s29 = ssub.s32 %s5763_s1, %s7667_s7 }
  0x18   : > { %p5958_p3 = por %p578_p2, %p577_p1  ;;  %p50_p4 = scmp.ge.s32.totalorder %s7669_s28, 2 }
  0x19   : > { %p583_p5 = scmp.ne.s32.totalorder %s5747_s30, %s5743_s4  ;;  %p584_p6 = scmp.eq.s32.totalorder %s5139_s27, 3 }
  0x1a   : > { %s7522_s3 = scalar_select %p5958_p3, 1, 0 }
  0x1b   : > { %p5142_p7 = scmp.ge.s32.totalorder %s5771_s2, 1  ;;  %s7671_s28 = smov (%p50_p4, %s7669_s28), 0 }
  0x1c   : > { %7523 = sst [smem:[#allocation11_spill]] %s7522_s3  ;;  %p5967_p8 = por %p584_p6, %p583_p5 }
  0x1d   : > { %7524 = sst [smem:[#allocation12_spill]] %s7671_s28  ;;  %p697_p9 = scmp.lt.s32.totalorder %s5771_s2, 5 }
  0x1e   : > { %s7525_s0 = scalar_select %p5967_p8, 1, 0 }
  0x1f   : > { %s562_s6 = ssub.s32 %s5767_s26, %s7671_s28  ;;  %s567_s23 = sadd.s32 1, %s5751_s24 }
  0x20   : > { %7526 = sst [smem:[#allocation13_spill]] %s7525_s0  ;;  %s564_s22 = sor.u32 %s563_s29, %s562_s6 }
  0x21   : > { %p698_p10 = pnand %p5142_p7, %p697_p9  ;;  %p565_p11 = scmp.eq.s32.totalorder %s564_s22, 0 }
  0x23   : > { %s5976_s7 = scalar_select %p565_p11, %s5751_s24, %s567_s23  }
  0x24   : > { %701 = sbr.rel (%p698_p10) target bundleno = 4627 (0x1213), region = 112 }
  0x25   : > { %7527 = sst [smem:[#allocation14_spill]] %s5976_s7 }
  0x29   : > { %p782_p12 = scmp.lt.s32.totalorder %s5759_s5, 1  ;;  %p784_p13 = scmp.lt.s32.totalorder %s5755_s25, 1  ;;  %vm882_vm0 = vcmask 261120   ;;  %v5594_v9 = vld [vmem:[%s7434_s8 + $0x8] sm:$0xff]   ;;  %v7466_v10 = vmov 0.0   ;;  %vm5774_vm1 = vmmov 0   ;;  %v7465_v13 = vlaneseq }
  0x2a   : > { %s7528_s7 = sld [smem:[#allocation69_spill]]  ;;  %5308 = vmatprep.subr.bf16.mxu1 %v7466_v10  ;;  %5312 = vmatprep.mubr.msk.bf16.mxu1 %vm5774_vm1, %v7466_v10  ;;  %v5595_v11 = vld [vmem:[%s7434_s8] sm:$0xff]   ;;  %v5598_v12 = vld [vmem:[%s7436_s10 + $0x8] sm:$0xff]   ;;  %v5775_v16 = vmov 1966171168   ;;  %s5776_s28 = smov 4  }
  0x2b   : > { %s5981_s27 = scalar_select %p782_p12, %s5759_s5, 1  ;;  %5309 = vmatpush3.bf16.msra.mxu1 %v5594_v9  ;;  %5324 = vmatprep.subr.bf16.mxu0 %v7466_v10  ;;  %v5599_v14 = vld [vmem:[%s7436_s10] sm:$0xff]   ;;  %v6036_v15 = vshrl.u32 %v7465_v13, 7  ;;  %v1163_v17 = vunpack.c.l.s4 %v5775_v16  ;;  %vm1500_vm2 = vcmask 31744   ;;  %vm2759_vm3 = vcmask 64512  }
  0x2c   : > { %s5984_s1 = scalar_select %p784_p13, %s5755_s25, 1  ;;  %5310 = vmatprep.subr.bf16.mxu1 %v7466_v10  ;;  %5328 = vmatprep.mubr.msk.bf16.mxu0 %vm5774_vm1, %v7466_v10  ;;  %vm2955_vm5 = vcmask 130048   ;;  %vm3328_vm6 = vcmask 195584   ;;  %vm3489_vm7 = vcmask 523264   ;;  %vm4411_vm8 = vcmask 97280  }
  0x2d   : > { %s5144_s29 = sshll.u32 %s5981_s27, 1  ;;  %s5234_s22 = sshll.u32 %s5981_s27, 4  ;;  %5325 = vmatpush3.bf16.msra.mxu0 %v5598_v12  ;;  %v1164_v19 = vunpack.c.0.s8 %v1163_v17  ;;  %v6049_v24 = vsub.s32 0, %v6036_v15  ;;  %vm4465_vm9 = vcmask 1045504  }
  0x2e   : > { %s787_s6 = sadd.s32 %s5144_s29, %s5984_s1  ;;  %s7529_s2 = sld [smem:[#allocation70_spill]]  ;;  %5326 = vmatprep.subr.bf16.mxu0 %v7466_v10 }
  0x2f   : > { %s5145_s23 = sshll.u32 %s787_s6, 3  ;;  %5311 = vmatpush3.bf16.msra.mxu1 %v5595_v11  ;;  %s7530_s4 = sld [smem:[#allocation75_spill]]  ;;  %v6043_v21 = vsub.s32 %v1164_v19, %v6036_v15 }
  0x30   : > { %s5992_s24 = scalar_lea.vmem %s7528_s7, %s5145_s23  ;;  %5316 = vmatprep.subr.bf16.mxu1 %v7466_v10  ;;  %s7532_s6 = sld [smem:[#allocation73_spill]] }
  0x31   : > { %v5995_v0 = vld [vmem:[%s5992_s24] sm:$0xff]  ;;  %5327 = vmatpush3.bf16.msra.mxu0 %v5599_v14  ;;  %s7550_s26 = sld [smem:[#allocation72_spill]]  ;;  %s7648_s27 = smov 104  }
  0x32   : > { %v881_v1 = vmul.f32 %v5995_v0, %v5995_v0  ;;  %5338 = vmatprep.subr.bf16.mxu0 %v7466_v10  ;;  %s7564_s29 = sld [smem:[#allocation76_spill]] }
  0x34   : > { %s794_s3 = scalar_lea.vmem %s7529_s2, %s5234_s22  ;;  %v883_v5 = vsel %vm882_vm0, %v881_v1, 0.0  ;;  %s7536_s2 = sld [smem:[#allocation74_spill]] }
  0x35   : > { %v6004_v2 = vld [vmem:[%s794_s3 + $0x8] sm:$0xff]  ;;  %v6008_v4 = vld [vmem:[%s794_s3] sm:$0xff]  ;;  %884 = vadd.xlane.f32.xlu0 %v883_v5  ;;  %s7531_s7 = smov %s7530_s4  ;;  %s5150_s3 = sshll.u32 %s5984_s1, 3 }
  0x36   : > { %v899_v3 = vmul.f32 %v6004_v2, %v6004_v2  ;;  %v898_v6 = vmul.f32 %v6008_v4, %v6008_v4  ;;  %v879_v18 = vld [vmem:[%s7530_s4] sm:$0xff]  ;;  %v880_v31 = vld [vmem:[%s7531_s7 + $0x8] sm:$0xff]  ;;  %s807_s23 = scalar_lea.vmem %s7532_s6, %s5150_s3  ;;  %s5778_s1 = smov 112  }
  0x37   : > { %v1751_v20 = vcombine.high %v879_v18, %v879_v18  ;;  %v1758_v22 = vrot.slane %v879_v18, %v6043_v21  ;;  %v1807_v38 = vrot.slane %v880_v31, %v6043_v21  ;;  %v1800_v44 = vcombine.high %v880_v31, %v880_v31  ;;  %v876_v55 = vld [vmem:[%s807_s23] sm:$0xff]  ;;  %s7501_s6 = smov 24   ;;  %s7650_s4 = smov 8  }
  0x38   : > { %v903_v7 = vsel %vm882_vm0, %v899_v3, 0.0  ;;  %v900_v8 = vsel %vm882_vm0, %v898_v6, 0.0  ;;  %v1218_v60 = vrot.slane %v876_v55, %v6043_v21  ;;  %v1211_v63 = vcombine.high %v876_v55, %v876_v55 }
  0x39   : > { %904 = vadd.xlane.f32.xlu1 %v903_v7  ;;  %901 = vadd.xlane.f32.xlu0 %v900_v8  ;;  %v1765_v23 = vrot.slane %v1751_v20, %v6043_v21  ;;  %v1766_v25 = vcombine.high %v1758_v22, %v1758_v22  ;;  %v1774_v27 = vrot.slane %v1758_v22, %v6043_v21 }
  0x3a   : > { %v1815_v43 = vcombine.high %v1807_v38, %v1807_v38  ;;  %v1823_v46 = vrot.slane %v1807_v38, %v6043_v21  ;;  %v1814_v49 = vrot.slane %v1800_v44, %v6043_v21  ;;  %v1226_v5 = vcombine.high %v1218_v60, %v1218_v60  ;;  %s7537_s0 = smov %s7536_s2  ;;  %v877_v19 = vld [vmem:[%s7536_s2] sm:$0xff]  ;;  %s803_s2 = scalar_lea.vmem %s7550_s26, %s5150_s3 }
  0x3b   : > { %v1767_v26 = vcombine.high %v1765_v23, %v1765_v23  ;;  %v1788_v28 = vrot.slane %v1766_v25, %v6043_v21  ;;  %v6055_v30 = vrot.slane %v1774_v27, %v6049_v24  ;;  %v1796_v32 = vcombine.high %v1774_v27, %v1774_v27  ;;  %s7504_s3 = smov 104   ;;  %s7651_s26 = smov 24  }
  0x3c   : > { %v1781_v34 = vrot.slane %v1765_v23, %v6043_v21  ;;  %v1837_v48 = vrot.slane %v1815_v43, %v6043_v21  ;;  %v6107_v50 = vrot.slane %v1823_v46, %v6049_v24  ;;  %v1845_v51 = vcombine.high %v1823_v46, %v1823_v46 }
  0x3d   : > { %v1795_v29 = vrot.slane %v1767_v26, %v6043_v21  ;;  %v6061_v33 = vrot.slane %v1788_v28, %v6049_v24  ;;  %v6067_v35 = vrot.slane %v1796_v32, %v6049_v24  ;;  %v1798_v37 = vcombine.high %v1788_v28, %v1788_v28 }
  0x3e   : > { %v6078_v39 = vrot.slane %v1781_v34, %v6049_v24  ;;  %v1797_v40 = vcombine.high %v1781_v34, %v1781_v34  ;;  %v6112_v52 = vrot.slane %v1837_v48, %v6049_v24  ;;  %v1847_v53 = vcombine.high %v1837_v48, %v1837_v48 }
  0x3f   : > { %v6072_v36 = vrot.slane %v1795_v29, %v6049_v24  ;;  %v6083_v41 = vrot.slane %v1798_v37, %v6049_v24  ;;  %v1799_v42 = vcombine.high %v1795_v29, %v1795_v29  ;;  %v1816_v54 = vcombine.high %v1814_v49, %v1814_v49 }
  0x40   : > { %v6088_v45 = vrot.slane %v1797_v40, %v6049_v24  ;;  %v6117_v56 = vrot.slane %v1845_v51, %v6049_v24  ;;  %v1830_v57 = vrot.slane %v1814_v49, %v6043_v21  ;;  %v6123_v58 = vrot.slane %v1847_v53, %v6049_v24  ;;  %v878_v53 = vld [vmem:[%s7537_s0 + $0x8] sm:$0xff] }
  0x41   : > { %v6095_v47 = vrot.slane %v1799_v42, %v6049_v24  ;;  %v1844_v59 = vrot.slane %v1816_v54, %v6043_v21  ;;  %v1234_v7 = vrot.slane %v1218_v60, %v6043_v21  ;;  %v1248_v9 = vrot.slane %v1226_v5, %v6043_v21 }
  0x42   : > { %v6130_v61 = vrot.slane %v1830_v57, %v6049_v24  ;;  %v1846_v62 = vcombine.high %v1830_v57, %v1830_v57  ;;  %v1225_v11 = vrot.slane %v1211_v63, %v6043_v21  ;;  %v1658_v26 = vrot.slane %v877_v19, %v6043_v21 }
  0x43   : > { %v6135_v1 = vrot.slane %v1844_v59, %v6049_v24  ;;  %v1848_v3 = vcombine.high %v1844_v59, %v1844_v59  ;;  %v6153_v12 = vrot.slane %v1234_v7, %v6049_v24  ;;  %v1256_v14 = vcombine.high %v1234_v7, %v1234_v7 }
  0x44   : > { %v6140_v6 = vrot.slane %v1846_v62, %v6049_v24  ;;  %v6158_v16 = vrot.slane %v1248_v9, %v6049_v24  ;;  %v1258_v17 = vcombine.high %v1248_v9, %v1248_v9  ;;  %v1227_v18 = vcombine.high %v1225_v11, %v1225_v11 }
  0x45   : > { %7533 = vst [vmem:[#allocation15_spill] sm:$0xff] %v6135_v1  ;;  %v6146_v8 = vrot.slane %v1848_v3, %v6049_v24  ;;  %v6166_v20 = vrot.slane %v1256_v14, %v6049_v24  ;;  %v1241_v22 = vrot.slane %v1225_v11, %v6043_v21  ;;  %v1666_v32 = vcombine.high %v1658_v26, %v1658_v26 }
  0x46   : > { %7534 = vst [vmem:[#allocation16_spill] sm:$0xff] %v6140_v6  ;;  %v6172_v23 = vrot.slane %v1258_v17, %v6049_v24  ;;  %v1255_v25 = vrot.slane %v1227_v18, %v6043_v21  ;;  %v1651_v34 = vcombine.high %v877_v19, %v877_v19  ;;  %v1674_v38 = vrot.slane %v1658_v26, %v6043_v21 }
  0x47   : > { %7535 = vst [vmem:[#allocation17_spill] sm:$0xff] %v6146_v8  ;;  %v6179_v27 = vrot.slane %v1241_v22, %v6049_v24  ;;  %v1257_v28 = vcombine.high %v1241_v22, %v1241_v22  ;;  %v1688_v42 = vrot.slane %v1666_v32, %v6043_v21  ;;  %v1707_v60 = vrot.slane %v878_v53, %v6043_v21  ;;  %v875_v32 = vld [vmem:[%s803_s2] sm:$0xff]  ;;  %s5777_s2 = smov 120  }
  0x48   : > { %v6184_v29 = vrot.slane %v1255_v25, %v6049_v24  ;;  %v1259_v31 = vcombine.high %v1255_v25, %v1255_v25  ;;  %v1665_v43 = vrot.slane %v1651_v34, %v6043_v21  ;;  %v6202_v44 = vrot.slane %v1674_v38, %v6049_v24 }
  0x49   : > { %7538 = vst [vmem:[#allocation18_spill] sm:$0xff] %v6179_v27  ;;  %v6189_v37 = vrot.slane %v1257_v28, %v6049_v24  ;;  %v1696_v46 = vcombine.high %v1674_v38, %v1674_v38  ;;  %v6207_v48 = vrot.slane %v1688_v42, %v6049_v24  ;;  %v1698_v49 = vcombine.high %v1688_v42, %v1688_v42 }
  0x4a   : > { %2027 = vrot.lane.b32.xlu1 %v6061_v33, %s5776_s28  ;;  %7539 = vst [vmem:[#allocation19_spill] sm:$0xff] %v6184_v29  ;;  %v6195_v40 = vrot.slane %v1259_v31, %v6049_v24  ;;  %7542 = vst [vmem:[#allocation22_spill] sm:$0xff] %v6202_v44  ;;  %v1667_v51 = vcombine.high %v1665_v43, %v1665_v43  ;;  %v1681_v55 = vrot.slane %v1665_v43, %v6043_v21 }
  0x4b   : > { %7540 = vst [vmem:[#allocation20_spill] sm:$0xff] %v6189_v37  ;;  %7543 = vst [vmem:[#allocation23_spill] sm:$0xff] %v6207_v48  ;;  %v6215_v54 = vrot.slane %v1696_v46, %v6049_v24  ;;  %v6221_v57 = vrot.slane %v1698_v49, %v6049_v24  ;;  %v1715_v7 = vcombine.high %v1707_v60, %v1707_v60 }
  0x4c   : > { %7541 = vst [vmem:[#allocation21_spill] sm:$0xff] %v6195_v40  ;;  %v1695_v59 = vrot.slane %v1667_v51, %v6043_v21  ;;  %v6228_v62 = vrot.slane %v1681_v55, %v6049_v24  ;;  %v1697_v63 = vcombine.high %v1681_v55, %v1681_v55  ;;  %v1700_v9 = vcombine.high %v878_v53, %v878_v53 }
  0x4d   : > { %7544 = vst [vmem:[#allocation24_spill] sm:$0xff] %v6215_v54  ;;  %7545 = vst [vmem:[#allocation25_spill] sm:$0xff] %v6221_v57  ;;  %v1723_v14 = vrot.slane %v1707_v60, %v6043_v21  ;;  %v1737_v18 = vrot.slane %v1715_v7, %v6043_v21  ;;  %v1168_v46 = vrot.slane %v875_v32, %v6043_v21 }
  0x4e   : > { %2035 = vrot.lane.b32.xlu1 %v6072_v36, %s5776_s28  ;;  %7546 = vst [vmem:[#allocation26_spill] sm:$0xff] %v6228_v62  ;;  %v6233_v3 = vrot.slane %v1695_v59, %v6049_v24  ;;  %v1699_v5 = vcombine.high %v1695_v59, %v1695_v59  ;;  %v6238_v11 = vrot.slane %v1697_v63, %v6049_v24 }
  0x4f   : > { %2025 = vrot.lane.b32.xlu0 %v6055_v30, %s5776_s28  ;;  %v1714_v19 = vrot.slane %v1700_v9, %v6043_v21  ;;  %v6256_v22 = vrot.slane %v1723_v14, %v6049_v24  ;;  %v1745_v25 = vcombine.high %v1723_v14, %v1723_v14  ;;  %v6261_v26 = vrot.slane %v1737_v18, %v6049_v24 }
  0x50   : > { %7547 = vst [vmem:[#allocation27_spill] sm:$0xff] %v6233_v3  ;;  %7548 = vst [vmem:[#allocation28_spill] sm:$0xff] %v6238_v11  ;;  %v6244_v17 = vrot.slane %v1699_v5, %v6049_v24  ;;  %v1747_v28 = vcombine.high %v1737_v18, %v1737_v18  ;;  %v1161_v53 = vcombine.high %v875_v32, %v875_v32 }
  0x51   : > { %7551 = vst [vmem:[#allocation30_spill] sm:$0xff] %v6256_v22  ;;  %7552 = vst [vmem:[#allocation31_spill] sm:$0xff] %v6261_v26  ;;  %v1716_v31 = vcombine.high %v1714_v19, %v1714_v19  ;;  %v6266_v34 = vrot.slane %v1745_v25, %v6049_v24  ;;  %v1730_v38 = vrot.slane %v1714_v19, %v6043_v21 }
  0x52   : > { %2031 = vrot.lane.b32.xlu1 %v6083_v41, %s5776_s28  ;;  %7549 = vst [vmem:[#allocation29_spill] sm:$0xff] %v6244_v17  ;;  %v6272_v42 = vrot.slane %v1747_v28, %v6049_v24  ;;  %v1176_v60 = vcombine.high %v1168_v46, %v1168_v46  ;;  %v1184_v5 = vrot.slane %v1168_v46, %v6043_v21 }
  0x53   : > { %2029 = vrot.lane.b32.xlu0 %v6067_v35, %s5776_s28  ;;  %7553 = vst [vmem:[#allocation32_spill] sm:$0xff] %v6266_v34  ;;  %v1744_v43 = vrot.slane %v1716_v31, %v6043_v21  ;;  %v6279_v49 = vrot.slane %v1730_v38, %v6049_v24  ;;  %v1746_v51 = vcombine.high %v1730_v38, %v1730_v38 }
  0x54   : > { %7554 = vst [vmem:[#allocation33_spill] sm:$0xff] %v6272_v42  ;;  %v1198_v9 = vrot.slane %v1176_v60, %v6043_v21  ;;  %v1175_v14 = vrot.slane %v1161_v53, %v6043_v21  ;;  %v6302_v18 = vrot.slane %v1184_v5, %v6049_v24 }
  0x55   : > { %7555 = vst [vmem:[#allocation34_spill] sm:$0xff] %v6279_v49  ;;  %v6284_v55 = vrot.slane %v1744_v43, %v6049_v24  ;;  %v1748_v59 = vcombine.high %v1744_v43, %v1744_v43  ;;  %v6289_v63 = vrot.slane %v1746_v51, %v6049_v24 }
  0x56   : > { %2039 = vrot.lane.b32.xlu1 %v6095_v47, %s5776_s28  ;;  %7559 = vst [vmem:[#allocation38_spill] sm:$0xff] %v6302_v18  ;;  %v6307_v19 = vrot.slane %v1198_v9, %v6049_v24  ;;  %v1208_v25 = vcombine.high %v1198_v9, %v1198_v9  ;;  %v1177_v28 = vcombine.high %v1175_v14, %v1175_v14 }
  0x57   : > { %2033 = vrot.lane.b32.xlu0 %v6078_v39, %s5776_s28  ;;  %7556 = vst [vmem:[#allocation35_spill] sm:$0xff] %v6284_v55  ;;  %7557 = vst [vmem:[#allocation36_spill] sm:$0xff] %v6289_v63  ;;  %v6295_v7 = vrot.slane %v1748_v59, %v6049_v24 }
  0x58   : > { %7560 = vst [vmem:[#allocation39_spill] sm:$0xff] %v6307_v19  ;;  %v6314_v43 = vrot.slane %v1208_v25, %v6049_v24  ;;  %v1205_v46 = vrot.slane %v1177_v28, %v6043_v21 }
  0x59   : > { %7558 = vst [vmem:[#allocation37_spill] sm:$0xff] %v6295_v7 }
  0x5a   : > { %2043 = vrot.lane.b32.xlu1 %v6112_v52, %s5776_s28  ;;  %7561 = vst [vmem:[#allocation40_spill] sm:$0xff] %v6314_v43  ;;  %v1209_v13 = vcombine.high %v1205_v46, %v1205_v46 }
  0x5b   : > { %2037 = vrot.lane.b32.xlu0 %v6088_v45, %s5776_s28 }
  0x5c   : > { %v6325_v25 = vrot.slane %v1209_v13, %v6049_v24  ;;  %v5596_v13 = vld [vmem:[%s7435_s9 + $0x8] sm:$0xff]  }
  0x5e   : > { %2047 = vrot.lane.b32.xlu1 %v6123_v58, %s5776_s28  ;;  %7563 = vst [vmem:[#allocation42_spill] sm:$0xff] %v6325_v25 }
  0x5f   : > { %2041 = vrot.lane.b32.xlu0 %v6107_v50, %s5776_s28 }
  0x62   : > { %2051 = vrot.lane.b32.xlu1 %v6135_v1, %s5776_s28 }
  0x63   : > { %2045 = vrot.lane.b32.xlu0 %v6117_v56, %s5776_s28 }
  0x66   : > { %2055 = vrot.lane.b32.xlu1 %v6146_v8, %s5776_s28 }
  0x67   : > { %2049 = vrot.lane.b32.xlu0 %v6130_v61, %s5776_s28 }
  0x6a   : > { %1350 = vrot.lane.b32.xlu1 %v6158_v16, %s5776_s28 }
  0x6b   : > { %2053 = vrot.lane.b32.xlu0 %v6140_v6, %s5776_s28 }
  0x6e   : > { %1354 = vrot.lane.b32.xlu1 %v6172_v23, %s5776_s28 }
  0x6f   : > { %1348 = vrot.lane.b32.xlu0 %v6153_v12, %s5776_s28 }
  0x72   : > { %1358 = vrot.lane.b32.xlu1 %v6184_v29, %s5776_s28 }
  0x73   : > { %1352 = vrot.lane.b32.xlu0 %v6166_v20, %s5776_s28 }
  0x76   : > { %1362 = vrot.lane.b32.xlu1 %v6195_v40, %s5776_s28 }
  0x77   : > { %1356 = vrot.lane.b32.xlu0 %v6179_v27, %s5776_s28 }
  0x7a   : > { %2171 = vrot.lane.b32.xlu1 %v6207_v48, %s5776_s28 }
  0x7b   : > { %1360 = vrot.lane.b32.xlu0 %v6189_v37, %s5776_s28 }
  0x7e   : > { %2175 = vrot.lane.b32.xlu1 %v6221_v57, %s5776_s28 }
  0x7f   : > { %2169 = vrot.lane.b32.xlu0 %v6202_v44, %s5776_s28 }
  0x82   : > { %2179 = vrot.lane.b32.xlu1 %v6233_v3, %s5776_s28 }
  0x83   : > { %2173 = vrot.lane.b32.xlu0 %v6215_v54, %s5776_s28 }
  0x86   : > { %2183 = vrot.lane.b32.xlu1 %v6244_v17, %s5776_s28 }
  0x87   : > { %2177 = vrot.lane.b32.xlu0 %v6228_v62, %s5776_s28 }
  0x8a   : > { %2187 = vrot.lane.b32.xlu1 %v6261_v26, %s5776_s28 }
  0x8b   : > { %2181 = vrot.lane.b32.xlu0 %v6238_v11, %s5776_s28 }
  0x8e   : > { %2191 = vrot.lane.b32.xlu1 %v6272_v42, %s5776_s28 }
  0x8f   : > { %2185 = vrot.lane.b32.xlu0 %v6256_v22, %s5776_s28 }
  0x92   : > { %2195 = vrot.lane.b32.xlu1 %v6284_v55, %s5776_s28 }
  0x93   : > { %2189 = vrot.lane.b32.xlu0 %v6266_v34, %s5776_s28 }
  0x96   : > { %2199 = vrot.lane.b32.xlu1 %v6295_v7, %s5776_s28 }
  0x97   : > { %2193 = vrot.lane.b32.xlu0 %v6279_v49, %s5776_s28 }
  0x9a   : > { %1422 = vrot.lane.b32.xlu1 %v6307_v19, %s5776_s28 }
  0x9b   : > { %2197 = vrot.lane.b32.xlu0 %v6289_v63, %s5776_s28 }
  0x9e   : > { %1426 = vrot.lane.b32.xlu1 %v6314_v43, %s5776_s28 }
  0x9f   : > { %1420 = vrot.lane.b32.xlu0 %v6302_v18, %s5776_s28 }
  0xbe   : > { %v885_v31 = vpop.xlane.xlu0 %884 }
  0xbf   : > { %v887_v32 = vmul.f32 0.03125, %v885_v31  ;;  %v6320_v31 = vrot.slane %v1205_v46, %v6049_v24 }
  0xc1   : > { %v888_v53 = vadd.f32 1e-06, %v887_v32  ;;  %7562 = vst [vmem:[#allocation41_spill] sm:$0xff] %v6320_v31  ;;  %1430 = vrot.lane.b32.xlu1 %v6320_v31, %s5776_s28  ;;  %v5153_v32 = vld [vmem:[%s7564_s29] ss:$0 sm:$0xff]  ;;  %s5782_s29 = smov 124  }
  0xc2   : > { %v905_v38 = vpop.xlane.xlu1 %904  ;;  %v902_v60 = vpop.xlane.xlu0 %901 }
  0xc3   : > { %v907_v51 = vmul.f32 0.03125, %v905_v38  ;;  %5626 = vrsqrt.f32 %v888_v53  ;;  %v906_v9 = vmul.f32 0.03125, %v902_v60 }
  0xc5   : > { %v909_v59 = vadd.f32 1e-06, %v907_v51  ;;  %v908_v10 = vadd.f32 1e-06, %v906_v9  ;;  %1434 = vrot.lane.b32.xlu1 %v6325_v25, %s5776_s28 }
  0xc7   : > { %5628 = vrsqrt.f32 %v909_v59 }
  0xc8   : > { %5630 = vrsqrt.f32 %v908_v10 }
  0xd0   : > { %v5627_v28 = vpop.eup %5626 }
  0xd1   : > { %v890_v46 = vmul.f32 %v5627_v28, %v5995_v0  ;;  %v5597_v0 = vld [vmem:[%s7435_s9] sm:$0xff]   ;;  %v7565_v28 = vmov 0.0  }
  0xd3   : > { %v897_v10 = vmul.f32 %v5153_v32, %v890_v46 }
  0xd4   : > { %v5629_v38 = vpop.eup %5628 }
  0xd5   : > { %v913_v51 = vmul.f32 %v5629_v38, %v6004_v2  ;;  %v5631_v53 = vpop.eup %5630  ;;  %v916_v9 = vpack.c.bf16 %v897_v10, %v897_v10 }
  0xd6   : > { %v912_v59 = vmul.f32 %v5631_v53, %v6008_v4  ;;  %v1206_v4 = vcombine.high %v1184_v5, %v1184_v5  ;;  %v6368_v5 = vpop.permute.xlu1 %2027 }
  0xd7   : > { %v915_v60 = vmul.f32 %v5153_v32, %v913_v51  ;;  %5313 = vmatmul.mubr.msk.bf16.vlgmr.msra.gmra.mxu1 %vm882_vm0, %v916_v9 }
  0xd8   : > { %v914_v7 = vmul.f32 %v5153_v32, %v912_v59  ;;  %5317 = vmatpush3.bf16.msra.mxu1 %v5596_v13  ;;  %5320 = vmatprep.mubr.msk.bf16.mxu1 %vm5774_vm1, %v7565_v28  ;;  %v6353_v32 = vrot.slane %v1206_v4, %v6049_v24 }
  0xd9   : > { %5318 = vmatprep.subr.bf16.mxu1 %v7565_v28 }
  0xda   : > { %v972_v2 = vpack.c.bf16 %v915_v60, %v914_v7  ;;  %7566 = vst [vmem:[#allocation43_spill] sm:$0xff] %v6353_v32  ;;  %1424 = vrot.lane.b32.xlu0 %v6353_v32, %s5776_s28  ;;  %v1191_v7 = vrot.slane %v1175_v14, %v6043_v21  ;;  %v6370_v10 = vpop.permute.xlu1 %2035  ;;  %v6376_v14 = vpop.permute.xlu0 %2025 }
  0xdc   : > { %5329 = vmatmul.mubr.msk.bf16.vlgmr.msra.gmra.mxu0 %vm882_vm0, %v972_v2  ;;  %5319 = vmatpush3.bf16.msra.mxu1 %v5597_v0  ;;  %v6359_v38 = vrot.slane %v1191_v7, %v6049_v24  ;;  %v1207_v46 = vcombine.high %v1191_v7, %v1191_v7 }
  0xdd   : > { %5340 = vmatprep.mubr.msk.bf16.mxu0 %vm5774_vm1, %v7565_v28  ;;  %5332 = vmatprep.subr.bf16.mxu1 %v7565_v28 }
  0xde   : > { %7567 = vst [vmem:[#allocation44_spill] sm:$0xff] %v6359_v38  ;;  %1428 = vrot.lane.b32.xlu0 %v6359_v38, %s5776_s28  ;;  %v6364_v51 = vrot.slane %v1207_v46, %v6049_v24  ;;  %v6372_v53 = vpop.permute.xlu1 %2031  ;;  %v6380_v59 = vpop.permute.xlu0 %2029 }
  0xdf   : > { %5321 = vmatmul.mubr.msk.bf16.vlgmr.msra.gmra.mxu1 %vm882_vm0, %v972_v2 }
  0xe0   : > { %5334 = vmatprep.mubr.msk.bf16.mxu1 %vm5774_vm1, %v7565_v28  ;;  %7568 = vst [vmem:[#allocation45_spill] sm:$0xff] %v6364_v51 }
  0xe2   : > { %1432 = vrot.lane.b32.xlu0 %v6364_v51, %s5776_s28  ;;  %v6374_v21 = vpop.permute.xlu1 %2039  ;;  %v6392_v4 = vpop.permute.xlu0 %2033 }
  0xe6   : > { %v6378_v13 = vpop.permute.xlu1 %2043 }
  0xea   : > { %v6386_v24 = vpop.permute.xlu1 %2047 }
  0xee   : > { %v6394_v55 = vpop.permute.xlu1 %2051 }
 0x197   : > { %v6382_v60 = vpop.f32.mrf.mxu1 }
 0x198   : > { %1083 = vrot.lane.b32.xlu1 %v6382_v60, %s5777_s2 }
 0x199   : > { %v5314_v9 = vpop.f32.mrf.mxu1 }
 0x19b   : > { %v969_v0 = vpop.f32.mrf.mxu1 }
 0x19c   : > { %v6388_v2 = vpop.f32.mrf.mxu0  ;;  %1086 = vrot.lane.b32.xlu1 %v6382_v60, %s5778_s1 }
 0x19d   : > { %7569 = vst [vmem:[#allocation46_spill] sm:$0xff] %v6388_v2  ;;  %v5315_v7 = vpop.f32.mrf.mxu1  ;;  %v6402_v2 = vpop.permute.xlu0 %2037 }
 0x19e   : > { %v5330_v46 = vpop.f32.mrf.mxu0  ;;  %v6410_v7 = vpop.permute.xlu1 %2055 }
 0x19f   : > { %v6396_v63 = vpop.f32.mrf.mxu1 }
 0x1a0   : > { %v6398_v49 = vpop.f32.mrf.mxu0  ;;  %1089 = vrot.lane.b32.xlu1 %v6382_v60, %s7504_s3 }
 0x1a1   : > { %7570 = vst [vmem:[#allocation47_spill] sm:$0xff] %v6398_v49  ;;  %v5322_v9 = vpop.f32.mrf.mxu1  ;;  %v6412_v49 = vpop.permute.xlu0 %2041 }
 0x1a2   : > { %v5331_v0 = vpop.f32.mrf.mxu0  ;;  %v6414_v26 = vpop.permute.xlu1 %1350 }
 0x1a3   : > { %v6404_v42 = vpop.f32.mrf.mxu1 }
 0x1a4   : > { %1511 = vrot.lane.b32.xlu1 %v6396_v63, %s5777_s2  ;;  %1513 = vrot.lane.b32.xlu0 %v6404_v42, %s5777_s2 }
 0x1a5   : > { %v5323_v46 = vpop.f32.mrf.mxu1  ;;  %v6416_v34 = vpop.permute.xlu0 %2045 }
 0x1a6   : > { %v6418_v9 = vpop.permute.xlu1 %1354 }
 0x1a9   : > { %v6420_v0 = vpop.permute.xlu0 %2049 }
 0x1aa   : > { %v6422_v22 = vpop.permute.xlu1 %1358 }
 0x1ad   : > { %v6424_v17 = vpop.permute.xlu0 %2053 }
 0x1ae   : > { %v6426_v3 = vpop.permute.xlu1 %1362 }
 0x1b1   : > { %v1349_v11 = vpop.permute.xlu0 %1348 }
 0x1b2   : > { %v6428_v62 = vpop.permute.xlu1 %2171 }
 0x1b3   : > { %7571 = vst [vmem:[#allocation48_spill] sm:$0xff] %v6428_v62 }
 0x1b5   : > { %v1353_v46 = vpop.permute.xlu0 %1352 }
 0x1b6   : > { %v6430_v57 = vpop.permute.xlu1 %2175 }
 0x1b7   : > { %7572 = vst [vmem:[#allocation49_spill] sm:$0xff] %v6430_v57 }
 0x1b9   : > { %v1357_v48 = vpop.permute.xlu0 %1356 }
 0x1ba   : > { %v6432_v54 = vpop.permute.xlu1 %2179 }
 0x1bb   : > { %7573 = vst [vmem:[#allocation50_spill] sm:$0xff] %v6432_v54 }
 0x1bd   : > { %v6434_v44 = vpop.permute.xlu0 %1360 }
 0x1be   : > { %v6436_v25 = vpop.permute.xlu1 %2183 }
 0x1bf   : > { %7574 = vst [vmem:[#allocation51_spill] sm:$0xff] %v6436_v25 }
 0x1c1   : > { %v6438_v31 = vpop.permute.xlu0 %2169 }
 0x1c2   : > { %7575 = vst [vmem:[#allocation52_spill] sm:$0xff] %v6438_v31  ;;  %v6440_v51 = vpop.permute.xlu1 %2187 }
 0x1c3   : > { %7576 = vst [vmem:[#allocation53_spill] sm:$0xff] %v6440_v51 }
 0x1c5   : > { %v6442_v43 = vpop.permute.xlu0 %2173 }
 0x1c6   : > { %7577 = vst [vmem:[#allocation54_spill] sm:$0xff] %v6442_v43  ;;  %v6444_v38 = vpop.permute.xlu1 %2191 }
 0x1c7   : > { %7578 = vst [vmem:[#allocation55_spill] sm:$0xff] %v6444_v38 }
 0x1c9   : > { %v6446_v19 = vpop.permute.xlu0 %2177 }
 0x1ca   : > { %7579 = vst [vmem:[#allocation56_spill] sm:$0xff] %v6446_v19  ;;  %v6448_v62 = vpop.permute.xlu1 %2195 }
 0x1cb   : > { %7580 = vst [vmem:[#allocation57_spill] sm:$0xff] %v6448_v62 }
 0x1cd   : > { %v6450_v57 = vpop.permute.xlu0 %2181 }
 0x1ce   : > { %7581 = vst [vmem:[#allocation58_spill] sm:$0xff] %v6450_v57  ;;  %v6452_v32 = vpop.permute.xlu1 %2199 }
 0x1cf   : > { %7582 = vst [vmem:[#allocation59_spill] sm:$0xff] %v6452_v32  ;;  %v5780_v32 = vmov 1983009808  }
 0x1d0   : > { %v1095_v40 = vunpack.c.l.s4 %v5780_v32 }
 0x1d1   : > { %v6454_v54 = vpop.permute.xlu0 %2185 }
 0x1d2   : > { %7583 = vst [vmem:[#allocation60_spill] sm:$0xff] %v6454_v54  ;;  %v6456_v18 = vpop.permute.xlu1 %1422  ;;  %v5781_v54 = vmov 1934713408   ;;  %v1096_v37 = vunpack.c.0.s8 %v1095_v40 }
 0x1d3   : > { %7584 = vst [vmem:[#allocation61_spill] sm:$0xff] %v6456_v18  ;;  %v1127_v29 = vunpack.c.l.s4 %v5781_v54 }
 0x1d5   : > { %v6458_v25 = vpop.permute.xlu0 %2189 }
 0x1d6   : > { %7585 = vst [vmem:[#allocation62_spill] sm:$0xff] %v6458_v25  ;;  %v6460_v31 = vpop.permute.xlu1 %1426 }
 0x1d7   : > { %7586 = vst [vmem:[#allocation63_spill] sm:$0xff] %v6460_v31  ;;  %v1128_v31 = vunpack.c.0.s8 %v1127_v29 }
 0x1d9   : > { %v6462_v51 = vpop.permute.xlu0 %2193  ;;  %v6480_v1 = vsub.s32 %v1128_v31, %v6036_v15 }
 0x1da   : > { %7587 = vst [vmem:[#allocation64_spill] sm:$0xff] %v6462_v51  ;;  %v6464_v43 = vpop.permute.xlu1 %1430 }
 0x1db   : > { %7588 = vst [vmem:[#allocation65_spill] sm:$0xff] %v6464_v43 }
 0x1dd   : > { %v6466_v38 = vpop.permute.xlu0 %2197 }
 0x1de   : > { %7589 = vst [vmem:[#allocation66_spill] sm:$0xff] %v6466_v38  ;;  %v6468_v19 = vpop.permute.xlu1 %1434  ;;  %v6477_v38 = vsub.s32 %v1096_v37, %v6036_v15 }
 0x1e1   : > { %v6470_v62 = vpop.permute.xlu0 %1420 }
 0x1e2   : > { %7590 = vst [vmem:[#allocation67_spill] sm:$0xff] %v6470_v62 }
 0x1e5   : > { %v6472_v18 = vpop.permute.xlu0 %1424 }
 0x1e6   : > { %7591 = vst [vmem:[#allocation68_spill] sm:$0xff] %v6472_v18 }
 0x1e9   : > { %v6482_v32 = vpop.permute.xlu0 %1428 }
 0x20a   : > { %v1084_v57 = vpop.permute.xlu1 %1083 }
 0x20e   : > { %v1087_v25 = vpop.permute.xlu1 %1086 }
 0x20f   : > { %v1092_v51 = vcombine.low %v6382_v60, %v1087_v25  ;;  %v1093_v43 = vcombine.high %v6382_v60, %v1087_v25 }
 0x211   : > { %v1100_v54 = vrot.slane %v1092_v51, %v6477_v38  ;;  %v1107_v40 = vrot.slane %v1093_v43, %v6477_v38 }
 0x212   : > { %v1090_v8 = vpop.permute.xlu1 %1089 }
 0x213   : > { %v1108_v27 = vcombine.low %v1084_v57, %v1090_v8  ;;  %v1109_v62 = vcombine.high %v1084_v57, %v1090_v8  ;;  %v1433_v57 = vpop.permute.xlu0 %1432 }
 0x215   : > { %v1116_v29 = vrot.slane %v1108_v27, %v6477_v38  ;;  %v1123_v18 = vrot.slane %v1109_v62, %v6477_v38 }
 0x217   : > { %v1124_v25 = vcombine.low %v1100_v54, %v1116_v29  ;;  %v1125_v60 = vcombine.high %v1100_v54, %v1116_v29  ;;  %v1141_v6 = vcombine.high %v1107_v40, %v1123_v18  ;;  %v1140_v51 = vcombine.low %v1107_v40, %v1123_v18  ;;  %v1512_v29 = vpop.permute.xlu1 %1511 }
 0x219   : > { %v6489_v37 = vrot.slane %v1124_v25, %v6480_v1  ;;  %v6492_v8 = vrot.slane %v1141_v6, %v6480_v1  ;;  %v6495_v31 = vrot.slane %v1125_v60, %v6480_v1  ;;  %v6507_v6 = vrot.slane %v1140_v51, %v6480_v1 }
 0x21b   : > { %v6498_v43 = vmul.f32 %v1433_v57, %v6492_v8  ;;  %v1372_v27 = vmul.f32 %v1349_v11, %v6489_v37  ;;  %v6504_v62 = vcombine.high %v6489_v37, %v7565_v28  ;;  %v1374_v54 = vmul.f32 %v1353_v46, %v6495_v31 }
 0x21c   : > { %v6514_v40 = vcombine.high %v6495_v31, %v7565_v28  ;;  %v1376_v11 = vmul.f32 %v1357_v48, %v6507_v6  ;;  %v6523_v46 = vcombine.high %v6507_v6, %v7565_v28  ;;  %v1378_v60 = vmul.f32 %v6434_v44, %v6492_v8 }
 0x21d   : > { %1388 = vrot.lane.b32.xlu0 %v1372_v27, %s5782_s29  ;;  %v1373_v18 = vmul.f32 %v6414_v26, %v6504_v62  ;;  %v1539_v26 = vrot.slane %v1512_v29, %v6477_v38  ;;  %v6534_v57 = vcombine.high %v6492_v8, %v7565_v28  ;;  %v1452_v27 = vmul.f32 %v6153_v12, %v6489_v37 }
 0x21e   : > { %v1375_v25 = vmul.f32 %v6418_v9, %v6514_v40  ;;  %v1377_v48 = vmul.f32 %v6422_v22, %v6523_v46  ;;  %v1524_v9 = vrot.slane %v6396_v63, %v6477_v38  ;;  %v1532_v12 = vcombine.high %v1512_v29, %v7565_v28 }
 0x21f   : > { %1390 = vrot.lane.b32.xlu1 %v1373_v18, %s5782_s29  ;;  %v1379_v44 = vmul.f32 %v6426_v3, %v6534_v57  ;;  %v1454_v18 = vmul.f32 %v6166_v20, %v6495_v31 }
 0x220   : > { %v1547_v51 = vcombine.low %v1524_v9, %v1539_v26  ;;  %v1548_v22 = vcombine.high %v1524_v9, %v1539_v26  ;;  %v1455_v26 = vmul.f32 %v6172_v23, %v6514_v40  ;;  %v1546_v29 = vrot.slane %v1532_v12, %v6477_v38 }
 0x221   : > { %1392 = vrot.lane.b32.xlu0 %v1374_v54, %s5782_s29 }
 0x222   : > { %v6547_v54 = vrot.slane %v1547_v51, %v6480_v1  ;;  %v6557_v3 = vrot.slane %v1548_v22, %v6480_v1  ;;  %v1514_v22 = vpop.permute.xlu0 %1513 }
 0x223   : > { %1394 = vrot.lane.b32.xlu1 %v1375_v25, %s5782_s29 }
 0x224   : > { %v2073_v25 = vmul.f32 %v6376_v14, %v6547_v54  ;;  %v6565_v20 = vcombine.high %v6547_v54, %v7565_v28  ;;  %v6578_v23 = vcombine.high %v6557_v3, %v7565_v28 }
 0x225   : > { %1396 = vrot.lane.b32.xlu0 %v1376_v11, %s5782_s29  ;;  %v1453_v11 = vmul.f32 %v6158_v16, %v6504_v62  ;;  %v1517_v16 = vcombine.high %v6396_v63, %v7565_v28  ;;  %v6584_v63 = vmul.f32 %v6468_v19, %v6534_v57  ;;  %v2235_v19 = vmul.f32 %v6067_v35, %v6557_v3 }
 0x226   : > { %v2074_v14 = vmul.f32 %v6368_v5, %v6565_v20  ;;  %v2076_v5 = vmul.f32 %v6372_v53, %v6578_v23 }
 0x227   : > { %1398 = vrot.lane.b32.xlu1 %v1377_v48, %s5782_s29  ;;  %v1531_v48 = vrot.slane %v1517_v16, %v6477_v38 }
 0x229   : > { %1400 = vrot.lane.b32.xlu0 %v1378_v60, %s5782_s29  ;;  %v2075_v60 = vmul.f32 %v6380_v59, %v6557_v3  ;;  %v1563_v9 = vcombine.low %v1531_v48, %v1546_v29  ;;  %v2233_v59 = vmul.f32 %v6055_v30, %v6547_v54  ;;  %v1564_v51 = vcombine.high %v1531_v48, %v1546_v29 }
 0x22b   : > { %1402 = vrot.lane.b32.xlu1 %v1379_v44, %s5782_s29  ;;  %v2234_v44 = vmul.f32 %v6061_v33, %v6565_v20  ;;  %v6603_v30 = vrot.slane %v1564_v51, %v6480_v1  ;;  %v1605_v33 = vrot.slane %v1514_v22, %v6477_v38 }
 0x22d   : > { %1468 = vrot.lane.b32.xlu0 %v1452_v27, %s5776_s28  ;;  %v6594_v27 = vrot.slane %v1563_v9, %v6480_v1  ;;  %v6622_v12 = vcombine.high %v6603_v30, %v7565_v28  ;;  %v2239_v29 = vmul.f32 %v6088_v45, %v6603_v30 }
 0x22f   : > { %1470 = vrot.lane.b32.xlu1 %v1453_v11, %s5776_s28  ;;  %v2077_v53 = vmul.f32 %v6392_v4, %v6594_v27  ;;  %v6611_v35 = vcombine.high %v6594_v27, %v7565_v28  ;;  %v2079_v11 = vmul.f32 %v6402_v2, %v6603_v30  ;;  %v2080_v2 = vmul.f32 %v6374_v21, %v6622_v12 }
 0x230   : > { %v2240_v48 = vmul.f32 %v6095_v47, %v6622_v12 }
 0x231   : > { %1472 = vrot.lane.b32.xlu0 %v1454_v18, %s5776_s28  ;;  %v2236_v18 = vmul.f32 %v6083_v41, %v6578_v23  ;;  %v2078_v4 = vmul.f32 %v6370_v10, %v6611_v35  ;;  %v1590_v41 = vrot.slane %v6404_v42, %v6477_v38 }
 0x233   : > { %1474 = vrot.lane.b32.xlu1 %v1455_v26, %s5776_s28  ;;  %v2237_v26 = vmul.f32 %v6078_v39, %v6594_v27  ;;  %v1614_v10 = vcombine.high %v1590_v41, %v1605_v33  ;;  %v1598_v39 = vcombine.high %v1514_v22, %v7565_v28 }
 0x235   : > { %2105 = vrot.lane.b32.xlu0 %v2073_v25, %s5782_s29  ;;  %v1613_v25 = vcombine.low %v1590_v41, %v1605_v33  ;;  %v6645_v21 = vrot.slane %v1614_v10, %v6480_v1  ;;  %v1612_v9 = vrot.slane %v1598_v39, %v6477_v38  ;;  %v7594_v41 = vld [vmem:[#allocation18_spill] sm:$0xff]  ;;  %v7597_v10 = vld [vmem:[#allocation19_spill] sm:$0xff] }
 0x237   : > { %2107 = vrot.lane.b32.xlu1 %v2074_v14, %s5782_s29  ;;  %v6635_v16 = vrot.slane %v1613_v25, %v6480_v1  ;;  %v6666_v47 = vcombine.high %v6645_v21, %v7565_v28  ;;  %v7595_v25 = vld [vmem:[#allocation17_spill] sm:$0xff] }
 0x239   : > { %2109 = vrot.lane.b32.xlu0 %v2075_v60, %s5782_s29  ;;  %v2238_v60 = vmul.f32 %v6072_v36, %v6611_v35  ;;  %v2081_v14 = vmul.f32 %v6412_v49, %v6635_v16  ;;  %v6653_v45 = vcombine.high %v6635_v16, %v7565_v28  ;;  %v1583_v36 = vcombine.high %v6404_v42, %v7565_v28 }
 0x23a   : > { %v2241_v51 = vmul.f32 %v6107_v50, %v6635_v16  ;;  %v2244_v22 = vmul.f32 %v6123_v58, %v6666_v47 }
 0x23b   : > { %2111 = vrot.lane.b32.xlu1 %v2076_v5, %s5782_s29  ;;  %v2082_v49 = vmul.f32 %v6378_v13, %v6653_v45  ;;  %v1597_v5 = vrot.slane %v1583_v36, %v6477_v38 }
 0x23d   : > { %2265 = vrot.lane.b32.xlu0 %v2233_v59, %s5776_s28  ;;  %v2083_v59 = vmul.f32 %v6416_v34, %v6645_v21  ;;  %v1629_v42 = vcombine.low %v1597_v5, %v1612_v9  ;;  %v2084_v34 = vmul.f32 %v6386_v24, %v6666_v47  ;;  %v1630_v13 = vcombine.high %v1597_v5, %v1612_v9  ;;  %v7601_v5 = vld [vmem:[#allocation39_spill] sm:$0xff] }
 0x23f   : > { %2267 = vrot.lane.b32.xlu1 %v2234_v44, %s5776_s28  ;;  %v2243_v44 = vmul.f32 %v6117_v56, %v6645_v21  ;;  %v6687_v50 = vrot.slane %v1630_v13, %v6480_v1 }
 0x241   : > { %2269 = vrot.lane.b32.xlu0 %v2235_v19, %s5776_s28  ;;  %v6678_v19 = vrot.slane %v1629_v42, %v6480_v1  ;;  %v1301_v42 = vmul.f32 %v7601_v5, %v6504_v62  ;;  %v7609_v5 = vld [vmem:[#allocation61_spill] sm:$0xff] }
 0x243   : > { %2271 = vrot.lane.b32.xlu1 %v2236_v18, %s5776_s28  ;;  %v2085_v24 = vmul.f32 %v6420_v0, %v6678_v19  ;;  %v6695_v18 = vcombine.high %v6678_v19, %v7565_v28  ;;  %v6705_v0 = vcombine.high %v6687_v50, %v7565_v28  ;;  %v2245_v58 = vmul.f32 %v6130_v61, %v6678_v19 }
 0x244   : > { %v1456_v61 = vmul.f32 %v7594_v41, %v6507_v6 }
 0x245   : > { %2113 = vrot.lane.b32.xlu0 %v2077_v53, %s5782_s29  ;;  %v2242_v53 = vmul.f32 %v6112_v52, %v6653_v45  ;;  %v2087_v52 = vmul.f32 %v6424_v17, %v6687_v50  ;;  %v2086_v56 = vmul.f32 %v6394_v55, %v6695_v18  ;;  %v2088_v33 = vmul.f32 %v6410_v7, %v6705_v0  ;;  %v7592_v17 = vld [vmem:[#allocation16_spill] sm:$0xff] }
 0x246   : > { %v2247_v55 = vmul.f32 %v7592_v17, %v6687_v50  ;;  %v2248_v7 = vmul.f32 %v7595_v25, %v6705_v0 }
 0x247   : > { %2115 = vrot.lane.b32.xlu1 %v2078_v4, %s5782_s29 }
 0x249   : > { %2117 = vrot.lane.b32.xlu0 %v2079_v11, %s5782_s29  ;;  %v7593_v11 = vld [vmem:[#allocation15_spill] sm:$0xff] }
 0x24a   : > { %v2246_v4 = vmul.f32 %v7593_v11, %v6695_v18 }
 0x24b   : > { %2119 = vrot.lane.b32.xlu1 %v2080_v2, %s5782_s29 }
 0x24d   : > { %2273 = vrot.lane.b32.xlu0 %v2237_v26, %s5776_s28  ;;  %v7596_v26 = vld [vmem:[#allocation20_spill] sm:$0xff] }
 0x24e   : > { %v1458_v2 = vmul.f32 %v7596_v26, %v6492_v8 }
 0x24f   : > { %2275 = vrot.lane.b32.xlu1 %v2238_v60, %s5776_s28  ;;  %v7598_v60 = vld [vmem:[#allocation21_spill] sm:$0xff] }
 0x250   : > { %v1459_v39 = vmul.f32 %v7598_v60, %v6534_v57 }
 0x251   : > { %2277 = vrot.lane.b32.xlu0 %v2239_v29, %s5776_s28  ;;  %v1457_v29 = vmul.f32 %v7597_v10, %v6523_v46 }
 0x253   : > { %2279 = vrot.lane.b32.xlu1 %v2240_v48, %s5776_s28 }
 0x255   : > { %2121 = vrot.lane.b32.xlu0 %v2081_v14, %s5782_s29  ;;  %v7599_v14 = vld [vmem:[#allocation38_spill] sm:$0xff] }
 0x256   : > { %v1300_v48 = vmul.f32 %v7599_v14, %v6489_v37 }
 0x257   : > { %2123 = vrot.lane.b32.xlu1 %v2082_v49, %s5782_s29 }
 0x259   : > { %2125 = vrot.lane.b32.xlu0 %v2083_v59, %s5782_s29  ;;  %v7600_v59 = vld [vmem:[#allocation43_spill] sm:$0xff] }
 0x25a   : > { %v1302_v49 = vmul.f32 %v7600_v59, %v6495_v31  ;;  %v7608_v59 = vld [vmem:[#allocation68_spill] sm:$0xff] }
 0x25b   : > { %2127 = vrot.lane.b32.xlu1 %v2084_v34, %s5782_s29 }
 0x25d   : > { %2281 = vrot.lane.b32.xlu0 %v2241_v51, %s5776_s28 }
 0x25f   : > { %2283 = vrot.lane.b32.xlu1 %v2242_v53, %s5776_s28  ;;  %v7602_v53 = vld [vmem:[#allocation44_spill] sm:$0xff] }
 0x261   : > { %2285 = vrot.lane.b32.xlu0 %v2243_v44, %s5776_s28 }
 0x263   : > { %2287 = vrot.lane.b32.xlu1 %v2244_v22, %s5776_s28  ;;  %v7603_v22 = vld [vmem:[#allocation40_spill] sm:$0xff] }
 0x265   : > { %2129 = vrot.lane.b32.xlu0 %v2085_v24, %s5782_s29  ;;  %v6744_v24 = vmul.f32 %v7602_v53, %v6507_v6 }
 0x267   : > { %2131 = vrot.lane.b32.xlu1 %v2086_v56, %s5782_s29 }
 0x269   : > { %2133 = vrot.lane.b32.xlu0 %v2087_v52, %s5782_s29  ;;  %v1303_v52 = vmul.f32 %v7603_v22, %v6514_v40 }
 0x26b   : > { %2135 = vrot.lane.b32.xlu1 %v2088_v33, %s5782_s29  ;;  %s7503_s29 = smov 16  }
 0x26d   : > { %2289 = vrot.lane.b32.xlu0 %v2245_v58, %s5776_s28 }
 0x26f   : > { %2291 = vrot.lane.b32.xlu1 %v2246_v4, %s5776_s28  ;;  %v7605_v4 = vld [vmem:[#allocation41_spill] sm:$0xff] }
 0x270   : > { %v6758_v41 = vmul.f32 %v7605_v4, %v6523_v46 }
 0x271   : > { %2293 = vrot.lane.b32.xlu0 %v2247_v55, %s5776_s28  ;;  %v7604_v55 = vld [vmem:[#allocation45_spill] sm:$0xff] }
 0x272   : > { %v6754_v11 = vmul.f32 %v7604_v55, %v6492_v8  ;;  %v7607_v8 = vld [vmem:[#allocation42_spill] sm:$0xff] }
 0x273   : > { %2295 = vrot.lane.b32.xlu1 %v2248_v7, %s5776_s28 }
 0x275   : > { %1476 = vrot.lane.b32.xlu0 %v1456_v61, %s5776_s28 }
 0x277   : > { %1478 = vrot.lane.b32.xlu1 %v1457_v29, %s5776_s28  ;;  %v6772_v29 = vmul.f32 %v7607_v8, %v6534_v57 }
 0x279   : > { %1480 = vrot.lane.b32.xlu0 %v1458_v2, %s5776_s28  ;;  %v7606_v2 = vld [vmem:[#allocation67_spill] sm:$0xff] }
 0x27a   : > { %v1444_v10 = vmul.f32 %v7606_v2, %v6489_v37  ;;  %v1445_v37 = vmul.f32 %v7609_v5, %v6504_v62 }
 0x27b   : > { %1482 = vrot.lane.b32.xlu1 %v1459_v39, %s5776_s28  ;;  %s5152_s28 = sshll.u32 %s5755_s25, 3 }
 0x28f   : > { %v1389_v36 = vpop.permute.xlu0 %1388 }
 0x290   : > { %v1412_v9 = vsub.f32 %v1300_v48, %v1389_v36 }
 0x291   : > { %v1391_v34 = vpop.permute.xlu1 %1390 }
 0x292   : > { %v1413_v44 = vsub.f32 %v1301_v42, %v1391_v34 }
 0x293   : > { %v1393_v51 = vpop.permute.xlu0 %1392 }
 0x294   : > { %v1414_v13 = vsub.f32 %v1302_v49, %v1393_v51  ;;  %v1446_v49 = vmul.f32 %v7608_v59, %v6495_v31  ;;  %v7611_v59 = vld [vmem:[#allocation52_spill] sm:$0xff] }
 0x295   : > { %v1395_v58 = vpop.permute.xlu1 %1394 }
 0x296   : > { %v1415_v17 = vsub.f32 %v1303_v52, %v1395_v58  ;;  %v7610_v58 = vld [vmem:[#allocation63_spill] sm:$0xff] }
 0x297   : > { %v6748_v56 = vpop.permute.xlu0 %1396  ;;  %v1447_v55 = vmul.f32 %v7610_v58, %v6514_v40 }
 0x298   : > { %v1416_v33 = vsub.f32 %v6744_v24, %v6748_v56 }
 0x299   : > { %v6762_v25 = vpop.permute.xlu1 %1398 }
 0x29a   : > { %v1417_v26 = vsub.f32 %v6758_v41, %v6762_v25 }
 0x29b   : > { %v6760_v61 = vpop.permute.xlu0 %1400 }
 0x29c   : > { %v1418_v7 = vsub.f32 %v6754_v11, %v6760_v61 }
 0x29d   : > { %v6774_v39 = vpop.permute.xlu1 %1402 }
 0x29e   : > { %v1419_v48 = vsub.f32 %v6772_v29, %v6774_v39 }
 0x29f   : > { %v1469_v60 = vpop.permute.xlu0 %1468 }
 0x2a0   : > { %v1492_v14 = vadd.f32 %v1469_v60, %v1444_v10 }
 0x2a1   : > { %v1471_v51 = vpop.permute.xlu1 %1470 }
 0x2a2   : > { %v1501_v36 = vsel %vm1500_vm2, %v1412_v9, %v1492_v14  ;;  %v1493_v34 = vadd.f32 %v1471_v51, %v1445_v37  ;;  %v7613_v37 = vld [vmem:[#allocation24_spill] sm:$0xff] }
 0x2a3   : > { %v1473_v42 = vpop.permute.xlu0 %1472 }
 0x2a4   : > { %v1494_v57 = vadd.f32 %v1473_v42, %v1446_v49  ;;  %v1502_v22 = vsel %vm1500_vm2, %v1413_v44, %v1493_v34  ;;  %v7612_v49 = vld [vmem:[#allocation22_spill] sm:$0xff]  ;;  %v1931_v42 = vmul.f32 %v7613_v37, %v6557_v3 }
 0x2a5   : > { %v1475_v9 = vpop.permute.xlu1 %1474  ;;  %v1929_v5 = vmul.f32 %v7612_v49, %v6547_v54 }
 0x2a6   : > { %v1503_v53 = vsel %vm1500_vm2, %v1414_v13, %v1494_v57  ;;  %v1495_v2 = vadd.f32 %v1475_v9, %v1447_v55  ;;  %v7614_v57 = vld [vmem:[#allocation54_spill] sm:$0xff]  ;;  %v7615_v9 = vld [vmem:[#allocation48_spill] sm:$0xff] }
 0x2a7   : > { %v2345_v52 = vcombine.low %v1501_v36, %v1503_v53  ;;  %v2106_v4 = vpop.permute.xlu0 %2105  ;;  %v2219_v34 = vmul.f32 %v7614_v57, %v6557_v3 }
 0x2a8   : > { %v1504_v31 = vsel %vm1500_vm2, %v1415_v17, %v1495_v2  ;;  %v2217_v17 = vmul.f32 %v7611_v59, %v6547_v54  ;;  %v2218_v2 = vmul.f32 %v7615_v9, %v6565_v20 }
 0x2a9   : > { %v2353_v8 = vcombine.low %v1502_v22, %v1504_v31  ;;  %v2108_v62 = vpop.permute.xlu1 %2107  ;;  %v6789_v60 = vrot.slane %v2345_v52, %v6477_v38  ;;  %v2153_v22 = vsub.f32 %v1929_v5, %v2106_v4  ;;  %v7616_v31 = vld [vmem:[#allocation23_spill] sm:$0xff]  ;;  %v7618_v4 = vld [vmem:[#allocation49_spill] sm:$0xff] }
 0x2ab   : > { %v2110_v10 = vpop.permute.xlu0 %2109  ;;  %v6792_v14 = vrot.slane %v2353_v8, %v6477_v38  ;;  %v1930_v8 = vmul.f32 %v7616_v31, %v6565_v20 }
 0x2ac   : > { %v2155_v52 = vsub.f32 %v1931_v42, %v2110_v10  ;;  %v2220_v10 = vmul.f32 %v7618_v4, %v6578_v23 }
 0x2ad   : > { %v2377_v44 = vcombine.low %v6789_v60, %v6792_v14  ;;  %v2378_v40 = vcombine.high %v6789_v60, %v6792_v14  ;;  %v2112_v36 = vpop.permute.xlu1 %2111  ;;  %v2154_v42 = vsub.f32 %v1930_v8, %v2108_v62  ;;  %v7620_v62 = vld [vmem:[#allocation26_spill] sm:$0xff]  ;;  %v7621_v8 = vld [vmem:[#allocation28_spill] sm:$0xff] }
 0x2af   : > { %v2266_v13 = vpop.permute.xlu0 %2265 }
 0x2b0   : > { %v2313_v51 = vadd.f32 %v2266_v13, %v2217_v17  ;;  %v7617_v13 = vld [vmem:[#allocation25_spill] sm:$0xff] }
 0x2b1   : > { %v2268_v58 = vpop.permute.xlu1 %2267  ;;  %v1932_v17 = vmul.f32 %v7617_v13, %v6578_v23  ;;  %v7619_v23 = vld [vmem:[#allocation56_spill] sm:$0xff] }
 0x2b2   : > { %v2329_v54 = vsel %vm1500_vm2, %v2153_v22, %v2313_v51  ;;  %v2314_v49 = vadd.f32 %v2268_v58, %v2218_v2 }
 0x2b3   : > { %v2270_v53 = vpop.permute.xlu0 %2269  ;;  %v2156_v57 = vsub.f32 %v1932_v17, %v2112_v36  ;;  %v1933_v36 = vmul.f32 %v7620_v62, %v6594_v27  ;;  %v7622_v17 = vld [vmem:[#allocation58_spill] sm:$0xff] }
 0x2b4   : > { %v2315_v55 = vadd.f32 %v2270_v53, %v2219_v34  ;;  %v2330_v53 = vsel %vm1500_vm2, %v2154_v42, %v2314_v49  ;;  %v2223_v49 = vmul.f32 %v7622_v17, %v6603_v30 }
 0x2b5   : > { %v2272_v37 = vpop.permute.xlu1 %2271 }
 0x2b6   : > { %v2331_v59 = vsel %vm1500_vm2, %v2155_v52, %v2315_v55  ;;  %v2316_v34 = vadd.f32 %v2272_v37, %v2220_v10 }
 0x2b7   : > { %v2413_v3 = vcombine.low %v2329_v54, %v2331_v59  ;;  %v2114_v5 = vpop.permute.xlu0 %2113  ;;  %v2221_v54 = vmul.f32 %v7619_v23, %v6594_v27  ;;  %v1935_v59 = vmul.f32 %v7621_v8, %v6603_v30 }
 0x2b8   : > { %v2332_v20 = vsel %vm1500_vm2, %v2156_v57, %v2316_v34  ;;  %v7623_v57 = vld [vmem:[#allocation50_spill] sm:$0xff] }
 0x2b9   : > { %v2421_v22 = vcombine.low %v2330_v53, %v2332_v20  ;;  %v2116_v52 = vpop.permute.xlu1 %2115  ;;  %v2420_v55 = vrot.slane %v2413_v3, %v6477_v38  ;;  %v2157_v3 = vsub.f32 %v1933_v36, %v2114_v5  ;;  %v2222_v34 = vmul.f32 %v7623_v57, %v6611_v35  ;;  %v7624_v53 = vld [vmem:[#allocation27_spill] sm:$0xff] }
 0x2ba   : > { %v1934_v20 = vmul.f32 %v7624_v53, %v6611_v35  ;;  %v7626_v5 = vld [vmem:[#allocation51_spill] sm:$0xff] }
 0x2bb   : > { %v2118_v51 = vpop.permute.xlu0 %2117  ;;  %v2428_v58 = vrot.slane %v2421_v22, %v6477_v38 }
 0x2bc   : > { %v2159_v10 = vsub.f32 %v1935_v59, %v2118_v51  ;;  %v2224_v51 = vmul.f32 %v7626_v5, %v6622_v12  ;;  %v2158_v62 = vsub.f32 %v1934_v20, %v2116_v52  ;;  %v7628_v52 = vld [vmem:[#allocation30_spill] sm:$0xff] }
 0x2bd   : > { %v2445_v2 = vcombine.low %v2420_v55, %v2428_v58  ;;  %v2120_v31 = vpop.permute.xlu1 %2119  ;;  %v7625_v55 = vld [vmem:[#allocation29_spill] sm:$0xff] }
 0x2be   : > { %v1936_v58 = vmul.f32 %v7625_v55, %v6622_v12  ;;  %v7627_v12 = vld [vmem:[#allocation60_spill] sm:$0xff] }
 0x2bf   : > { %v2274_v9 = vpop.permute.xlu0 %2273  ;;  %v2225_v57 = vmul.f32 %v7627_v12, %v6635_v16  ;;  %v6851_v55 = vrot.slane %v2445_v2, %v6480_v1  ;;  %v7632_v2 = vld [vmem:[#allocation31_spill] sm:$0xff] }
 0x2c0   : > { %v2317_v13 = vadd.f32 %v2274_v9, %v2221_v54  ;;  %v2160_v36 = vsub.f32 %v1936_v58, %v2120_v31  ;;  %v1937_v31 = vmul.f32 %v7628_v52, %v6635_v16 }
 0x2c1   : > { %v2276_v37 = vpop.permute.xlu1 %2275 }
 0x2c2   : > { %v2333_v27 = vsel %vm1500_vm2, %v2157_v3, %v2317_v13  ;;  %v2318_v9 = vadd.f32 %v2276_v37, %v2222_v34  ;;  %v7629_v34 = vld [vmem:[#allocation32_spill] sm:$0xff] }
 0x2c3   : > { %v2278_v4 = vpop.permute.xlu0 %2277  ;;  %v1939_v53 = vmul.f32 %v7629_v34, %v6645_v21 }
 0x2c4   : > { %v2319_v42 = vadd.f32 %v2278_v4, %v2223_v49  ;;  %v2334_v59 = vsel %vm1500_vm2, %v2158_v62, %v2318_v9 }
 0x2c5   : > { %v2280_v54 = vpop.permute.xlu1 %2279 }
 0x2c6   : > { %v2335_v22 = vsel %vm1500_vm2, %v2159_v10, %v2319_v42  ;;  %v2320_v8 = vadd.f32 %v2280_v54, %v2224_v51 }
 0x2c7   : > { %v2429_v30 = vcombine.low %v2333_v27, %v2335_v22  ;;  %v2122_v23 = vpop.permute.xlu0 %2121  ;;  %v7630_v27 = vld [vmem:[#allocation62_spill] sm:$0xff] }
 0x2c8   : > { %v2336_v35 = vsel %vm1500_vm2, %v2160_v36, %v2320_v8  ;;  %v2227_v22 = vmul.f32 %v7630_v27, %v6645_v21  ;;  %v2161_v9 = vsub.f32 %v1937_v31, %v2122_v23  ;;  %v7631_v36 = vld [vmem:[#allocation53_spill] sm:$0xff]  ;;  %v1938_v8 = vmul.f32 %v7632_v2, %v6653_v45 }
 0x2c9   : > { %v2437_v17 = vcombine.low %v2334_v59, %v2336_v35  ;;  %v2124_v49 = vpop.permute.xlu1 %2123  ;;  %v2436_v4 = vrot.slane %v2429_v30, %v6477_v38  ;;  %v2226_v21 = vmul.f32 %v7631_v36, %v6653_v45  ;;  %v7633_v35 = vld [vmem:[#allocation33_spill] sm:$0xff]  ;;  %v7637_v36 = vld [vmem:[#allocation36_spill] sm:$0xff] }
 0x2cb   : > { %v2126_v13 = vpop.permute.xlu0 %2125  ;;  %v2444_v3 = vrot.slane %v2437_v17, %v6477_v38 }
 0x2cc   : > { %v2163_v5 = vsub.f32 %v1939_v53, %v2126_v13  ;;  %v1940_v13 = vmul.f32 %v7633_v35, %v6666_v47 }
 0x2cd   : > { %v2453_v37 = vcombine.low %v2436_v4, %v2444_v3  ;;  %v2128_v42 = vpop.permute.xlu1 %2127  ;;  %v7634_v3 = vld [vmem:[#allocation55_spill] sm:$0xff] }
 0x2ce   : > { %v2164_v52 = vsub.f32 %v1940_v13, %v2128_v42 }
 0x2cf   : > { %v2282_v10 = vpop.permute.xlu0 %2281  ;;  %v6854_v58 = vrot.slane %v2453_v37, %v6480_v1 }
 0x2d0   : > { %v2321_v20 = vadd.f32 %v2282_v10, %v2225_v57  ;;  %v2228_v10 = vmul.f32 %v7634_v3, %v6666_v47  ;;  %v2162_v57 = vsub.f32 %v1938_v8, %v2124_v49  ;;  %v7635_v47 = vld [vmem:[#allocation64_spill] sm:$0xff]  ;;  %v7636_v49 = vld [vmem:[#allocation34_spill] sm:$0xff]  ;;  %v7639_v3 = vld [vmem:[#allocation57_spill] sm:$0xff] }
 0x2d1   : > { %v2284_v51 = vpop.permute.xlu1 %2283  ;;  %v2461_v16 = vcombine.low %v6851_v55, %v6854_v58  ;;  %v2462_v62 = vcombine.high %v6851_v55, %v6854_v58  ;;  %v1941_v42 = vmul.f32 %v7636_v49, %v6678_v19  ;;  %v7638_v8 = vld [vmem:[#allocation66_spill] sm:$0xff] }
 0x2d2   : > { %v2337_v59 = vsel %vm1500_vm2, %v2161_v9, %v2321_v20  ;;  %v2322_v17 = vadd.f32 %v2284_v51, %v2226_v21  ;;  %v1943_v21 = vmul.f32 %v7637_v36, %v6687_v50 }
 0x2d3   : > { %v2286_v30 = vpop.permute.xlu0 %2285 }
 0x2d4   : > { %v2323_v54 = vadd.f32 %v2286_v30, %v2227_v22  ;;  %v2338_v34 = vsel %vm1500_vm2, %v2162_v57, %v2322_v17 }
 0x2d5   : > { %v2288_v12 = vpop.permute.xlu1 %2287 }
 0x2d6   : > { %v2339_v23 = vsel %vm1500_vm2, %v2163_v5, %v2323_v54  ;;  %v2324_v31 = vadd.f32 %v2288_v12, %v2228_v10  ;;  %v2229_v54 = vmul.f32 %v7635_v47, %v6678_v19  ;;  %v2230_v10 = vmul.f32 %v7639_v3, %v6695_v18  ;;  %v7640_v12 = vld [vmem:[#allocation35_spill] sm:$0xff] }
 0x2d7   : > { %v2463_v4 = vcombine.low %v2337_v59, %v2339_v23  ;;  %v2130_v37 = vpop.permute.xlu0 %2129  ;;  %v2231_v59 = vmul.f32 %v7638_v8, %v6687_v50  ;;  %v1942_v57 = vmul.f32 %v7640_v12, %v6695_v18  ;;  %v7641_v50 = vld [vmem:[#allocation37_spill] sm:$0xff] }
 0x2d8   : > { %v2340_v45 = vsel %vm1500_vm2, %v2164_v52, %v2324_v31  ;;  %v2165_v35 = vsub.f32 %v1941_v42, %v2130_v37  ;;  %v1448_v31 = vmul.f32 %v6482_v32, %v6507_v6  ;;  %v7643_v42 = vld [vmem:[#allocation65_spill] sm:$0xff] }
 0x2d9   : > { %v2471_v20 = vcombine.low %v2338_v34, %v2340_v45  ;;  %v2132_v27 = vpop.permute.xlu1 %2131  ;;  %v2470_v22 = vrot.slane %v2463_v4, %v6477_v38  ;;  %v1944_v34 = vmul.f32 %v7641_v50, %v6705_v0  ;;  %v1449_v36 = vmul.f32 %v7643_v42, %v6523_v46 }
 0x2da   : > { %v2166_v47 = vsub.f32 %v1942_v57, %v2132_v27  ;;  %v2944_v57 = vstv %s5152_s28  ;;  %s7502_s28 = smov 8  }
 0x2db   : > { %v2134_v53 = vpop.permute.xlu0 %2133  ;;  %v2478_v9 = vrot.slane %v2471_v20, %v6477_v38 }
 0x2dc   : > { %v2167_v13 = vsub.f32 %v1943_v21, %v2134_v53  ;;  %v7642_v53 = vld [vmem:[#allocation59_spill] sm:$0xff] }
 0x2dd   : > { %v2495_v5 = vcombine.low %v2470_v22, %v2478_v9  ;;  %v2136_v51 = vpop.permute.xlu1 %2135  ;;  %v2232_v20 = vmul.f32 %v7642_v53, %v6705_v0 }
 0x2de   : > { %v2168_v18 = vsub.f32 %v1944_v34, %v2136_v51 }
 0x2df   : > { %v2290_v30 = vpop.permute.xlu0 %2289 }
 0x2e0   : > { %v2325_v2 = vadd.f32 %v2290_v30, %v2229_v54 }
 0x2e1   : > { %v2292_v17 = vpop.permute.xlu1 %2291 }
 0x2e2   : > { %v2341_v19 = vsel %vm1500_vm2, %v2165_v35, %v2325_v2  ;;  %v2326_v37 = vadd.f32 %v2292_v17, %v2230_v10  ;;  %v2502_v35 = vrot.slane %v2495_v5, %v6480_v1 }
 0x2e3   : > { %v2294_v23 = vpop.permute.xlu0 %2293 }
 0x2e4   : > { %v2327_v4 = vadd.f32 %v2294_v23, %v2231_v59  ;;  %v2342_v32 = vsel %vm1500_vm2, %v2166_v47, %v2326_v37 }
 0x2e5   : > { %v2296_v9 = vpop.permute.xlu1 %2295 }
 0x2e6   : > { %v2343_v52 = vsel %vm1500_vm2, %v2167_v13, %v2327_v4  ;;  %v2328_v54 = vadd.f32 %v2296_v9, %v2232_v20 }
 0x2e7   : > { %v2479_v45 = vcombine.low %v2341_v19, %v2343_v52  ;;  %v1477_v22 = vpop.permute.xlu0 %1476  ;;  %v2945_v19 = vadd.s32 %v2944_v57, %v6036_v15  ;;  %v7644_v52 = vlaneseq }
 0x2e8   : > { %v1496_v30 = vadd.f32 %v1477_v22, %v1448_v31  ;;  %v2344_v6 = vsel %vm1500_vm2, %v2168_v18, %v2328_v54 }
 0x2e9   : > { %v2487_v0 = vcombine.low %v2342_v32, %v2344_v6  ;;  %v1479_v2 = vpop.permute.xlu1 %1478  ;;  %v2486_v51 = vrot.slane %v2479_v45, %v6477_v38  ;;  %v2947_v31 = vand.u32 127, %v7644_v52 }
 0x2ea   : > { %v1505_v49 = vsel %vm1500_vm2, %v1416_v33, %v1496_v30  ;;  %v1497_v27 = vadd.f32 %v1479_v2, %v1449_v36 }
 0x2eb   : > { %v1481_v21 = vpop.permute.xlu0 %1480  ;;  %v2494_v59 = vrot.slane %v2487_v0, %v6477_v38  ;;  %vm2948_vm4 = vcmp.ge.s32.totalorder %v2945_v19, %v2947_v31 }
 0x2ec   : > { %v1498_v8 = vadd.f32 %v1481_v21, %v6498_v43  ;;  %v1506_v46 = vsel %vm1500_vm2, %v1417_v26, %v1497_v27 }
 0x2ed   : > { %v2503_v33 = vcombine.low %v2486_v51, %v2494_v59  ;;  %v1483_v23 = vpop.permute.xlu1 %1482 }
 0x2ee   : > { %v1507_v24 = vsel %vm1500_vm2, %v1418_v7, %v1498_v8  ;;  %v1499_v43 = vadd.f32 %v1483_v23, %v6584_v63 }
 0x2ef   : > { %v2361_v56 = vcombine.low %v1505_v49, %v1507_v24  ;;  %v2510_v13 = vrot.slane %v2503_v33, %v6480_v1 }
 0x2f0   : > { %v1508_v11 = vsel %vm1500_vm2, %v1419_v48, %v1499_v43  ;;  %v2385_v48 = vrot.slane %v2377_v44, %v6480_v1 }
 0x2f1   : > { %v2369_v61 = vcombine.low %v1506_v46, %v1508_v11  ;;  %v2511_v7 = vcombine.low %v2502_v35, %v2510_v13  ;;  %v2512_v17 = vcombine.high %v2502_v35, %v2510_v13  ;;  %v2368_v41 = vrot.slane %v2361_v56, %v6477_v38 }
 0x2f3   : > { %v2376_v25 = vrot.slane %v2369_v61, %v6477_v38  ;;  %v2757_v63 = vpack.c.bf16 %v2511_v7, %v2461_v16  ;;  %v2758_v26 = vpack.c.bf16 %v2512_v17, %v2462_v62  ;;  %v2392_v16 = vrot.slane %v2378_v40, %v6480_v1 }
 0x2f5   : > { %v2393_v5 = vcombine.low %v2368_v41, %v2376_v25  ;;  %v2394_v29 = vcombine.high %v2368_v41, %v2376_v25  ;;  %v2764_v39 = vsel %vm2759_vm3, %v2757_v63, 0  ;;  %v2853_v60 = vsel %vm2759_vm3, %v2758_v26, 0  ;;  %v7645_v25 = vld [vmem:[#allocation47_spill] sm:$0xff]  ;;  %v7646_v26 = vld [vmem:[#allocation46_spill] sm:$0xff] }
 0x2f6   : > { %5333 = vmatpush3.bf16.xpose.msra.mxu1 %v2764_v39  ;;  %5339 = vmatpush3.bf16.xpose.msra.mxu0 %v2764_v39 }
 0x2f7   : > { %v2401_v4 = vrot.slane %v2393_v5, %v6480_v1  ;;  %v2408_v55 = vrot.slane %v2394_v29, %v6480_v1  ;;  %5344 = vmatprep.subr.bf16.mxu1 %v7565_v28  ;;  %5350 = vmatprep.subr.bf16.mxu0 %v7565_v28 }
 0x2f9   : > { %v2409_v58 = vcombine.low %v2385_v48, %v2401_v4  ;;  %v2410_v62 = vcombine.high %v2385_v48, %v2401_v4  ;;  %v2411_v3 = vcombine.low %v2392_v16, %v2408_v55  ;;  %v2412_v10 = vcombine.high %v2392_v16, %v2408_v55 }
 0x2fb   : > { %v2753_v44 = vpack.c.bf16 %v2409_v58, %v2409_v58  ;;  %v2754_v12 = vpack.c.bf16 %v2410_v62, %v2410_v62  ;;  %v2755_v14 = vpack.c.bf16 %v2411_v3, %v2411_v3  ;;  %v2756_v40 = vpack.c.bf16 %v2412_v10, %v2412_v10 }
 0x2fd   : > { %5335 = vmatmul.mubr.msk.bf16.vlgmr.msra.gmra.mxu1 %vm2759_vm3, %v2753_v44  ;;  %5341 = vmatmul.mubr.msk.bf16.vlgmr.msra.gmra.mxu0 %vm2759_vm3, %v2754_v12  ;;  %v2587_v44 = vcombine.high %v7645_v25, %v7565_v28  ;;  %v2521_v12 = vcombine.high %v7646_v26, %v7565_v28 }
 0x2fe   : > { %5345 = vmatpush3.bf16.xpose.msra.mxu1 %v2853_v60  ;;  %5351 = vmatpush3.bf16.xpose.msra.mxu0 %v2853_v60 }
 0x2ff   : > { %5346 = vmatprep.mubr.msk.bf16.mxu1 %vm5774_vm1, %v7565_v28  ;;  %5352 = vmatprep.mubr.msk.bf16.mxu0 %vm5774_vm1, %v7565_v28  ;;  %v2601_v31 = vrot.slane %v2587_v44, %v6477_v38 }
 0x300   : > { %5356 = vmatprep.subr.bf16.mxu1 %v7565_v28  ;;  %5362 = vmatprep.subr.bf16.mxu0 %v7565_v28 }
 0x305   : > { %5347 = vmatmul.mubr.msk.bf16.vlgmr.msra.gmra.mxu1 %vm2759_vm3, %v2755_v14  ;;  %5353 = vmatmul.mubr.msk.bf16.vlgmr.msra.gmra.mxu0 %vm2759_vm3, %v2756_v40  ;;  %v2528_v14 = vrot.slane %v7646_v26, %v6477_v38  ;;  %v2594_v40 = vrot.slane %v7645_v25, %v6477_v38 }
 0x306   : > { %5358 = vmatprep.mubr.msk.bf16.mxu1 %vm5774_vm1, %v7565_v28  ;;  %5364 = vmatprep.mubr.msk.bf16.mxu0 %vm5774_vm1, %v7565_v28 }
 0x3bd   : > { %v2800_v50 = vpop.f32.mrf.mxu1  ;;  %v2843_v34 = vpop.f32.mrf.mxu0 }
 0x3be   : > { %v2938_v37 = vmul.f32 0.35355338, %v2800_v50  ;;  %v2939_v45 = vmul.f32 0.35355338, %v2843_v34 }
 0x3bf   : > { %v5336_v53 = vpop.f32.mrf.mxu1  ;;  %v5342_v20 = vpop.f32.mrf.mxu0 }
 0x3c0   : > { %v2951_v22 = vsel %vm2948_vm4, %v2938_v37, -1e+30  ;;  %v2952_v9 = vsel %vm2948_vm4, %v2939_v45, -1e+30  ;;  %v2535_v20 = vrot.slane %v2521_v12, %v6477_v38 }
 0x3c1   : > { %v2803_v30 = vpop.f32.mrf.mxu1  ;;  %v2846_v47 = vpop.f32.mrf.mxu0  ;;  %v2959_v18 = vsel %vm2955_vm5, %v2952_v9, -inf  ;;  %v2956_v15 = vsel %vm2955_vm5, %v2951_v22, -inf }
 0x3c2   : > { %2960 = vmax.xlane.f32.xlu1 %v2959_v18  ;;  %2957 = vmax.xlane.f32.xlu0 %v2956_v15 }
 0x3c3   : > { %v5337_v54 = vpop.f32.mrf.mxu1  ;;  %v5343_v49 = vpop.f32.mrf.mxu0 }
 0x3c5   : > { %v2889_v32 = vpop.f32.mrf.mxu1  ;;  %v2932_v6 = vpop.f32.mrf.mxu0 }
 0x3c6   : > { %v2940_v42 = vmul.f32 0.35355338, %v2889_v32  ;;  %v2941_v36 = vmul.f32 0.35355338, %v2932_v6 }
 0x3c7   : > { %v5348_v21 = vpop.f32.mrf.mxu1  ;;  %v5354_v0 = vpop.f32.mrf.mxu0 }
 0x3c8   : > { %v2953_v2 = vsel %vm2948_vm4, %v2940_v42, -1e+30  ;;  %v2954_v59 = vsel %vm2948_vm4, %v2941_v36, -1e+30 }
 0x3c9   : > { %v2892_v8 = vpop.f32.mrf.mxu1  ;;  %v2935_v27 = vpop.f32.mrf.mxu0  ;;  %v2962_v51 = vsel %vm2955_vm5, %v2953_v2, -inf  ;;  %v2965_v56 = vsel %vm2955_vm5, %v2954_v59, -inf }
 0x3ca   : > { %2963 = vmax.xlane.f32.xlu0 %v2962_v51 }
 0x3cb   : > { %v5349_v24 = vpop.f32.mrf.mxu1  ;;  %v5355_v46 = vpop.f32.mrf.mxu0 }
 0x3ce   : > { %2966 = vmax.xlane.f32.xlu0 %v2965_v56 }
 0x44b   : > { %v2961_v33 = vpop.xlane.xlu1 %2960  ;;  %v2958_v23 = vpop.xlane.xlu0 %2957 }
 0x44c   : > { %v2969_v43 = vsub.f32 %v2952_v9, %v2961_v33  ;;  %v2968_v35 = vsub.f32 %v2951_v22, %v2958_v23 }
 0x44e   : > { %v2974_v13 = vmul.f32 1.442695, %v2969_v43  ;;  %v2972_v11 = vmul.f32 1.442695, %v2968_v35 }
 0x450   : > { %5632 = vpow2.f32 %v2974_v13 }
 0x451   : > { %5634 = vpow2.f32 %v2972_v11 }
 0x453   : > { %v2964_v63 = vpop.xlane.xlu0 %2963 }
 0x454   : > { %v2970_v29 = vsub.f32 %v2953_v2, %v2964_v63 }
 0x456   : > { %v2976_v48 = vmul.f32 1.442695, %v2970_v29 }
 0x457   : > { %v2967_v5 = vpop.xlane.xlu0 %2966 }
 0x458   : > { %v2971_v39 = vsub.f32 %v2954_v59, %v2967_v5  ;;  %5636 = vpow2.f32 %v2976_v48 }
 0x45a   : > { %v2978_v16 = vmul.f32 1.442695, %v2971_v39 }
 0x45c   : > { %5638 = vpow2.f32 %v2978_v16 }
 0x45d   : > { %v6967_v61 = vpop.eup %5632 }
 0x45e   : > { %v6969_v7 = vpop.eup %5634  ;;  %v2983_v17 = vsel %vm2955_vm5, %v6967_v61, 0.0 }
 0x45f   : > { %2984 = vadd.xlane.f32.xlu1 %v2983_v17  ;;  %v2980_v41 = vsel %vm2955_vm5, %v6969_v7, 0.0 }
 0x460   : > { %2981 = vadd.xlane.f32.xlu0 %v2980_v41 }
 0x465   : > { %v6979_v4 = vpop.eup %5636 }
 0x466   : > { %v2986_v58 = vsel %vm2955_vm5, %v6979_v4, 0.0 }
 0x469   : > { %v6981_v55 = vpop.eup %5638 }
 0x46a   : > { %v2989_v62 = vsel %vm2955_vm5, %v6981_v55, 0.0 }
 0x470   : > { %2517 = vrot.lane.b32.xlu1 %v7645_v25, %s5777_s2 }
 0x476   : > { %2515 = vrot.lane.b32.xlu0 %v7646_v26, %s5777_s2 }
 0x494   : > { %2987 = vadd.xlane.f32.xlu1 %v2986_v58 }
 0x495   : > { %2990 = vadd.xlane.f32.xlu0 %v2989_v62 }
 0x4e8   : > { %v2985_v3 = vpop.xlane.xlu1 %2984 }
 0x4e9   : > { %v2982_v10 = vpop.xlane.xlu0 %2981  ;;  %5640 = vrcp.f32 %v2985_v3 }
 0x4ea   : > { %5642 = vrcp.f32 %v2982_v10 }
 0x4ec   : > { %v2518_v60 = vpop.permute.xlu1 %2517 }
 0x4ed   : > { %v2602_v57 = vcombine.high %v2518_v60, %v7565_v28  ;;  %v2609_v19 = vrot.slane %v2518_v60, %v6477_v38  ;;  %v2516_v52 = vpop.permute.xlu0 %2515 }
 0x4ee   : > { %v2536_v50 = vcombine.high %v2516_v52, %v7565_v28  ;;  %v2543_v34 = vrot.slane %v2516_v52, %v6477_v38 }
 0x4ef   : > { %v2616_v37 = vrot.slane %v2602_v57, %v6477_v38  ;;  %v2617_v45 = vcombine.low %v2594_v40, %v2609_v19  ;;  %v2618_v53 = vcombine.high %v2594_v40, %v2609_v19 }
 0x4f0   : > { %v2550_v22 = vrot.slane %v2536_v50, %v6477_v38  ;;  %v2551_v9 = vcombine.low %v2528_v14, %v2543_v34  ;;  %v2552_v30 = vcombine.high %v2528_v14, %v2543_v34 }
 0x4f1   : > { %v2625_v47 = vrot.slane %v2617_v45, %v6480_v1  ;;  %v2632_v18 = vrot.slane %v2618_v53, %v6480_v1  ;;  %v2633_v15 = vcombine.low %v2601_v31, %v2616_v37  ;;  %v2634_v54 = vcombine.high %v2601_v31, %v2616_v37 }
 0x4f2   : > { %v2559_v49 = vrot.slane %v2551_v9, %v6480_v1  ;;  %v2566_v32 = vrot.slane %v2552_v30, %v6480_v1  ;;  %v2567_v6 = vcombine.low %v2535_v20, %v2550_v22  ;;  %v2568_v42 = vcombine.high %v2535_v20, %v2550_v22 }
 0x4f3   : > { %v2641_v36 = vrot.slane %v2633_v15, %v6480_v1  ;;  %v2648_v21 = vrot.slane %v2634_v54, %v6480_v1  ;;  %v2703_v0 = vcombine.low %v2625_v47, %v2632_v18  ;;  %v5165_v2 = vcombine.high %v2625_v47, %v2632_v18 }
 0x4f4   : > { %v2575_v8 = vrot.slane %v2567_v6, %v6480_v1  ;;  %v2582_v27 = vrot.slane %v2568_v42, %v6480_v1  ;;  %v2653_v51 = vcombine.low %v2559_v49, %v2566_v32  ;;  %v5163_v59 = vcombine.high %v2559_v49, %v2566_v32 }
 0x4f5   : > { %v2710_v24 = vrot.slane %v2703_v0, %v6477_v38  ;;  %v2718_v46 = vrot.slane %v5165_v2, %v6477_v38  ;;  %v2719_v56 = vcombine.low %v2641_v36, %v2648_v21  ;;  %v5166_v33 = vcombine.high %v2641_v36, %v2648_v21 }
 0x4f6   : > { %v2660_v23 = vrot.slane %v2653_v51, %v6477_v38  ;;  %v2668_v43 = vrot.slane %v5163_v59, %v6477_v38  ;;  %v2669_v35 = vcombine.low %v2575_v8, %v2582_v27  ;;  %v5164_v13 = vcombine.high %v2575_v8, %v2582_v27  ;;  %v5641_v39 = vpop.eup %5640 }
 0x4f7   : > { %v2726_v11 = vrot.slane %v2719_v56, %v6477_v38  ;;  %v2734_v17 = vrot.slane %v5166_v33, %v6477_v38  ;;  %v2735_v41 = vcombine.low %v2710_v24, %v2718_v46  ;;  %v5643_v58 = vpop.eup %5642  ;;  %v2997_v60 = vmul.f32 %v5641_v39, %v6967_v61 }
 0x4f8   : > { %v2676_v25 = vrot.slane %v2669_v35, %v6477_v38  ;;  %v2684_v63 = vrot.slane %v5164_v13, %v6477_v38  ;;  %v2685_v26 = vcombine.low %v2660_v23, %v2668_v43  ;;  %v2996_v12 = vmul.f32 %v5643_v58, %v6969_v7  ;;  %v5604_v13 = vld [vmem:[%s7437_s11 + $0x8] sm:$0xff]  }
 0x4f9   : > { %v2743_v5 = vcombine.low %v2726_v11, %v2734_v17  ;;  %v2742_v48 = vrot.slane %v2735_v41, %v6480_v1  ;;  %v3001_v52 = vpack.c.bf16 %v2997_v60, %v2997_v60 }
 0x4fa   : > { %v2693_v29 = vcombine.low %v2676_v25, %v2684_v63  ;;  %v2692_v62 = vrot.slane %v2685_v26, %v6480_v1  ;;  %v3000_v19 = vpack.c.bf16 %v2996_v12, %v2996_v12 }
 0x4fb   : > { %v2750_v16 = vrot.slane %v2743_v5, %v6480_v1 }
 0x4fc   : > { %v2700_v3 = vrot.slane %v2693_v29, %v6480_v1 }
 0x4fd   : > { %v2751_v10 = vcombine.low %v2742_v48, %v2750_v16  ;;  %v2752_v57 = vcombine.high %v2742_v48, %v2750_v16 }
 0x4fe   : > { %v2701_v44 = vcombine.low %v2692_v62, %v2700_v3  ;;  %v2702_v40 = vcombine.high %v2692_v62, %v2700_v3  ;;  %v5605_v62 = vld [vmem:[%s7437_s11] sm:$0xff]  }
 0x500   : > { %v3004_v14 = vpack.c.bf16 %v2751_v10, %v2701_v44  ;;  %v3005_v31 = vpack.c.bf16 %v2752_v57, %v2702_v40 }
 0x502   : > { %5357 = vmatpush3.bf16.msra.mxu1 %v3004_v14  ;;  %5363 = vmatpush3.bf16.msra.mxu0 %v3004_v14 }
 0x503   : > { %5368 = vmatprep.subr.bf16.mxu1 %v7565_v28  ;;  %5374 = vmatprep.subr.bf16.mxu0 %v7565_v28 }
 0x505   : > { %5359 = vmatmul.mubr.msk.bf16.vlgmr.msra.gmra.mxu1 %vm2955_vm5, %v3000_v19  ;;  %5365 = vmatmul.mubr.msk.bf16.vlgmr.msra.gmra.mxu0 %vm2955_vm5, %v3001_v52 }
 0x506   : > { %5369 = vmatpush3.bf16.msra.mxu1 %v3005_v31  ;;  %5375 = vmatpush3.bf16.msra.mxu0 %v3005_v31 }
 0x507   : > { %5370 = vmatprep.mubr.msk.bf16.mxu1 %vm5774_vm1, %v7565_v28  ;;  %5376 = vmatprep.mubr.msk.bf16.mxu0 %vm5774_vm1, %v7565_v28 }
 0x508   : > { %5380 = vmatprep.subr.bf16.mxu1 %v7565_v28  ;;  %5388 = vmatprep.subr.bf16.mxu0 %v7565_v28 }
 0x51d   : > { %v2988_v61 = vpop.xlane.xlu1 %2987 }
 0x51e   : > { %5644 = vrcp.f32 %v2988_v61  ;;  %v2991_v7 = vpop.xlane.xlu0 %2990 }
 0x51f   : > { %5646 = vrcp.f32 %v2991_v7 }
 0x52b   : > { %v5645_v50 = vpop.eup %5644 }
 0x52c   : > { %v5647_v34 = vpop.eup %5646  ;;  %v2998_v37 = vmul.f32 %v5645_v50, %v6979_v4 }
 0x52d   : > { %v2999_v45 = vmul.f32 %v5647_v34, %v6981_v55 }
 0x52e   : > { %v3002_v53 = vpack.c.bf16 %v2998_v37, %v2998_v37 }
 0x52f   : > { %v3003_v20 = vpack.c.bf16 %v2999_v45, %v2999_v45 }
 0x530   : > { %5371 = vmatmul.mubr.msk.bf16.vlgmr.msra.gmra.mxu1 %vm2955_vm5, %v3002_v53 }
 0x531   : > { %5377 = vmatmul.mubr.msk.bf16.vlgmr.msra.gmra.mxu0 %vm2955_vm5, %v3003_v20  ;;  %5384 = vmatprep.mubr.msk.bf16.mxu1 %vm5774_vm1, %v7565_v28 }
 0x532   : > { %5392 = vmatprep.mubr.msk.bf16.mxu0 %vm5774_vm1, %v7565_v28  ;;  %5381 = vmatpush3.bf16.msra.mxu1 %v5604_v13 }
 0x533   : > { %5382 = vmatprep.subr.bf16.mxu1 %v7565_v28 }
 0x536   : > { %5383 = vmatpush3.bf16.msra.mxu1 %v5605_v62  ;;  %v5613_v62 = vld [vmem:[%s7442_s16] sm:$0xff]  }
 0x537   : > { %5396 = vmatprep.subr.bf16.mxu1 %v7565_v28 }
 0x5c5   : > { %v3043_v22 = vpop.f32.mrf.mxu1  ;;  %v3086_v9 = vpop.f32.mrf.mxu0 }
 0x5c7   : > { %v5360_v30 = vpop.f32.mrf.mxu1  ;;  %v5366_v47 = vpop.f32.mrf.mxu0 }
 0x5c9   : > { %v3046_v18 = vpop.f32.mrf.mxu1  ;;  %v3089_v4 = vpop.f32.mrf.mxu0 }
 0x5cb   : > { %v5361_v15 = vpop.f32.mrf.mxu1  ;;  %v5367_v55 = vpop.f32.mrf.mxu0 }
 0x5f0   : > { %v3129_v54 = vpop.f32.mrf.mxu1 }
 0x5f1   : > { %v3178_v49 = vcombine.low %v3043_v22, %v3129_v54  ;;  %v3179_v32 = vcombine.high %v3043_v22, %v3129_v54  ;;  %v3172_v6 = vpop.f32.mrf.mxu0  ;;  %v5606_v54 = vld [vmem:[%s7439_s13 + $0x8] sm:$0xff]  }
 0x5f2   : > { %v3194_v42 = vcombine.low %v3086_v9, %v3172_v6  ;;  %v3195_v36 = vcombine.high %v3086_v9, %v3172_v6  ;;  %v5372_v21 = vpop.f32.mrf.mxu1  ;;  %v5678_v9 = vld [vmem:[%s5992_s24] sm:$0xff]  ;;  %5389 = vmatpush3.bf16.msra.mxu0 %v5606_v54  ;;  %s779_s24 = sand.u32 1, %s5747_s30  }
 0x5f3   : > { %v3186_v0 = vrot.slane %v3178_v49, %v6477_v38  ;;  %v3193_v2 = vrot.slane %v3179_v32, %v6477_v38  ;;  %v5378_v8 = vpop.f32.mrf.mxu0  ;;  %v5607_v49 = vld [vmem:[%s7439_s13] sm:$0xff]   ;;  %5390 = vmatprep.subr.bf16.mxu0 %v7565_v28  ;;  %s5143_s3 = sshll.u32 %s779_s24, 3 }
 0x5f4   : > { %v3202_v27 = vrot.slane %v3194_v42, %v6477_v38  ;;  %v3209_v51 = vrot.slane %v3195_v36, %v6477_v38  ;;  %v3132_v59 = vpop.f32.mrf.mxu1  ;;  %v5180_v21 = vld [vmem:[%s7438_s12] ss:$0 sm:$0xff] }
 0x5f5   : > { %v3175_v24 = vpop.f32.mrf.mxu0  ;;  %v5610_v59 = vld [vmem:[%s7440_s14 + $0x8] sm:$0xff]  }
 0x5f6   : > { %v3210_v46 = vcombine.low %v3186_v0, %v3202_v27  ;;  %v3211_v56 = vcombine.high %v3186_v0, %v3202_v27  ;;  %v3226_v33 = vcombine.low %v3193_v2, %v3209_v51  ;;  %v3227_v23 = vcombine.high %v3193_v2, %v3209_v51  ;;  %v5373_v43 = vpop.f32.mrf.mxu1  ;;  %5391 = vmatpush3.bf16.msra.mxu0 %v5607_v49  ;;  %v5608_v27 = vld [vmem:[%s7440_s14 + $0x18] sm:$0xff]   ;;  %v5609_v51 = vld [vmem:[%s7440_s14 + $0x10] sm:$0xff]   ;;  %v5611_v24 = vld [vmem:[%s7440_s14] sm:$0xff]  }
 0x5f7   : > { %v5379_v35 = vpop.f32.mrf.mxu0  ;;  %5408 = vmatprep.subr.bf16.mxu0 %v7565_v28 }
 0x5f8   : > { %v3218_v11 = vrot.slane %v3210_v46, %v6480_v1  ;;  %v3225_v17 = vrot.slane %v3211_v56, %v6480_v1  ;;  %v3234_v41 = vrot.slane %v3226_v33, %v6480_v1  ;;  %v3241_v25 = vrot.slane %v3227_v23, %v6480_v1 }
 0x5fa   : > { %v3246_v63 = vcombine.low %v3218_v11, %v3225_v17  ;;  %v5175_v26 = vcombine.high %v3218_v11, %v3225_v17  ;;  %v3262_v5 = vcombine.low %v3234_v41, %v3241_v25  ;;  %v5176_v29 = vcombine.high %v3234_v41, %v3241_v25 }
 0x5fc   : > { %v3253_v39 = vrot.slane %v3246_v63, %v6477_v38  ;;  %v3261_v48 = vrot.slane %v5175_v26, %v6477_v38  ;;  %v3269_v16 = vrot.slane %v3262_v5, %v6477_v38  ;;  %v3277_v58 = vrot.slane %v5176_v29, %v6477_v38 }
 0x5fe   : > { %v3279_v3 = vcombine.high %v3253_v39, %v3261_v48  ;;  %v3295_v10 = vcombine.high %v3269_v16, %v3277_v58  ;;  %v3278_v44 = vcombine.low %v3253_v39, %v3261_v48  ;;  %v3294_v12 = vcombine.low %v3269_v16, %v3277_v58  ;;  %v5612_v58 = vld [vmem:[%s7442_s16 + $0x8] sm:$0xff]  }
 0x600   : > { %v3293_v60 = vrot.slane %v3279_v3, %v6480_v1  ;;  %v3309_v14 = vrot.slane %v3295_v10, %v6480_v1  ;;  %v3286_v40 = vrot.slane %v3278_v44, %v6480_v1  ;;  %v3302_v57 = vrot.slane %v3294_v12, %v6480_v1 }
 0x602   : > { %v3312_v19 = vcombine.low %v3293_v60, %v3309_v14  ;;  %v3311_v52 = vcombine.high %v3286_v40, %v3302_v57  ;;  %v3310_v31 = vcombine.low %v3286_v40, %v3302_v57  ;;  %v3313_v61 = vcombine.high %v3293_v60, %v3309_v14  ;;  %v5189_v60 = vld [vmem:[%s7441_s15] ss:$0 sm:$0xff]  ;;  %v5614_v57 = vld [vmem:[%s7443_s17 + $0x8] sm:$0xff]  }
 0x604   : > { %3319 = vrot.lane.b32.xlu1 %v3312_v19, %s7503_s29  ;;  %3315 = vrot.lane.b32.xlu0 %v3311_v52, %s7502_s28  ;;  %s7654_s28 = sld [smem:[#allocation78_spill]] }
 0x608   : > { %3323 = vrot.lane.b32.xlu1 %v3313_v61, %s7501_s6  ;;  %s7647_s6 = sld [smem:[#allocation71_spill]]  ;;  %v5615_v61 = vld [vmem:[%s7443_s17] sm:$0xff]  }
 0x60e   : > { %s799_s23 = scalar_lea.vmem %s7647_s6, %s5234_s22  ;;  %s7652_s6 = sld [smem:[#allocation77_spill]] }
 0x60f   : > { %v873_v52 = vld [vmem:[%s799_s23] sm:$0xff] }
 0x676   : > { %v3320_v7 = vpop.permute.xlu1 %3319  ;;  %v3316_v50 = vpop.permute.xlu0 %3315 }
 0x677   : > { %v3326_v34 = vsel %vm2759_vm3, %v3310_v31, %v3316_v50  ;;  %v874_v31 = vld [vmem:[%s799_s23 + $0x8] sm:$0xf]  ;;  %s7649_s23 = smov 16  }
 0x678   : > { %v3327_v45 = vsel %vm2955_vm5, %v3326_v34, %v3320_v7  ;;  %v3605_v7 = vpack.c.bf16 %v874_v31, %v873_v52 }
 0x67a   : > { %v3324_v37 = vpop.permute.xlu1 %3323 }
 0x67b   : > { %v3329_v53 = vsel %vm3328_vm6, %v3327_v45, %v3324_v37 }
 0x67c   : > { %v3330_v20 = vpack.c.bf16 %v3329_v53, %v3329_v53 }
 0x67e   : > { %5385 = vmatmul.mubr.msk.bf16.vlgmr.msra.gmra.mxu1 %vm882_vm0, %v3330_v20 }
 0x67f   : > { %5404 = vmatprep.mubr.msk.bf16.mxu1 %vm5774_vm1, %v7565_v28  ;;  %5397 = vmatpush3.bf16.msra.mxu1 %v5608_v27 }
 0x680   : > { %5398 = vmatprep.subr.bf16.mxu1 %v7565_v28 }
 0x683   : > { %5399 = vmatpush3.bf16.msra.mxu1 %v5609_v51 }
 0x684   : > { %5400 = vmatprep.subr.bf16.mxu1 %v7565_v28 }
 0x687   : > { %5401 = vmatpush3.bf16.msra.mxu1 %v5610_v59 }
 0x688   : > { %5402 = vmatprep.subr.bf16.mxu1 %v7565_v28 }
 0x68b   : > { %5403 = vmatpush3.bf16.msra.mxu1 %v5611_v24 }
 0x68c   : > { %5424 = vmatprep.subr.bf16.mxu1 %v7565_v28 }
 0x73e   : > { %v3380_v22 = vpop.f32.mrf.mxu1 }
 0x73f   : > { %v3386_v30 = vadd.f32 %v5678_v9, %v3380_v22 }
 0x740   : > { %v5386_v47 = vpop.f32.mrf.mxu1 }
 0x741   : > { %v3387_v18 = vmul.f32 %v3386_v30, %v3386_v30  ;;  %v5617_v47 = vld [vmem:[%s7444_s18] sm:$0xff]  }
 0x742   : > { %v3383_v4 = vpop.f32.mrf.mxu1 }
 0x743   : > { %v3388_v15 = vsel %vm882_vm0, %v3387_v18, 0.0 }
 0x744   : > { %3389 = vadd.xlane.f32.xlu1 %v3388_v15  ;;  %v5387_v55 = vpop.f32.mrf.mxu1 }
 0x7cd   : > { %v3390_v32 = vpop.xlane.xlu1 %3389 }
 0x7ce   : > { %v3391_v6 = vmul.f32 0.03125, %v3390_v32 }
 0x7d0   : > { %v3392_v42 = vadd.f32 1e-06, %v3391_v6 }
 0x7d2   : > { %5648 = vrsqrt.f32 %v3392_v42 }
 0x7df   : > { %v5649_v36 = vpop.eup %5648 }
 0x7e0   : > { %v3394_v0 = vmul.f32 %v5649_v36, %v3386_v30 }
 0x7e2   : > { %v3401_v2 = vmul.f32 %v5180_v21, %v3394_v0 }
 0x7e4   : > { %v3402_v8 = vpack.c.bf16 %v3401_v2, %v3401_v2 }
 0x7e6   : > { %5393 = vmatmul.mubr.msk.bf16.vlgmr.msra.gmra.mxu0 %vm882_vm0, %v3402_v8 }
 0x7e7   : > { %5412 = vmatprep.mubr.msk.bf16.mxu0 %vm5774_vm1, %v7565_v28  ;;  %5409 = vmatpush3.bf16.msra.mxu0 %v5612_v58 }
 0x7e8   : > { %5410 = vmatprep.subr.bf16.mxu0 %v7565_v28 }
 0x7eb   : > { %5411 = vmatpush3.bf16.msra.mxu0 %v5613_v62 }
 0x7ec   : > { %5416 = vmatprep.subr.bf16.mxu0 %v7565_v28 }
 0x8a6   : > { %v3452_v46 = vpop.f32.mrf.mxu0 }
 0x8a7   : > { %v3458_v56 = vsub.f32 0.0, %v3452_v46 }
 0x8a8   : > { %v5394_v33 = vpop.f32.mrf.mxu0 }
 0x8a9   : > { %v3459_v23 = vmul.f32 1.442695, %v3458_v56 }
 0x8aa   : > { %v3455_v43 = vpop.f32.mrf.mxu0 }
 0x8ab   : > { %5650 = vpow2.f32 %v3459_v23 }
 0x8ac   : > { %v5395_v35 = vpop.f32.mrf.mxu0 }
 0x8b8   : > { %v5651_v13 = vpop.eup %5650 }
 0x8b9   : > { %v3461_v11 = vadd.f32 1.0, %v5651_v13 }
 0x8bb   : > { %5652 = vrcp.f32 %v3461_v11 }
 0x8c8   : > { %v5653_v17 = vpop.eup %5652 }
 0x8c9   : > { %v3463_v41 = vmul.f32 %v5653_v17, %v3452_v46 }
 0x8cb   : > { %v3464_v25 = vpack.c.bf16 %v3463_v41, %v3463_v41 }
 0x8cd   : > { %5405 = vmatmul.mubr.msk.bf16.vlgmr.msra.gmra.mxu1 %vm3489_vm7, %v3464_v25 }
 0x8ce   : > { %5428 = vmatprep.mubr.msk.bf16.mxu1 %vm5774_vm1, %v7565_v28 }
 0x98d   : > { %v3527_v63 = vpop.f32.mrf.mxu1 }
 0x98e   : > { %v7111_v26 = vadd.f32 %v3527_v63, %v3386_v30  ;;  %v5616_v30 = vld [vmem:[%s7444_s18 + $0x8] sm:$0xff]  }
 0x98f   : > { %v5406_v5 = vpop.f32.mrf.mxu1  ;;  %5425 = vmatpush3.bf16.msra.mxu1 %v5616_v30 }
 0x990   : > { %v3534_v29 = vmul.f32 %v7111_v26, %v7111_v26  ;;  %5426 = vmatprep.subr.bf16.mxu1 %v7565_v28 }
 0x991   : > { %v3530_v39 = vpop.f32.mrf.mxu1 }
 0x992   : > { %v3535_v48 = vsel %vm882_vm0, %v3534_v29, 0.0 }
 0x993   : > { %3536 = vadd.xlane.f32.xlu0 %v3535_v48  ;;  %v5407_v16 = vpop.f32.mrf.mxu1  ;;  %5427 = vmatpush3.bf16.msra.mxu1 %v5617_v47 }
 0x994   : > { %5438 = vmatprep.subr.bf16.mxu1 %v7565_v28 }
 0x996   : > { %5429 = vmatmul.mubr.msk.bf16.vlgmr.msra.gmra.mxu1 %vm882_vm0, %v3605_v7 }
 0x997   : > { %5440 = vmatprep.mubr.msk.bf16.mxu1 %vm5774_vm1, %v7565_v28 }
 0xa1c   : > { %v3537_v3 = vpop.xlane.xlu0 %3536 }
 0xa1d   : > { %v3538_v10 = vmul.f32 0.03125, %v3537_v3 }
 0xa1f   : > { %v3539_v44 = vadd.f32 1e-06, %v3538_v10 }
 0xa21   : > { %5654 = vrsqrt.f32 %v3539_v44 }
 0xa2e   : > { %v5655_v12 = vpop.eup %5654 }
 0xa2f   : > { %v3541_v14 = vmul.f32 %v5655_v12, %v7111_v26 }
 0xa31   : > { %v3548_v40 = vmul.f32 %v5189_v60, %v3541_v14 }
 0xa33   : > { %v3549_v19 = vpack.c.bf16 %v3548_v40, %v3548_v40 }
 0xa35   : > { %5413 = vmatmul.mubr.msk.bf16.vlgmr.msra.gmra.mxu0 %vm882_vm0, %v3549_v19 }
 0xa36   : > { %5417 = vmatpush3.bf16.msra.mxu0 %v5614_v57  ;;  %5420 = vmatprep.mubr.msk.bf16.mxu0 %vm5774_vm1, %v7565_v28 }
 0xa37   : > { %5418 = vmatprep.subr.bf16.mxu0 %v7565_v28 }
 0xa3a   : > { %5419 = vmatpush3.bf16.msra.mxu0 %v5615_v61 }
 0xa3b   : > { %5432 = vmatprep.subr.bf16.mxu0 %v7565_v28 }
 0xa3d   : > { %5421 = vmatmul.mubr.msk.bf16.vlgmr.msra.gmra.mxu0 %vm882_vm0, %v3605_v7 }
 0xa3e   : > { %5434 = vmatprep.mubr.msk.bf16.mxu0 %vm5774_vm1, %v7565_v28 }
 0xaf5   : > { %v7147_v50 = vpop.f32.mrf.mxu0 }
 0xaf6   : > { %3716 = vrot.lane.b32.xlu1 %v7147_v50, %s5777_s2 }
 0xaf7   : > { %v5414_v34 = vpop.f32.mrf.mxu0 }
 0xaf9   : > { %v3602_v37 = vpop.f32.mrf.mxu0 }
 0xafb   : > { %v5415_v45 = vpop.f32.mrf.mxu0 }
 0xafd   : > { %v3655_v53 = vpop.f32.mrf.mxu0 }
 0xafe   : > { %3863 = vrot.lane.b32.xlu0 %v3655_v53, %s5777_s2  ;;  %v3868_v18 = vcombine.high %v3655_v53, %v7565_v28  ;;  %v3875_v55 = vrot.slane %v3655_v53, %v6477_v38 }
 0xaff   : > { %v5422_v20 = vpop.f32.mrf.mxu0 }
 0xb00   : > { %v3882_v32 = vrot.slane %v3868_v18, %v6477_v38 }
 0xb01   : > { %v3658_v22 = vpop.f32.mrf.mxu0 }
 0xb02   : > { %3719 = vrot.lane.b32.xlu0 %v7147_v50, %s5778_s1  ;;  %3865 = vrot.lane.b32.xlu1 %v3658_v22, %s5777_s2  ;;  %v3940_v59 = vrot.slane %v3658_v22, %v6477_v38  ;;  %s5230_s1 = sshll.u32 %s5759_s5, 1 }
 0xb03   : > { %v5423_v9 = vpop.f32.mrf.mxu0  ;;  %s5008_s29 = sadd.s32 %s5755_s25, %s5230_s1  ;;  %s4997_s25 = scalar_lea.sflag [#allocation3], %s779_s24 }
 0xb06   : > { %3722 = vrot.lane.b32.xlu1 %v7147_v50, %s7648_s27 }
 0xb68   : > { %v3717_v4 = vpop.permute.xlu1 %3716 }
 0xb70   : > { %v3864_v15 = vpop.permute.xlu0 %3863 }
 0xb71   : > { %v3883_v54 = vcombine.high %v3864_v15, %v7565_v28  ;;  %v3890_v49 = vrot.slane %v3864_v15, %v6477_v38 }
 0xb73   : > { %v3897_v6 = vrot.slane %v3883_v54, %v6477_v38  ;;  %v3898_v42 = vcombine.low %v3875_v55, %v3890_v49  ;;  %v3899_v36 = vcombine.high %v3875_v55, %v3890_v49 }
 0xb74   : > { %v3720_v21 = vpop.permute.xlu0 %3719  ;;  %v3866_v0 = vpop.permute.xlu1 %3865 }
 0xb75   : > { %v3906_v2 = vrot.slane %v3898_v42, %v6480_v1  ;;  %v3913_v8 = vrot.slane %v3899_v36, %v6480_v1  ;;  %v3914_v27 = vcombine.low %v3882_v32, %v3897_v6  ;;  %v3915_v51 = vcombine.high %v3882_v32, %v3897_v6 }
 0xb76   : > { %v3725_v24 = vcombine.low %v7147_v50, %v3720_v21  ;;  %v3948_v46 = vrot.slane %v3866_v0, %v6477_v38  ;;  %v3726_v35 = vcombine.high %v7147_v50, %v3720_v21 }
 0xb77   : > { %v3922_v56 = vrot.slane %v3914_v27, %v6480_v1  ;;  %v3929_v33 = vrot.slane %v3915_v51, %v6480_v1  ;;  %v3967_v23 = vcombine.low %v3906_v2, %v3913_v8  ;;  %v5201_v43 = vcombine.high %v3906_v2, %v3913_v8 }
 0xb78   : > { %v3949_v13 = vcombine.low %v3940_v59, %v3948_v46  ;;  %v3950_v11 = vcombine.high %v3940_v59, %v3948_v46  ;;  %v3723_v17 = vpop.permute.xlu1 %3722  ;;  %v3733_v3 = vrot.slane %v3725_v24, %v6477_v38  ;;  %v3740_v40 = vrot.slane %v3726_v35, %v6477_v38 }
 0xb79   : > { %v3974_v41 = vrot.slane %v3967_v23, %v6477_v38  ;;  %v3982_v25 = vrot.slane %v5201_v43, %v6477_v38  ;;  %v3983_v63 = vcombine.low %v3922_v56, %v3929_v33  ;;  %v5202_v5 = vcombine.high %v3922_v56, %v3929_v33 }
 0xb7a   : > { %v3957_v29 = vrot.slane %v3949_v13, %v6480_v1  ;;  %v3964_v39 = vrot.slane %v3950_v11, %v6480_v1  ;;  %v3741_v48 = vcombine.low %v3717_v4, %v3723_v17  ;;  %v3742_v16 = vcombine.high %v3717_v4, %v3723_v17 }
 0xb7b   : > { %v3990_v58 = vrot.slane %v3983_v63, %v6477_v38  ;;  %v3998_v62 = vrot.slane %v5202_v5, %v6477_v38  ;;  %v3999_v10 = vcombine.low %v3974_v41, %v3982_v25  ;;  %v7228_v5 = vpop.f32.mrf.mxu1 }
 0xb7c   : > { %v4017_v44 = vcombine.low %v3957_v29, %v3964_v39  ;;  %v5203_v12 = vcombine.high %v3957_v29, %v3964_v39  ;;  %v3749_v60 = vrot.slane %v3741_v48, %v6477_v38  ;;  %v3756_v14 = vrot.slane %v3742_v16, %v6477_v38 }
 0xb7d   : > { %v4007_v57 = vcombine.low %v3990_v58, %v3998_v62  ;;  %v4006_v34 = vrot.slane %v3999_v10, %v6480_v1  ;;  %v5430_v29 = vpop.f32.mrf.mxu1 }
 0xb7e   : > { %v4024_v19 = vrot.slane %v4017_v44, %v6477_v38  ;;  %v4032_v52 = vrot.slane %v5203_v12, %v6477_v38  ;;  %v3757_v31 = vcombine.low %v3733_v3, %v3749_v60  ;;  %v3758_v61 = vcombine.high %v3733_v3, %v3749_v60 }
 0xb7f   : > { %v3773_v7 = vcombine.low %v3740_v40, %v3756_v14  ;;  %v3774_v50 = vcombine.high %v3740_v40, %v3756_v14  ;;  %v4014_v37 = vrot.slane %v4007_v57, %v6480_v1  ;;  %v7230_v39 = vpop.f32.mrf.mxu1 }
 0xb80   : > { %v3765_v45 = vrot.slane %v3757_v31, %v6480_v1  ;;  %v3772_v53 = vrot.slane %v3758_v61, %v6480_v1  ;;  %v4033_v20 = vcombine.low %v4024_v19, %v4032_v52 }
 0xb81   : > { %v3781_v22 = vrot.slane %v3773_v7, %v6480_v1  ;;  %v3788_v9 = vrot.slane %v3774_v50, %v6480_v1  ;;  %v4015_v30 = vcombine.low %v4006_v34, %v4014_v37  ;;  %v4016_v54 = vcombine.high %v4006_v34, %v4014_v37  ;;  %v5431_v48 = vpop.f32.mrf.mxu1 }
 0xb82   : > { %v3793_v47 = vcombine.low %v3765_v45, %v3772_v53  ;;  %v5199_v18 = vcombine.high %v3765_v45, %v3772_v53  ;;  %v4040_v4 = vrot.slane %v4033_v20, %v6480_v1 }
 0xb83   : > { %v3809_v15 = vcombine.low %v3781_v22, %v3788_v9  ;;  %v5200_v55 = vcombine.high %v3781_v22, %v3788_v9 }
 0xb84   : > { %v3800_v49 = vrot.slane %v3793_v47, %v6477_v38  ;;  %v3808_v32 = vrot.slane %v5199_v18, %v6477_v38  ;;  %v4227_v6 = vpack.c.bf16 %v4040_v4, %v4015_v30  ;;  %v4041_v42 = vcombine.high %v4040_v4, %v7565_v28 }
 0xb85   : > { %v3816_v36 = vrot.slane %v3809_v15, %v6477_v38  ;;  %v3824_v21 = vrot.slane %v5200_v55, %v6477_v38 }
 0xb86   : > { %v3825_v0 = vcombine.low %v3800_v49, %v3808_v32  ;;  %v4233_v2 = vsel %vm2759_vm3, %v4227_v6, 0  ;;  %v4228_v8 = vpack.c.bf16 %v4041_v42, %v4016_v54  ;;  %v3826_v59 = vcombine.high %v3800_v49, %v3808_v32 }
 0xb87   : > { %v3841_v27 = vcombine.low %v3816_v36, %v3824_v21  ;;  %5433 = vmatpush3.bf16.xpose.msra.mxu0 %v4233_v2  ;;  %5439 = vmatpush3.bf16.xpose.msra.mxu1 %v4233_v2  ;;  %v3842_v24 = vcombine.high %v3816_v36, %v3824_v21 }
 0xb88   : > { %v3833_v51 = vrot.slane %v3825_v0, %v6480_v1  ;;  %5444 = vmatprep.subr.bf16.mxu0 %v7565_v28  ;;  %5450 = vmatprep.subr.bf16.mxu1 %v7565_v28  ;;  %v3840_v35 = vrot.slane %v3826_v59, %v6480_v1  ;;  %v4322_v11 = vsel %vm2759_vm3, %v4228_v8, 0 }
 0xb89   : > { %v3849_v46 = vrot.slane %v3841_v27, %v6480_v1  ;;  %v3856_v13 = vrot.slane %v3842_v24, %v6480_v1 }
 0xb8b   : > { %v3857_v56 = vcombine.low %v3833_v51, %v3849_v46  ;;  %v3858_v33 = vcombine.high %v3833_v51, %v3849_v46  ;;  %v3859_v17 = vcombine.low %v3840_v35, %v3856_v13  ;;  %v3860_v41 = vcombine.high %v3840_v35, %v3856_v13 }
 0xb8d   : > { %v4223_v23 = vpack.c.bf16 %v3857_v56, %v3857_v56  ;;  %v4224_v43 = vpack.c.bf16 %v3858_v33, %v3858_v33  ;;  %v4225_v25 = vpack.c.bf16 %v3859_v17, %v3859_v17  ;;  %v4226_v63 = vpack.c.bf16 %v3860_v41, %v3860_v41 }
 0xb8e   : > { %v4049_v56 = vcombine.high %v7228_v5, %v7565_v28 }
 0xb8f   : > { %5435 = vmatmul.mubr.msk.bf16.vlgmr.msra.gmra.mxu0 %vm2759_vm3, %v4223_v23  ;;  %5441 = vmatmul.mubr.msk.bf16.vlgmr.msra.gmra.mxu1 %vm2759_vm3, %v4224_v43  ;;  %v4056_v43 = vrot.slane %v7228_v5, %v6477_v38 }
 0xb90   : > { %5445 = vmatpush3.bf16.xpose.msra.mxu0 %v4322_v11  ;;  %5451 = vmatpush3.bf16.xpose.msra.mxu1 %v4322_v11  ;;  %v4063_v11 = vrot.slane %v4049_v56, %v6477_v38 }
 0xb91   : > { %5446 = vmatprep.mubr.msk.bf16.mxu0 %vm5774_vm1, %v7565_v28  ;;  %5452 = vmatprep.mubr.msk.bf16.mxu1 %vm5774_vm1, %v7565_v28 }
 0xb92   : > { %5456 = vmatprep.subr.bf16.mxu0 %v7565_v28  ;;  %5462 = vmatprep.subr.bf16.mxu1 %v7565_v28 }
 0xb97   : > { %5447 = vmatmul.mubr.msk.bf16.vlgmr.msra.gmra.mxu0 %vm2759_vm3, %v4225_v25  ;;  %5453 = vmatmul.mubr.msk.bf16.vlgmr.msra.gmra.mxu1 %vm2759_vm3, %v4226_v63 }
 0xb98   : > { %5458 = vmatprep.mubr.msk.bf16.mxu0 %vm5774_vm1, %v7565_v28  ;;  %5464 = vmatprep.mubr.msk.bf16.mxu1 %vm5774_vm1, %v7565_v28 }
 0xc4f   : > { %v4269_v16 = vpop.f32.mrf.mxu0  ;;  %v4312_v58 = vpop.f32.mrf.mxu1 }
 0xc50   : > { %v4407_v62 = vmul.f32 0.35355338, %v4269_v16  ;;  %v4408_v3 = vmul.f32 0.35355338, %v4312_v58 }
 0xc51   : > { %v5436_v10 = vpop.f32.mrf.mxu0  ;;  %v5442_v44 = vpop.f32.mrf.mxu1 }
 0xc52   : > { %v4412_v12 = vsel %vm4411_vm8, %v4407_v62, -inf  ;;  %v4415_v60 = vsel %vm4411_vm8, %v4408_v3, -inf }
 0xc53   : > { %4413 = vmax.xlane.f32.xlu0 %v4412_v12  ;;  %v4272_v14 = vpop.f32.mrf.mxu0  ;;  %4416 = vmax.xlane.f32.xlu1 %v4415_v60  ;;  %v4315_v40 = vpop.f32.mrf.mxu1 }
 0xc54   : > { %v4121_v40 = vrot.slane %v7230_v39, %v6477_v38 }
 0xc55   : > { %v5437_v57 = vpop.f32.mrf.mxu0  ;;  %v5443_v19 = vpop.f32.mrf.mxu1 }
 0xc57   : > { %v4358_v52 = vpop.f32.mrf.mxu0  ;;  %v4401_v31 = vpop.f32.mrf.mxu1 }
 0xc58   : > { %v4409_v61 = vmul.f32 0.35355338, %v4358_v52  ;;  %v4410_v34 = vmul.f32 0.35355338, %v4401_v31 }
 0xc59   : > { %v5448_v7 = vpop.f32.mrf.mxu0  ;;  %v5454_v50 = vpop.f32.mrf.mxu1 }
 0xc5a   : > { %v4418_v37 = vsel %vm4411_vm8, %v4409_v61, -inf  ;;  %v4421_v9 = vsel %vm4411_vm8, %v4410_v34, -inf }
 0xc5b   : > { %4419 = vmax.xlane.f32.xlu0 %v4418_v37  ;;  %v4361_v45 = vpop.f32.mrf.mxu0  ;;  %v4404_v53 = vpop.f32.mrf.mxu1 }
 0xc5d   : > { %v5449_v20 = vpop.f32.mrf.mxu0  ;;  %v5455_v22 = vpop.f32.mrf.mxu1 }
 0xc5f   : > { %4422 = vmax.xlane.f32.xlu0 %v4421_v9 }
 0xcdc   : > { %v4414_v30 = vpop.xlane.xlu0 %4413  ;;  %v4417_v47 = vpop.xlane.xlu1 %4416 }
 0xcdd   : > { %v4424_v18 = vsub.f32 %v4407_v62, %v4414_v30  ;;  %v4425_v4 = vsub.f32 %v4408_v3, %v4417_v47 }
 0xcdf   : > { %v4428_v15 = vmul.f32 1.442695, %v4424_v18  ;;  %v4430_v55 = vmul.f32 1.442695, %v4425_v4 }
 0xce1   : > { %5656 = vpow2.f32 %v4428_v15 }
 0xce2   : > { %5658 = vpow2.f32 %v4430_v55 }
 0xce4   : > { %v4420_v54 = vpop.xlane.xlu0 %4419 }
 0xce5   : > { %v4426_v49 = vsub.f32 %v4409_v61, %v4420_v54 }
 0xce7   : > { %v4432_v32 = vmul.f32 1.442695, %v4426_v49 }
 0xce8   : > { %v4423_v6 = vpop.xlane.xlu0 %4422 }
 0xce9   : > { %5660 = vpow2.f32 %v4432_v32  ;;  %v4427_v42 = vsub.f32 %v4410_v34, %v4423_v6 }
 0xceb   : > { %v4434_v36 = vmul.f32 1.442695, %v4427_v42 }
 0xced   : > { %5662 = vpow2.f32 %v4434_v36 }
 0xcee   : > { %v7236_v21 = vpop.eup %5656 }
 0xcef   : > { %v7238_v0 = vpop.eup %5658  ;;  %v4436_v2 = vsel %vm4411_vm8, %v7236_v21, 0.0 }
 0xcf0   : > { %v4439_v8 = vsel %vm4411_vm8, %v7238_v0, 0.0  ;;  %4437 = vadd.xlane.f32.xlu0 %v4436_v2 }
 0xcf1   : > { %4440 = vadd.xlane.f32.xlu1 %v4439_v8 }
 0xcf6   : > { %v7244_v27 = vpop.eup %5660 }
 0xcf7   : > { %v4442_v51 = vsel %vm4411_vm8, %v7244_v27, 0.0 }
 0xcf8   : > { %4443 = vadd.xlane.f32.xlu1 %v4442_v51 }
 0xcfa   : > { %v7248_v59 = vpop.eup %5662 }
 0xcfb   : > { %v4445_v24 = vsel %vm4411_vm8, %v7248_v59, 0.0 }
 0xcfc   : > { %4446 = vadd.xlane.f32.xlu1 %v4445_v24 }
 0xd06   : > { %4044 = vrot.lane.b32.xlu0 %v7228_v5, %s5777_s2 }
 0xd0d   : > { %4046 = vrot.lane.b32.xlu1 %v7230_v39, %s5777_s2 }
 0xd79   : > { %v4438_v46 = vpop.xlane.xlu0 %4437 }
 0xd7a   : > { %v4441_v33 = vpop.xlane.xlu1 %4440  ;;  %5664 = vrcp.f32 %v4438_v46 }
 0xd7b   : > { %5666 = vrcp.f32 %v4441_v33 }
 0xd7d   : > { %v4045_v23 = vpop.permute.xlu0 %4044 }
 0xd7e   : > { %v4064_v35 = vcombine.high %v4045_v23, %v7565_v28  ;;  %v4071_v13 = vrot.slane %v4045_v23, %v6477_v38 }
 0xd80   : > { %v4078_v17 = vrot.slane %v4064_v35, %v6477_v38  ;;  %v4079_v41 = vcombine.low %v4056_v43, %v4071_v13  ;;  %v4080_v25 = vcombine.high %v4056_v43, %v4071_v13 }
 0xd81   : > { %v4444_v63 = vpop.xlane.xlu1 %4443 }
 0xd82   : > { %v4095_v29 = vcombine.low %v4063_v11, %v4078_v17  ;;  %v4096_v48 = vcombine.high %v4063_v11, %v4078_v17  ;;  %v4087_v16 = vrot.slane %v4079_v41, %v6480_v1  ;;  %v4094_v58 = vrot.slane %v4080_v25, %v6480_v1 }
 0xd83   : > { %5668 = vrcp.f32 %v4444_v63 }
 0xd84   : > { %v4103_v62 = vrot.slane %v4095_v29, %v6480_v1  ;;  %v4110_v5 = vrot.slane %v4096_v48, %v6480_v1  ;;  %v4148_v12 = vcombine.low %v4087_v16, %v4094_v58  ;;  %v5204_v60 = vcombine.high %v4087_v16, %v4094_v58 }
 0xd85   : > { %v4447_v3 = vpop.xlane.xlu1 %4446 }
 0xd86   : > { %v4164_v10 = vcombine.low %v4103_v62, %v4110_v5  ;;  %v5205_v44 = vcombine.high %v4103_v62, %v4110_v5  ;;  %v4155_v31 = vrot.slane %v4148_v12, %v6477_v38  ;;  %v4163_v61 = vrot.slane %v5204_v60, %v6477_v38 }
 0xd87   : > { %5670 = vrcp.f32 %v4447_v3  ;;  %v5665_v47 = vpop.eup %5664 }
 0xd88   : > { %v4171_v57 = vrot.slane %v4164_v10, %v6477_v38  ;;  %v4179_v19 = vrot.slane %v5205_v44, %v6477_v38  ;;  %v4180_v20 = vcombine.low %v4155_v31, %v4163_v61  ;;  %v5667_v15 = vpop.eup %5666  ;;  %v4452_v49 = vmul.f32 %v5665_v47, %v7236_v21 }
 0xd89   : > { %v4047_v14 = vpop.permute.xlu1 %4046  ;;  %v4453_v6 = vmul.f32 %v5667_v15, %v7238_v0  ;;  %v5619_v15 = vld [vmem:[%s7445_s19] sm:$0xff]  }
 0xd8a   : > { %v4129_v52 = vrot.slane %v4047_v14, %v6477_v38  ;;  %v4188_v45 = vcombine.low %v4171_v57, %v4179_v19  ;;  %v4187_v18 = vrot.slane %v4180_v20, %v6480_v1  ;;  %v4456_v24 = vpack.c.bf16 %v4452_v49, %v4452_v49 }
 0xd8b   : > { %v4457_v46 = vpack.c.bf16 %v4453_v6, %v4453_v6 }
 0xd8c   : > { %v4130_v7 = vcombine.low %v4121_v40, %v4129_v52  ;;  %v4131_v50 = vcombine.high %v4121_v40, %v4129_v52  ;;  %v4195_v30 = vrot.slane %v4188_v45, %v6480_v1 }
 0xd8e   : > { %v4138_v34 = vrot.slane %v4130_v7, %v6480_v1  ;;  %v4145_v37 = vrot.slane %v4131_v50, %v6480_v1  ;;  %v4196_v55 = vcombine.low %v4187_v18, %v4195_v30  ;;  %v4197_v42 = vcombine.high %v4187_v18, %v4195_v30  ;;  %v5618_v50 = vld [vmem:[%s7445_s19 + $0x8] sm:$0xff]  }
 0xd90   : > { %v4198_v39 = vcombine.low %v4138_v34, %v4145_v37  ;;  %v5206_v53 = vcombine.high %v4138_v34, %v4145_v37  ;;  %v5669_v51 = vpop.eup %5668 }
 0xd91   : > { %v4454_v0 = vmul.f32 %v5669_v51, %v7244_v27 }
 0xd92   : > { %v4205_v22 = vrot.slane %v4198_v39, %v6477_v38  ;;  %v4213_v9 = vrot.slane %v5206_v53, %v6477_v38 }
 0xd93   : > { %v4458_v23 = vpack.c.bf16 %v4454_v0, %v4454_v0 }
 0xd94   : > { %v4214_v4 = vcombine.low %v4205_v22, %v4213_v9  ;;  %v5671_v56 = vpop.eup %5670 }
 0xd95   : > { %v4455_v33 = vmul.f32 %v5671_v56, %v7248_v59 }
 0xd96   : > { %v4221_v54 = vrot.slane %v4214_v4, %v6480_v1 }
 0xd97   : > { %v4459_v43 = vpack.c.bf16 %v4455_v33, %v4455_v33 }
 0xd98   : > { %v4460_v32 = vpack.c.bf16 %v4221_v54, %v4196_v55  ;;  %v4222_v36 = vcombine.high %v4221_v54, %v7565_v28 }
 0xd9a   : > { %v4467_v2 = vsel %vm4465_vm9, %v4460_v32, 0  ;;  %v4461_v8 = vpack.c.bf16 %v4222_v36, %v4197_v42 }
 0xd9b   : > { %5457 = vmatpush3.bf16.msra.mxu0 %v4467_v2  ;;  %5463 = vmatpush3.bf16.msra.mxu1 %v4467_v2 }
 0xd9c   : > { %5468 = vmatprep.subr.bf16.mxu0 %v7565_v28  ;;  %5474 = vmatprep.subr.bf16.mxu1 %v7565_v28  ;;  %v4556_v21 = vsel %vm4465_vm9, %v4461_v8, 0 }
 0xd9e   : > { %5459 = vmatmul.mubr.msk.bf16.vlgmr.msra.gmra.mxu0 %vm4411_vm8, %v4456_v24  ;;  %5465 = vmatmul.mubr.msk.bf16.vlgmr.msra.gmra.mxu1 %vm4411_vm8, %v4457_v46 }
 0xd9f   : > { %5469 = vmatpush3.bf16.msra.mxu0 %v4556_v21  ;;  %5475 = vmatpush3.bf16.msra.mxu1 %v4556_v21 }
 0xda0   : > { %5470 = vmatprep.mubr.msk.bf16.mxu0 %vm5774_vm1, %v7565_v28  ;;  %5476 = vmatprep.mubr.msk.bf16.mxu1 %vm5774_vm1, %v7565_v28 }
 0xda1   : > { %5480 = vmatprep.subr.bf16.mxu0 %v7565_v28  ;;  %5488 = vmatprep.subr.bf16.mxu1 %v7565_v28 }
 0xda6   : > { %5471 = vmatmul.mubr.msk.bf16.vlgmr.msra.gmra.mxu0 %vm4411_vm8, %v4458_v23  ;;  %5477 = vmatmul.mubr.msk.bf16.vlgmr.msra.gmra.mxu1 %vm4411_vm8, %v4459_v43 }
 0xda7   : > { %5484 = vmatprep.mubr.msk.bf16.mxu0 %vm5774_vm1, %v7565_v28  ;;  %5492 = vmatprep.mubr.msk.bf16.mxu1 %vm5774_vm1, %v7565_v28 }
 0xda8   : > { %5481 = vmatpush3.bf16.msra.mxu0 %v5618_v50 }
 0xda9   : > { %5482 = vmatprep.subr.bf16.mxu0 %v7565_v28 }
 0xdac   : > { %5483 = vmatpush3.bf16.msra.mxu0 %v5619_v15 }
 0xdad   : > { %5496 = vmatprep.subr.bf16.mxu0 %v7565_v28 }
 0xe5e   : > { %v4503_v35 = vpop.f32.mrf.mxu0  ;;  %v4546_v27 = vpop.f32.mrf.mxu1 }
 0xe60   : > { %v5460_v13 = vpop.f32.mrf.mxu0  ;;  %v5466_v59 = vpop.f32.mrf.mxu1 }
 0xe62   : > { %v4506_v11 = vpop.f32.mrf.mxu0  ;;  %v4549_v17 = vpop.f32.mrf.mxu1 }
 0xe64   : > { %v5461_v41 = vpop.f32.mrf.mxu0  ;;  %v5467_v25 = vpop.f32.mrf.mxu1 }
 0xe65   : > { %v5620_v41 = vld [vmem:[%s7447_s21 + $0x8] sm:$0xff]   ;;  %v5621_v25 = vld [vmem:[%s7447_s21] sm:$0xff]  }
 0xe66   : > { %v4592_v63 = vpop.f32.mrf.mxu0  ;;  %v4635_v29 = vpop.f32.mrf.mxu1  ;;  %5489 = vmatpush3.bf16.msra.mxu1 %v5620_v41 }
 0xe67   : > { %v4641_v48 = vcombine.low %v4503_v35, %v4592_v63  ;;  %v4642_v16 = vcombine.high %v4503_v35, %v4592_v63  ;;  %v4657_v58 = vcombine.low %v4546_v27, %v4635_v29  ;;  %v4658_v62 = vcombine.high %v4546_v27, %v4635_v29  ;;  %5490 = vmatprep.subr.bf16.mxu1 %v7565_v28 }
 0xe68   : > { %v5472_v5 = vpop.f32.mrf.mxu0  ;;  %v5478_v3 = vpop.f32.mrf.mxu1 }
 0xe69   : > { %v4649_v10 = vrot.slane %v4641_v48, %v6477_v38  ;;  %v4656_v44 = vrot.slane %v4642_v16, %v6477_v38  ;;  %v4665_v12 = vrot.slane %v4657_v58, %v6477_v38  ;;  %v4672_v60 = vrot.slane %v4658_v62, %v6477_v38  ;;  %v5220_v16 = vld [vmem:[%s7446_s20] ss:$0 sm:$0xff]  ;;  %v5622_v3 = vld [vmem:[%s7652_s6 + $0x18] sm:$0xff]  }
 0xe6a   : > { %v4595_v14 = vpop.f32.mrf.mxu0  ;;  %v4638_v40 = vpop.f32.mrf.mxu1  ;;  %5491 = vmatpush3.bf16.msra.mxu1 %v5621_v25 }
 0xe6b   : > { %v4673_v57 = vcombine.low %v4649_v10, %v4665_v12  ;;  %v4674_v19 = vcombine.high %v4649_v10, %v4665_v12  ;;  %v4689_v52 = vcombine.low %v4656_v44, %v4672_v60  ;;  %v4690_v31 = vcombine.high %v4656_v44, %v4672_v60  ;;  %v5623_v10 = vld [vmem:[%s7652_s6 + $0x10] sm:$0xff]   ;;  %v5624_v44 = vld [vmem:[%s7652_s6 + $0x8] sm:$0xff]   ;;  %v5625_v12 = vld [vmem:[%s7652_s6] sm:$0xff]  }
 0xe6c   : > { %v5473_v61 = vpop.f32.mrf.mxu0  ;;  %v5479_v7 = vpop.f32.mrf.mxu1 }
 0xe6d   : > { %v4681_v34 = vrot.slane %v4673_v57, %v6480_v1  ;;  %v4688_v37 = vrot.slane %v4674_v19, %v6480_v1  ;;  %v4697_v45 = vrot.slane %v4689_v52, %v6480_v1  ;;  %v4704_v39 = vrot.slane %v4690_v31, %v6480_v1 }
 0xe6f   : > { %v4709_v53 = vcombine.low %v4681_v34, %v4688_v37  ;;  %v5215_v20 = vcombine.high %v4681_v34, %v4688_v37  ;;  %v4725_v22 = vcombine.low %v4697_v45, %v4704_v39  ;;  %v5216_v9 = vcombine.high %v4697_v45, %v4704_v39 }
 0xe71   : > { %v4716_v30 = vrot.slane %v4709_v53, %v6477_v38  ;;  %v4724_v47 = vrot.slane %v5215_v20, %v6477_v38  ;;  %v4732_v18 = vrot.slane %v4725_v22, %v6477_v38  ;;  %v4740_v4 = vrot.slane %v5216_v9, %v6477_v38 }
 0xe73   : > { %v4742_v55 = vcombine.high %v4716_v30, %v4724_v47  ;;  %v4758_v54 = vcombine.high %v4732_v18, %v4740_v4  ;;  %v4741_v49 = vcombine.low %v4716_v30, %v4724_v47  ;;  %v4757_v32 = vcombine.low %v4732_v18, %v4740_v4 }
 0xe75   : > { %v4756_v6 = vrot.slane %v4742_v55, %v6480_v1  ;;  %v4772_v42 = vrot.slane %v4758_v54, %v6480_v1  ;;  %v4749_v36 = vrot.slane %v4741_v49, %v6480_v1  ;;  %v4765_v2 = vrot.slane %v4757_v32, %v6480_v1 }
 0xe77   : > { %v4775_v38 = vcombine.low %v4756_v6, %v4772_v42  ;;  %v4774_v8 = vcombine.high %v4749_v36, %v4765_v2  ;;  %v4773_v51 = vcombine.low %v4749_v36, %v4765_v2  ;;  %v4776_v24 = vcombine.high %v4756_v6, %v4772_v42 }
 0xe79   : > { %4782 = vrot.lane.b32.xlu1 %v4775_v38, %s7649_s23  ;;  %4778 = vrot.lane.b32.xlu0 %v4774_v8, %s7650_s4  ;;  %s5231_s23 = sshll.u32 %s5008_s29, 7  ;;  %s781_s4 = scalar_lea.vmem [#allocation2], %s5143_s3 }
 0xe7a   : > { %s7373_s0 = scalar_lea.hbm %s7654_s28, %s5231_s23  ;;  %s5786_s3 = smov [#allocation2]  }
 0xe7b   : > { %s5683_s1 = sshll.u32 %s5786_s3, 4  ;;  %s5684_s1 = int_to_ptr.vmem [resolvable:$false] %s5683_s1 }
 0xe7c   : > { %s5685_s29 = scalar_lea.vmem %s5684_s1, 256 }
 0xe7d   : > { %4786 = vrot.lane.b32.xlu0 %v4776_v24, %s7651_s26  ;;  %s5012_s26 = sshll.u32 %s781_s4, 4  ;;  %s7375_s26 = int_to_ptr.vmem [resolvable:$true] %s5012_s26 }
 0xe7e   : > { %s5679_s5 = scalar_lea.vmem %s7375_s26, 128  ;;  %p5686_p4 = scmp.lt.s32.totalorder %s7375_s26, %s5684_s1 }
 0xe7f   : > { %p5680_p0 = scmp.ne.s32.totalorder %s7375_s26, %s5679_s5  ;;  %p5687_p5 = scmp.lt.s32.totalorder %s5685_s29, %s5679_s5 }
 0xe81   : > { %p5681_p1 = pnand %p5680_p0, %p5958_p3  ;;  %p5688_p6 = por %p5687_p5, %p5686_p4 }
 0xe83   : > { %p5682_p2 = pneg %p5681_p1 }
 0xe85   : > { %p5689_p7 = pnand %p5688_p6, %p5682_p2 }
 0xeeb   : > { %v4779_v46 = vpop.permute.xlu0 %4778  ;;  %v4783_v56 = vpop.permute.xlu1 %4782 }
 0xeec   : > { %v4789_v21 = vsel %vm2759_vm3, %v4773_v51, %v4779_v46 }
 0xeed   : > { %v4790_v33 = vsel %vm2955_vm5, %v4789_v21, %v4783_v56 }
 0xeef   : > { %v4787_v0 = vpop.permute.xlu0 %4786 }
 0xef0   : > { %v4791_v23 = vsel %vm3328_vm6, %v4790_v33, %v4787_v0 }
 0xef1   : > { %v4792_v1 = vpack.c.bf16 %v4791_v23, %v4791_v23 }
 0xef3   : > { %5485 = vmatmul.mubr.msk.bf16.vlgmr.msra.gmra.mxu0 %vm882_vm0, %v4792_v1 }
 0xef4   : > { %5504 = vmatprep.mubr.msk.bf16.mxu0 %vm5774_vm1, %v7565_v28  ;;  %5497 = vmatpush3.bf16.msra.mxu0 %v5622_v3 }
 0xef5   : > { %5498 = vmatprep.subr.bf16.mxu0 %v7565_v28 }
 0xef8   : > { %5499 = vmatpush3.bf16.msra.mxu0 %v5623_v10 }
 0xef9   : > { %5500 = vmatprep.subr.bf16.mxu0 %v7565_v28 }
 0xefc   : > { %5501 = vmatpush3.bf16.msra.mxu0 %v5624_v44 }
 0xefd   : > { %5502 = vmatprep.subr.bf16.mxu0 %v7565_v28 }
 0xf00   : > { %5503 = vmatpush3.bf16.msra.mxu0 %v5625_v12 }
 0xfb3   : > { %v4842_v43 = vpop.f32.mrf.mxu0 }
 0xfb4   : > { %v4848_v35 = vadd.f32 %v4842_v43, %v7111_v26 }
 0xfb5   : > { %v5486_v27 = vpop.f32.mrf.mxu0 }
 0xfb6   : > { %v4849_v13 = vmul.f32 %v4848_v35, %v4848_v35 }
 0xfb7   : > { %v4845_v59 = vpop.f32.mrf.mxu0 }
 0xfb8   : > { %v4850_v11 = vsel %vm882_vm0, %v4849_v13, 0.0 }
 0xfb9   : > { %4851 = vadd.xlane.f32.xlu1 %v4850_v11  ;;  %v5487_v17 = vpop.f32.mrf.mxu0 }
0x1042   : > { %v4852_v26 = vpop.xlane.xlu1 %4851 }
0x1043   : > { %v4853_v63 = vmul.f32 0.03125, %v4852_v26 }
0x1045   : > { %v4854_v29 = vadd.f32 1e-06, %v4853_v63 }
0x1047   : > { %5672 = vrsqrt.f32 %v4854_v29 }
0x1054   : > { %v5673_v48 = vpop.eup %5672 }
0x1055   : > { %v4856_v58 = vmul.f32 %v5673_v48, %v4848_v35 }
0x1057   : > { %v4863_v62 = vmul.f32 %v5220_v16, %v4856_v58 }
0x1059   : > { %v4864_v5 = vpack.c.bf16 %v4863_v62, %v4863_v62 }
0x105b   : > { %5493 = vmatmul.mubr.msk.bf16.vlgmr.msra.gmra.mxu1 %vm882_vm0, %v4864_v5 }
0x111b   : > { %v4914_v60 = vpop.f32.mrf.mxu1 }
0x111c   : > { %v4920_v14 = vsub.f32 0.0, %v4914_v60 }
0x111d   : > { %v5494_v40 = vpop.f32.mrf.mxu1 }
0x111e   : > { %v4921_v57 = vmul.f32 1.442695, %v4920_v14 }
0x111f   : > { %v4917_v19 = vpop.f32.mrf.mxu1 }
0x1120   : > { %5674 = vpow2.f32 %v4921_v57 }
0x1121   : > { %v5495_v52 = vpop.f32.mrf.mxu1 }
0x112d   : > { %v5675_v31 = vpop.eup %5674 }
0x112e   : > { %v4923_v61 = vadd.f32 1.0, %v5675_v31 }
0x1130   : > { %5676 = vrcp.f32 %v4923_v61 }
0x113d   : > { %v5677_v7 = vpop.eup %5676 }
0x113e   : > { %v4925_v50 = vmul.f32 %v5677_v7, %v4914_v60 }
0x1140   : > { %v4926_v34 = vpack.c.bf16 %v4925_v50, %v4925_v50 }
0x1142   : > { %5505 = vmatmul.mubr.msk.bf16.vlgmr.msra.gmra.mxu0 %vm3489_vm7, %v4926_v34 }
0x1202   : > { %v4988_v28 = vpop.f32.mrf.mxu0 }
0x1203   : > { %v4994_v37 = vadd.f32 %v4988_v28, %v4848_v35 }
0x1204   : > { %v5506_v45 = vpop.f32.mrf.mxu0 }
0x1205   : > { %4995 = vst.msk [vmem:[%s781_s4] sm:$0xff] %vm882_vm0, %v4994_v37 }
0x1206   : > { %v4991_v39 = vpop.f32.mrf.mxu0 }
0x1207   : > { %5692 = shalt.err (!%p5689_p7)
}
0x1208   : > { %s5693_s23 = scalar_lea.hbm %s7373_s0, 128  ;;  %s5697_s27 = scalar_lea.hbm %s7654_s28, 512 }
0x1209   : > { %p5694_p9 = scmp.ne.s32.totalorder %s7373_s0, %s5693_s23  ;;  %p5698_p12 = scmp.lt.s32.totalorder %s7373_s0, %s7654_s28 }
0x120a   : > { %p5699_p13 = scmp.lt.s32.totalorder %s5697_s27, %s5693_s23 }
0x120b   : > { %p5695_p10 = pnand %p5694_p9, %p5958_p3 }
0x120c   : > { %p5700_p0 = por %p5699_p13, %p5698_p12 }
0x120d   : > { %p5696_p11 = pneg %p5695_p10 }
0x120f   : > { %p5701_p1 = pnand %p5700_p0, %p5696_p11 }
0x1211   : > { %5704 = shalt.err (!%p5701_p1)
}
0x1212   : > { %5508 = dma.vmem_to_hbm [thread:$0]  (%p5958_p3), %s7375_s26, 128, %s7373_s0, %s4997_s25   ;;  %v5507_v53 = vpop.f32.mrf.mxu0 }
0x1213 PF: > { %s7655_s5 = sld [smem:[#allocation9_spill]] }
0x1214   : > { %s7656_s1 = sld [smem:[#allocation5_spill]] }
0x1219   : > { %p5514_p2 = scmp.ge.s32.totalorder %s7655_s5, 2 }
0x121a   : > { %s5024_s24 = sand.u32 1, %s7656_s1  }
0x121b   : > { %p5511_p4 = pnand %p5514_p2, %p5967_p8  ;;  %s5025_s4 = scalar_lea.sflag [#allocation3], %s5024_s24 }
0x121d   : > { %p5512_p5 = pneg %p5511_p4 }
0x121f   : > { %5738 = dma.done.wait (%p5512_p5), %s5025_s4, 128  }
0x1220   : > { %5740 = vsyncadd (%p5512_p5), %s5025_s4, 4294967168  ;;  %s36_s2 = sadd.s32 1, %s7655_s5   ;;  %s7658_s23 = sld [smem:[#allocation6_spill]] }
0x1221   : > { %p33_p6 = scmp.ge.s32.totalorder %s36_s2, 6   ;;  %s7659_s24 = sld [smem:[#allocation14_spill]] }
0x1222   : > { %s7660_s25 = sld [smem:[#allocation7_spill]]  ;;  %s7664_s4 = smov %s5747_s30 }
0x1223   : > { %s7661_s5 = sld [smem:[#allocation8_spill]]  ;;  %35 = sbr.rel (!%p33_p6) target bundleno = 16 (0x10), region = 159 }
0x1224   : > { %s7662_s1 = sld [smem:[#allocation10_spill]] }
0x1225   : > { %s7663_s26 = sld [smem:[#allocation12_spill]] }
0x1226   : > { %s7665_s30 = smov %s7658_s23 }
0x1228   :  { %5030 = vsyncpa [#allocation3], 1 }
0x1229   :  { %5032 = vsyncpa [#allocation3 + $0x1], 1 }

</bundles_post_ra>
